<compile_context>
chip_gen: v7x
topology: tpu7x:2x2x1
jax: 0.10.0
libtpu: 0.0.40
codegen_flags: <defaults>
</compile_context>

<pallas_src>
import functools

import jax
import jax.numpy as jnp
from jax.experimental import pallas as pl
from jax.experimental.pallas import tpu as pltpu


def _round_up(n, m):
    return ((n + m - 1) // m) * m


# ----------------------------------------------------------------------------
# Fused Pallas kernel
# ----------------------------------------------------------------------------
def _fused_forward_kernel(x_ref, wih_ref, whh_ref, bias_ref,
                          fc1w_hbm, fc1b_ref, fc2w_hbm, fc2b_ref,
                          out_ref,
                          seq_ref, pre_ref, fc1w_vmem, fc2w_vmem, dma_sem):
    """Entire RecurrentModel forward, fully VMEM-resident compute.

    x_ref     : (T, Bp, P)   time-major input, zero-padded (lanes >= D are 0)
    wih_ref   : (L, P, P)    per-layer W_ih^T, zero-padded
    whh_ref   : (L, P, P)    per-layer W_hh^T, zero-padded
    bias_ref  : (L, 1, P)    per-layer (b_ih + b_hh), zero-padded
    fc1w_hbm  : (P, Fp)      fc1 weight^T in HBM (manual DMA)
    fc1b_ref  : (1, Fp)
    fc2w_hbm  : (Fp, Cp)     fc2 weight^T in HBM (manual DMA)
    fc2b_ref  : (1, Cp)
    out_ref   : (Bp, Cp)     padded logits (lanes >= C are 0)
    seq_ref   : VMEM (T, Bp, P) scratch: a layer's output sequence
    pre_ref   : VMEM (T, Bp, P) scratch: hoisted input projection + bias
    fc1w_vmem : VMEM (P, Fp)    landing buffer for fc1 weight DMA
    fc2w_vmem : VMEM (Fp, Cp)   landing buffer for fc2 weight DMA
    dma_sem   : DMA semaphores (2,)
    """
    T, Bp, P = x_ref.shape
    num_layers = wih_ref.shape[0]

    # Kick off the ~4 MiB head-weight DMAs immediately; they complete behind
    # the serial T*L recurrence instead of serializing in front of it.
    fc1_cp = pltpu.make_async_copy(fc1w_hbm, fc1w_vmem, dma_sem.at[0])
    fc2_cp = pltpu.make_async_copy(fc2w_hbm, fc2w_vmem, dma_sem.at[1])
    fc1_cp.start()
    fc2_cp.start()

    h_last = jnp.zeros((Bp, P), jnp.float32)
    for layer in range(num_layers):                 # static Python unroll
        # ---- Hoisted input projection + bias: ONE (T*Bp, P) x (P, P) matmul
        #      per layer, written to pre_ref.  The time loop then only carries
        #      the K=P recurrent dot on its critical path.
        src = x_ref if layer == 0 else seq_ref
        src2d = src[...].reshape(T * Bp, P)
        pre = jnp.dot(src2d, wih_ref[layer],
                      preferred_element_type=jnp.float32) + bias_ref[layer]
        pre_ref[...] = pre.reshape(T, Bp, P)

        whh = whh_ref[layer]                        # (P, P) = 16 vregs: OK to hold
        write_seq = layer < num_layers - 1          # last layer only needs h_T

        def step(t, h, whh=whh, write_seq=write_seq):
            h_new = jnp.tanh(
                pre_ref[t]
                + jnp.dot(h, whh, preferred_element_type=jnp.float32))
            if write_seq:
                seq_ref[t] = h_new                  # input sequence for next layer
            return h_new

        unroll = True if T <= 16 else 8             # bound code size / vreg pressure
        h_last = jax.lax.fori_loop(0, T, step,
                                   jnp.zeros((Bp, P), jnp.float32),
                                   unroll=unroll)

    # ---- MLP head, fused in the same kernel (weights arrived during the RNN) ----
    fc1_cp.wait()
    fc2_cp.wait()
    h = jnp.maximum(h_last, 0.0)
    a = jnp.dot(h, fc1w_vmem[...], preferred_element_type=jnp.float32) + fc1b_ref[...]
    a = jnp.maximum(a, 0.0)
    y = jnp.dot(a, fc2w_vmem[...], preferred_element_type=jnp.float32) + fc2b_ref[...]
    out_ref[...] = y.astype(out_ref.dtype)


def _fused_forward(x_tbp, prep):
    """x_tbp: (T, Bp, P) padded time-major input. Returns (Bp, Cp) padded logits."""
    T, Bp, P = x_tbp.shape
    Fp = prep["fc1w_t"].shape[1]
    Cp = prep["fc2w_t"].shape[1]
    vmem = pltpu.MemorySpace.VMEM
    return pl.pallas_call(
        _fused_forward_kernel,
        out_shape=jax.ShapeDtypeStruct((Bp, Cp), x_tbp.dtype),
        in_specs=[
            pl.BlockSpec(memory_space=vmem),    # x (time-major, padded)
            pl.BlockSpec(memory_space=vmem),    # W_ih^T stack
            pl.BlockSpec(memory_space=vmem),    # W_hh^T stack
            pl.BlockSpec(memory_space=vmem),    # bias stack
            pl.BlockSpec(memory_space=pl.ANY),  # fc1 weight: stays in HBM, manual DMA
            pl.BlockSpec(memory_space=vmem),    # fc1 bias
            pl.BlockSpec(memory_space=pl.ANY),  # fc2 weight: stays in HBM, manual DMA
            pl.BlockSpec(memory_space=vmem),    # fc2 bias
        ],
        out_specs=pl.BlockSpec(memory_space=vmem),
        scratch_shapes=[
            pltpu.VMEM((T, Bp, P), jnp.float32),   # seq_ref (layer output sequence)
            pltpu.VMEM((T, Bp, P), jnp.float32),   # pre_ref (hoisted projection)
            pltpu.VMEM((P, Fp), jnp.float32),      # fc1 weight landing buffer
            pltpu.VMEM((Fp, Cp), jnp.float32),     # fc2 weight landing buffer
            pltpu.SemaphoreType.DMA((2,)),
        ],
        compiler_params=pltpu.CompilerParams(
            # Actual footprint ~4.5 MiB (2x 2 MiB head-weight buffers dominate);
            # 8 MiB leaves headroom and stays under v5e's 16 MiB default scope.
            vmem_limit_bytes=8 * 1024 * 1024,
        ),
    )(x_tbp, prep["w_ih"], prep["w_hh"], prep["bias"],
      prep["fc1w_t"], prep["fc1b"], prep["fc2w_t"], prep["fc2b"])


# ----------------------------------------------------------------------------
# One-time parameter layout prep (transpose / stack / zero-pad)
# ----------------------------------------------------------------------------
def prepare_params(params):
    rnn = params["rnn"]
    L = len(rnn)
    d_ins = [p["w_ih"].shape[1] for p in rnn]
    H = rnn[0]["w_hh"].shape[0]
    # One lane width P for both the x-slot and the h-slot of every layer.
    P = max(128, _round_up(max(d_ins + [H]), 128))

    w_ih = jnp.zeros((L, P, P), jnp.float32)
    w_hh = jnp.zeros((L, P, P), jnp.float32)
    bias = jnp.zeros((L, 1, P), jnp.float32)
    for l, p in enumerate(rnn):
        d_in = p["w_ih"].shape[1]
        w_ih = w_ih.at[l, :d_in, :H].set(p["w_ih"].T)
        w_hh = w_hh.at[l, :H, :H].set(p["w_hh"].T)
        bias = bias.at[l, 0, :H].set(p["b_ih"] + p["b_hh"])

    F = params["fc1_w"].shape[0]
    C = params["fc2_w"].shape[0]
    Fp = max(128, _round_up(F, 128))
    Cp = max(128, _round_up(C, 128))

    # Kept f32 to hold the 1e-4-level tolerance; bf16 head weights would halve
    # the (now hidden) DMA traffic if tolerance can be relaxed.
    fc1w_t = jnp.zeros((P, Fp), jnp.float32).at[:H, :F].set(params["fc1_w"].T)
    fc1b = jnp.zeros((1, Fp), jnp.float32).at[0, :F].set(params["fc1_b"])
    fc2w_t = jnp.zeros((Fp, Cp), jnp.float32).at[:F, :C].set(params["fc2_w"].T)
    fc2b = jnp.zeros((1, Cp), jnp.float32).at[0, :C].set(params["fc2_b"])

    return {"w_ih": w_ih, "w_hh": w_hh, "bias": bias,
            "fc1w_t": fc1w_t, "fc1b": fc1b,
            "fc2w_t": fc2w_t, "fc2b": fc2b}


# ----------------------------------------------------------------------------
# Forward wrapper
# ----------------------------------------------------------------------------
@functools.partial(jax.jit, static_argnames=("num_classes",))
def recurrent_model_forward(x, prep, *, num_classes):
    """x: (B, T, input_size) batch_first, like the PyTorch module."""
    B, T, D = x.shape
    P = prep["w_ih"].shape[2]
    Bp = _round_up(max(B, 8), 8)
    # Time-major + zero-pad to full (8,128) vregs.  Negligible extra copy at
    # (8,8,128);  TODO(synk): stage the pad inside the kernel if T*B*D grows.
    xt = jnp.transpose(x, (1, 0, 2)).astype(jnp.float32)     # (T, B, D)
    xt = jnp.pad(xt, ((0, 0), (0, Bp - B), (0, P - D)))      # (T, Bp, P)
    out = _fused_forward(xt, prep)
    return out[:B, :num_classes]


# ----------------------------------------------------------------------------
# Deterministic parameter init (PyTorch-style U(-1/sqrt(H), 1/sqrt(H)))
# ----------------------------------------------------------------------------
def init_params(key, input_size, hidden_size, num_layers, num_classes):
    fc_hidden = 1024 * 4
    params = {"rnn": []}
    k = 1.0 / jnp.sqrt(hidden_size)
    for layer in range(num_layers):
        d_in = input_size if layer == 0 else hidden_size
        key, k1, k2, k3, k4 = jax.random.split(key, 5)
        params["rnn"].append({
            "w_ih": jax.random.uniform(k1, (hidden_size, d_in), jnp.float32, -k, k),
            "w_hh": jax.random.uniform(k2, (hidden_size, hidden_size), jnp.float32, -k, k),
            "b_ih": jax.random.uniform(k3, (hidden_size,), jnp.float32, -k, k),
            "b_hh": jax.random.uniform(k4, (hidden_size,), jnp.float32, -k, k),
        })
    key, k1, k2, k3, k4 = jax.random.split(key, 5)
    kf1 = 1.0 / jnp.sqrt(hidden_size)
    kf2 = 1.0 / jnp.sqrt(fc_hidden)
    params["fc1_w"] = jax.random.uniform(k1, (fc_hidden, hidden_size), jnp.float32, -kf1, kf1)
    params["fc1_b"] = jax.random.uniform(k2, (fc_hidden,), jnp.float32, -kf1, kf1)
    params["fc2_w"] = jax.random.uniform(k3, (num_classes, fc_hidden), jnp.float32, -kf2, kf2)
    params["fc2_b"] = jax.random.uniform(k4, (num_classes,), jnp.float32, -kf2, kf2)
    return params


# ----------------------------------------------------------------------------
# Pure-JAX reference (for correctness check)
# ----------------------------------------------------------------------------
def reference_forward(x, params, num_layers):
    h_seq = x  # (B, T, D)
    B = x.shape[0]
    for layer in range(num_layers):
        p = params["rnn"][layer]
        H = p["w_hh"].shape[0]

        def step(h, x_t, p=p):
            h_new = jnp.tanh(x_t @ p["w_ih"].T + h @ p["w_hh"].T + p["b_ih"] + p["b_hh"])
            return h_new, h_new

        _, outs = jax.lax.scan(step, jnp.zeros((B, H), x.dtype),
                               jnp.transpose(h_seq, (1, 0, 2)))
        h_seq = jnp.transpose(outs, (1, 0, 2))
    out = jnp.maximum(h_seq[:, -1, :], 0.0)
    out = jnp.maximum(out @ params["fc1_w"].T + params["fc1_b"], 0.0)
    return out @ params["fc2_w"].T + params["fc2_b"]


# ----------------------------------------------------------------------------
if __name__ == "__main__":
    # Small shapes consistent with the module: seq=8, input=16, hidden=32
    batch, seq_len = 2, 8
    input_size, hidden_size, num_layers, num_classes = 16, 32, 2, 10

    key = jax.random.PRNGKey(0)
    key, pkey, xkey = jax.random.split(key, 3)
    params = init_params(pkey, input_size, hidden_size, num_layers, num_classes)
    prep = prepare_params(params)          # one-time weight layout prep
    x = jax.random.normal(xkey, (batch, seq_len, input_size), jnp.float32)

    out = recurrent_model_forward(x, prep, num_classes=num_classes)
    out = jax.block_until_ready(out)

    ref = reference_forward(x, params, num_layers)
    assert out.shape == (batch, num_classes)
    assert jnp.allclose(out, ref, atol=2e-4, rtol=2e-4), "mismatch vs JAX reference"

    print("KERNEL_OK")
</pallas_src>

<mosaic_0001>
module attributes {stable_mosaic.version = 11 : i64} {
  func.func @_fused_forward_kernel(%arg0: memref<8x8x128xf32, #tpu.memory_space<vmem>>, %arg1: memref<2x128x128xf32, #tpu.memory_space<vmem>>, %arg2: memref<2x128x128xf32, #tpu.memory_space<vmem>>, %arg3: memref<2x1x128xf32, #tpu.memory_space<vmem>>, %arg4: memref<128x4096xf32, #tpu.memory_space<any>>, %arg5: memref<1x4096xf32, #tpu.memory_space<vmem>>, %arg6: memref<4096x128xf32, #tpu.memory_space<any>>, %arg7: memref<1x128xf32, #tpu.memory_space<vmem>>, %arg8: memref<8x128xf32, #tpu.memory_space<vmem>>, %arg9: memref<8x8x128xf32, #tpu.memory_space<vmem>>, %arg10: memref<8x8x128xf32, #tpu.memory_space<vmem>>, %arg11: memref<128x4096xf32, #tpu.memory_space<vmem>>, %arg12: memref<4096x128xf32, #tpu.memory_space<vmem>>, %arg13: memref<2x!tpu.dma_semaphore, #tpu.memory_space<semaphore_mem>>) attributes {dimension_semantics = [], scalar_prefetch = 0 : i64, scratch_operands = 5 : i64, tpu.core_type = #tpu.core_type<tc>} {
    %c0_i32 = arith.constant 0 : i32
    %0 = tpu.memref_slice %arg13[%c0_i32] : memref<2x!tpu.dma_semaphore, #tpu.memory_space<semaphore_mem>> -> memref<1x!tpu.dma_semaphore, #tpu.memory_space<semaphore_mem>>
    %1 = tpu.memref_squeeze %0 : memref<1x!tpu.dma_semaphore, #tpu.memory_space<semaphore_mem>> -> memref<!tpu.dma_semaphore, #tpu.memory_space<semaphore_mem>>
    tpu.enqueue_dma source(%arg4 : memref<128x4096xf32, #tpu.memory_space<any>>) target(%arg11 : memref<128x4096xf32, #tpu.memory_space<vmem>>) target_semaphore(%1 : memref<!tpu.dma_semaphore, #tpu.memory_space<semaphore_mem>>)
    %c1_i32 = arith.constant 1 : i32
    %2 = tpu.memref_slice %arg13[%c1_i32] : memref<2x!tpu.dma_semaphore, #tpu.memory_space<semaphore_mem>> -> memref<1x!tpu.dma_semaphore, #tpu.memory_space<semaphore_mem>>
    %3 = tpu.memref_squeeze %2 : memref<1x!tpu.dma_semaphore, #tpu.memory_space<semaphore_mem>> -> memref<!tpu.dma_semaphore, #tpu.memory_space<semaphore_mem>>
    tpu.enqueue_dma source(%arg6 : memref<4096x128xf32, #tpu.memory_space<any>>) target(%arg12 : memref<4096x128xf32, #tpu.memory_space<vmem>>) target_semaphore(%3 : memref<!tpu.dma_semaphore, #tpu.memory_space<semaphore_mem>>)
    %c0 = arith.constant 0 : index
    %c0_0 = arith.constant 0 : index
    %c0_1 = arith.constant 0 : index
    %4 = vector.load %arg0[%c0, %c0_0, %c0_1] : memref<8x8x128xf32, #tpu.memory_space<vmem>>, vector<8x8x128xf32>
    %5 = vector.shape_cast %4 : vector<8x8x128xf32> to vector<64x128xf32>
    %c0_2 = arith.constant 0 : index
    %c0_3 = arith.constant 0 : index
    %c0_4 = arith.constant 0 : index
    %6 = vector.load %arg1[%c0_2, %c0_3, %c0_4] : memref<2x128x128xf32, #tpu.memory_space<vmem>>, vector<1x128x128xf32>
    %7 = vector.shape_cast %6 : vector<1x128x128xf32> to vector<128x128xf32>
    %cst = arith.constant dense<0.000000e+00> : vector<64x128xf32>
    %8 = tpu.matmul %5, %7, %cst {dimension_numbers = #tpu.dot_dimension_numbers<[1], [0], [0], [1], [0, 0, 1, 1], [], []>} : vector<64x128xf32>, vector<128x128xf32>, vector<64x128xf32> -> vector<64x128xf32>
    %c0_5 = arith.constant 0 : index
    %c0_6 = arith.constant 0 : index
    %c0_7 = arith.constant 0 : index
    %9 = vector.load %arg3[%c0_5, %c0_6, %c0_7] : memref<2x1x128xf32, #tpu.memory_space<vmem>>, vector<1x1x128xf32>
    %10 = vector.shape_cast %9 : vector<1x1x128xf32> to vector<1x128xf32>
    %11 = vector.broadcast %10 : vector<1x128xf32> to vector<64x128xf32>
    %12 = arith.addf %8, %11 : vector<64x128xf32>
    %13 = vector.shape_cast %12 : vector<64x128xf32> to vector<8x8x128xf32>
    %c0_8 = arith.constant 0 : index
    %c0_9 = arith.constant 0 : index
    %c0_10 = arith.constant 0 : index
    %14 = vector.load %arg10[%c0_8, %c0_9, %c0_10] : memref<8x8x128xf32, #tpu.memory_space<vmem>>, vector<8x8x128xf32>
    tpu.vector_store %arg10[%c0_8, %c0_9, %c0_10], %13 {strides = array<i32>} : memref<8x8x128xf32, #tpu.memory_space<vmem>>, vector<8x8x128xf32>,
    %c0_11 = arith.constant 0 : index
    %c0_12 = arith.constant 0 : index
    %c0_13 = arith.constant 0 : index
    %15 = vector.load %arg2[%c0_11, %c0_12, %c0_13] : memref<2x128x128xf32, #tpu.memory_space<vmem>>, vector<1x128x128xf32>
    %16 = vector.shape_cast %15 : vector<1x128x128xf32> to vector<128x128xf32>
    %cst_14 = arith.constant 0.000000e+00 : f32
    %17 = vector.broadcast %cst_14 : f32 to vector<8x128xf32>
    %c0_i32_15 = arith.constant 0 : i32
    %18 = arith.index_cast %c0_i32_15 : i32 to index
    %c0_16 = arith.constant 0 : index
    %c0_17 = arith.constant 0 : index
    %19 = vector.load %arg10[%18, %c0_16, %c0_17] : memref<8x8x128xf32, #tpu.memory_space<vmem>>, vector<1x8x128xf32>
    %20 = vector.shape_cast %19 : vector<1x8x128xf32> to vector<8x128xf32>
    %cst_18 = arith.constant dense<0.000000e+00> : vector<8x128xf32>
    %21 = tpu.matmul %17, %16, %cst_18 {dimension_numbers = #tpu.dot_dimension_numbers<[1], [0], [0], [1], [0, 0, 1, 1], [], []>} : vector<8x128xf32>, vector<128x128xf32>, vector<8x128xf32> -> vector<8x128xf32>
    %22 = arith.addf %20, %21 : vector<8x128xf32>
    %23 = math.tanh %22 : vector<8x128xf32>
    %24 = arith.index_cast %c0_i32_15 : i32 to index
    %c0_19 = arith.constant 0 : index
    %c0_20 = arith.constant 0 : index
    %25 = vector.load %arg9[%24, %c0_19, %c0_20] : memref<8x8x128xf32, #tpu.memory_space<vmem>>, vector<1x8x128xf32>
    %26 = vector.shape_cast %25 : vector<1x8x128xf32> to vector<8x128xf32>
    %27 = vector.shape_cast %23 : vector<8x128xf32> to vector<1x8x128xf32>
    tpu.vector_store %arg9[%24, %c0_19, %c0_20], %27 {strides = array<i32>} : memref<8x8x128xf32, #tpu.memory_space<vmem>>, vector<1x8x128xf32>,
    %c1_i32_21 = arith.constant 1 : i32
    %28 = arith.index_cast %c1_i32_21 : i32 to index
    %c0_22 = arith.constant 0 : index
    %c0_23 = arith.constant 0 : index
    %29 = vector.load %arg10[%28, %c0_22, %c0_23] : memref<8x8x128xf32, #tpu.memory_space<vmem>>, vector<1x8x128xf32>
    %30 = vector.shape_cast %29 : vector<1x8x128xf32> to vector<8x128xf32>
    %cst_24 = arith.constant dense<0.000000e+00> : vector<8x128xf32>
    %31 = tpu.matmul %23, %16, %cst_24 {dimension_numbers = #tpu.dot_dimension_numbers<[1], [0], [0], [1], [0, 0, 1, 1], [], []>} : vector<8x128xf32>, vector<128x128xf32>, vector<8x128xf32> -> vector<8x128xf32>
    %32 = arith.addf %30, %31 : vector<8x128xf32>
    %33 = math.tanh %32 : vector<8x128xf32>
    %34 = arith.index_cast %c1_i32_21 : i32 to index
    %c0_25 = arith.constant 0 : index
    %c0_26 = arith.constant 0 : index
    %35 = vector.load %arg9[%34, %c0_25, %c0_26] : memref<8x8x128xf32, #tpu.memory_space<vmem>>, vector<1x8x128xf32>
    %36 = vector.shape_cast %35 : vector<1x8x128xf32> to vector<8x128xf32>
    %37 = vector.shape_cast %33 : vector<8x128xf32> to vector<1x8x128xf32>
    tpu.vector_store %arg9[%34, %c0_25, %c0_26], %37 {strides = array<i32>} : memref<8x8x128xf32, #tpu.memory_space<vmem>>, vector<1x8x128xf32>,
    %c2_i32 = arith.constant 2 : i32
    %38 = arith.index_cast %c2_i32 : i32 to index
    %c0_27 = arith.constant 0 : index
    %c0_28 = arith.constant 0 : index
    %39 = vector.load %arg10[%38, %c0_27, %c0_28] : memref<8x8x128xf32, #tpu.memory_space<vmem>>, vector<1x8x128xf32>
    %40 = vector.shape_cast %39 : vector<1x8x128xf32> to vector<8x128xf32>
    %cst_29 = arith.constant dense<0.000000e+00> : vector<8x128xf32>
    %41 = tpu.matmul %33, %16, %cst_29 {dimension_numbers = #tpu.dot_dimension_numbers<[1], [0], [0], [1], [0, 0, 1, 1], [], []>} : vector<8x128xf32>, vector<128x128xf32>, vector<8x128xf32> -> vector<8x128xf32>
    %42 = arith.addf %40, %41 : vector<8x128xf32>
    %43 = math.tanh %42 : vector<8x128xf32>
    %44 = arith.index_cast %c2_i32 : i32 to index
    %c0_30 = arith.constant 0 : index
    %c0_31 = arith.constant 0 : index
    %45 = vector.load %arg9[%44, %c0_30, %c0_31] : memref<8x8x128xf32, #tpu.memory_space<vmem>>, vector<1x8x128xf32>
    %46 = vector.shape_cast %45 : vector<1x8x128xf32> to vector<8x128xf32>
    %47 = vector.shape_cast %43 : vector<8x128xf32> to vector<1x8x128xf32>
    tpu.vector_store %arg9[%44, %c0_30, %c0_31], %47 {strides = array<i32>} : memref<8x8x128xf32, #tpu.memory_space<vmem>>, vector<1x8x128xf32>,
    %c3_i32 = arith.constant 3 : i32
    %48 = arith.index_cast %c3_i32 : i32 to index
    %c0_32 = arith.constant 0 : index
    %c0_33 = arith.constant 0 : index
    %49 = vector.load %arg10[%48, %c0_32, %c0_33] : memref<8x8x128xf32, #tpu.memory_space<vmem>>, vector<1x8x128xf32>
    %50 = vector.shape_cast %49 : vector<1x8x128xf32> to vector<8x128xf32>
    %cst_34 = arith.constant dense<0.000000e+00> : vector<8x128xf32>
    %51 = tpu.matmul %43, %16, %cst_34 {dimension_numbers = #tpu.dot_dimension_numbers<[1], [0], [0], [1], [0, 0, 1, 1], [], []>} : vector<8x128xf32>, vector<128x128xf32>, vector<8x128xf32> -> vector<8x128xf32>
    %52 = arith.addf %50, %51 : vector<8x128xf32>
    %53 = math.tanh %52 : vector<8x128xf32>
    %54 = arith.index_cast %c3_i32 : i32 to index
    %c0_35 = arith.constant 0 : index
    %c0_36 = arith.constant 0 : index
    %55 = vector.load %arg9[%54, %c0_35, %c0_36] : memref<8x8x128xf32, #tpu.memory_space<vmem>>, vector<1x8x128xf32>
    %56 = vector.shape_cast %55 : vector<1x8x128xf32> to vector<8x128xf32>
    %57 = vector.shape_cast %53 : vector<8x128xf32> to vector<1x8x128xf32>
    tpu.vector_store %arg9[%54, %c0_35, %c0_36], %57 {strides = array<i32>} : memref<8x8x128xf32, #tpu.memory_space<vmem>>, vector<1x8x128xf32>,
    %c4_i32 = arith.constant 4 : i32
    %58 = arith.index_cast %c4_i32 : i32 to index
    %c0_37 = arith.constant 0 : index
    %c0_38 = arith.constant 0 : index
    %59 = vector.load %arg10[%58, %c0_37, %c0_38] : memref<8x8x128xf32, #tpu.memory_space<vmem>>, vector<1x8x128xf32>
    %60 = vector.shape_cast %59 : vector<1x8x128xf32> to vector<8x128xf32>
    %cst_39 = arith.constant dense<0.000000e+00> : vector<8x128xf32>
    %61 = tpu.matmul %53, %16, %cst_39 {dimension_numbers = #tpu.dot_dimension_numbers<[1], [0], [0], [1], [0, 0, 1, 1], [], []>} : vector<8x128xf32>, vector<128x128xf32>, vector<8x128xf32> -> vector<8x128xf32>
    %62 = arith.addf %60, %61 : vector<8x128xf32>
    %63 = math.tanh %62 : vector<8x128xf32>
    %64 = arith.index_cast %c4_i32 : i32 to index
    %c0_40 = arith.constant 0 : index
    %c0_41 = arith.constant 0 : index
    %65 = vector.load %arg9[%64, %c0_40, %c0_41] : memref<8x8x128xf32, #tpu.memory_space<vmem>>, vector<1x8x128xf32>
    %66 = vector.shape_cast %65 : vector<1x8x128xf32> to vector<8x128xf32>
    %67 = vector.shape_cast %63 : vector<8x128xf32> to vector<1x8x128xf32>
    tpu.vector_store %arg9[%64, %c0_40, %c0_41], %67 {strides = array<i32>} : memref<8x8x128xf32, #tpu.memory_space<vmem>>, vector<1x8x128xf32>,
    %c5_i32 = arith.constant 5 : i32
    %68 = arith.index_cast %c5_i32 : i32 to index
    %c0_42 = arith.constant 0 : index
    %c0_43 = arith.constant 0 : index
    %69 = vector.load %arg10[%68, %c0_42, %c0_43] : memref<8x8x128xf32, #tpu.memory_space<vmem>>, vector<1x8x128xf32>
    %70 = vector.shape_cast %69 : vector<1x8x128xf32> to vector<8x128xf32>
    %cst_44 = arith.constant dense<0.000000e+00> : vector<8x128xf32>
    %71 = tpu.matmul %63, %16, %cst_44 {dimension_numbers = #tpu.dot_dimension_numbers<[1], [0], [0], [1], [0, 0, 1, 1], [], []>} : vector<8x128xf32>, vector<128x128xf32>, vector<8x128xf32> -> vector<8x128xf32>
    %72 = arith.addf %70, %71 : vector<8x128xf32>
    %73 = math.tanh %72 : vector<8x128xf32>
    %74 = arith.index_cast %c5_i32 : i32 to index
    %c0_45 = arith.constant 0 : index
    %c0_46 = arith.constant 0 : index
    %75 = vector.load %arg9[%74, %c0_45, %c0_46] : memref<8x8x128xf32, #tpu.memory_space<vmem>>, vector<1x8x128xf32>
    %76 = vector.shape_cast %75 : vector<1x8x128xf32> to vector<8x128xf32>
    %77 = vector.shape_cast %73 : vector<8x128xf32> to vector<1x8x128xf32>
    tpu.vector_store %arg9[%74, %c0_45, %c0_46], %77 {strides = array<i32>} : memref<8x8x128xf32, #tpu.memory_space<vmem>>, vector<1x8x128xf32>,
    %c6_i32 = arith.constant 6 : i32
    %78 = arith.index_cast %c6_i32 : i32 to index
    %c0_47 = arith.constant 0 : index
    %c0_48 = arith.constant 0 : index
    %79 = vector.load %arg10[%78, %c0_47, %c0_48] : memref<8x8x128xf32, #tpu.memory_space<vmem>>, vector<1x8x128xf32>
    %80 = vector.shape_cast %79 : vector<1x8x128xf32> to vector<8x128xf32>
    %cst_49 = arith.constant dense<0.000000e+00> : vector<8x128xf32>
    %81 = tpu.matmul %73, %16, %cst_49 {dimension_numbers = #tpu.dot_dimension_numbers<[1], [0], [0], [1], [0, 0, 1, 1], [], []>} : vector<8x128xf32>, vector<128x128xf32>, vector<8x128xf32> -> vector<8x128xf32>
    %82 = arith.addf %80, %81 : vector<8x128xf32>
    %83 = math.tanh %82 : vector<8x128xf32>
    %84 = arith.index_cast %c6_i32 : i32 to index
    %c0_50 = arith.constant 0 : index
    %c0_51 = arith.constant 0 : index
    %85 = vector.load %arg9[%84, %c0_50, %c0_51] : memref<8x8x128xf32, #tpu.memory_space<vmem>>, vector<1x8x128xf32>
    %86 = vector.shape_cast %85 : vector<1x8x128xf32> to vector<8x128xf32>
    %87 = vector.shape_cast %83 : vector<8x128xf32> to vector<1x8x128xf32>
    tpu.vector_store %arg9[%84, %c0_50, %c0_51], %87 {strides = array<i32>} : memref<8x8x128xf32, #tpu.memory_space<vmem>>, vector<1x8x128xf32>,
    %c7_i32 = arith.constant 7 : i32
    %88 = arith.index_cast %c7_i32 : i32 to index
    %c0_52 = arith.constant 0 : index
    %c0_53 = arith.constant 0 : index
    %89 = vector.load %arg10[%88, %c0_52, %c0_53] : memref<8x8x128xf32, #tpu.memory_space<vmem>>, vector<1x8x128xf32>
    %90 = vector.shape_cast %89 : vector<1x8x128xf32> to vector<8x128xf32>
    %cst_54 = arith.constant dense<0.000000e+00> : vector<8x128xf32>
    %91 = tpu.matmul %83, %16, %cst_54 {dimension_numbers = #tpu.dot_dimension_numbers<[1], [0], [0], [1], [0, 0, 1, 1], [], []>} : vector<8x128xf32>, vector<128x128xf32>, vector<8x128xf32> -> vector<8x128xf32>
    %92 = arith.addf %90, %91 : vector<8x128xf32>
    %93 = math.tanh %92 : vector<8x128xf32>
    %94 = arith.index_cast %c7_i32 : i32 to index
    %c0_55 = arith.constant 0 : index
    %c0_56 = arith.constant 0 : index
    %95 = vector.load %arg9[%94, %c0_55, %c0_56] : memref<8x8x128xf32, #tpu.memory_space<vmem>>, vector<1x8x128xf32>
    %96 = vector.shape_cast %95 : vector<1x8x128xf32> to vector<8x128xf32>
    %97 = vector.shape_cast %93 : vector<8x128xf32> to vector<1x8x128xf32>
    tpu.vector_store %arg9[%94, %c0_55, %c0_56], %97 {strides = array<i32>} : memref<8x8x128xf32, #tpu.memory_space<vmem>>, vector<1x8x128xf32>,
    %c8_i32 = arith.constant 8 : i32
    %c0_57 = arith.constant 0 : index
    %c0_58 = arith.constant 0 : index
    %c0_59 = arith.constant 0 : index
    %98 = vector.load %arg9[%c0_57, %c0_58, %c0_59] : memref<8x8x128xf32, #tpu.memory_space<vmem>>, vector<8x8x128xf32>
    %99 = vector.shape_cast %98 : vector<8x8x128xf32> to vector<64x128xf32>
    %c1 = arith.constant 1 : index
    %c0_60 = arith.constant 0 : index
    %c0_61 = arith.constant 0 : index
    %100 = vector.load %arg1[%c1, %c0_60, %c0_61] : memref<2x128x128xf32, #tpu.memory_space<vmem>>, vector<1x128x128xf32>
    %101 = vector.shape_cast %100 : vector<1x128x128xf32> to vector<128x128xf32>
    %cst_62 = arith.constant dense<0.000000e+00> : vector<64x128xf32>
    %102 = tpu.matmul %99, %101, %cst_62 {dimension_numbers = #tpu.dot_dimension_numbers<[1], [0], [0], [1], [0, 0, 1, 1], [], []>} : vector<64x128xf32>, vector<128x128xf32>, vector<64x128xf32> -> vector<64x128xf32>
    %c1_63 = arith.constant 1 : index
    %c0_64 = arith.constant 0 : index
    %c0_65 = arith.constant 0 : index
    %103 = vector.load %arg3[%c1_63, %c0_64, %c0_65] : memref<2x1x128xf32, #tpu.memory_space<vmem>>, vector<1x1x128xf32>
    %104 = vector.shape_cast %103 : vector<1x1x128xf32> to vector<1x128xf32>
    %105 = vector.broadcast %104 : vector<1x128xf32> to vector<64x128xf32>
    %106 = arith.addf %102, %105 : vector<64x128xf32>
    %107 = vector.shape_cast %106 : vector<64x128xf32> to vector<8x8x128xf32>
    %c0_66 = arith.constant 0 : index
    %c0_67 = arith.constant 0 : index
    %c0_68 = arith.constant 0 : index
    %108 = vector.load %arg10[%c0_66, %c0_67, %c0_68] : memref<8x8x128xf32, #tpu.memory_space<vmem>>, vector<8x8x128xf32>
    tpu.vector_store %arg10[%c0_66, %c0_67, %c0_68], %107 {strides = array<i32>} : memref<8x8x128xf32, #tpu.memory_space<vmem>>, vector<8x8x128xf32>,
    %c1_69 = arith.constant 1 : index
    %c0_70 = arith.constant 0 : index
    %c0_71 = arith.constant 0 : index
    %109 = vector.load %arg2[%c1_69, %c0_70, %c0_71] : memref<2x128x128xf32, #tpu.memory_space<vmem>>, vector<1x128x128xf32>
    %110 = vector.shape_cast %109 : vector<1x128x128xf32> to vector<128x128xf32>
    %cst_72 = arith.constant 0.000000e+00 : f32
    %111 = vector.broadcast %cst_72 : f32 to vector<8x128xf32>
    %c0_i32_73 = arith.constant 0 : i32
    %112 = arith.index_cast %c0_i32_73 : i32 to index
    %c0_74 = arith.constant 0 : index
    %c0_75 = arith.constant 0 : index
    %113 = vector.load %arg10[%112, %c0_74, %c0_75] : memref<8x8x128xf32, #tpu.memory_space<vmem>>, vector<1x8x128xf32>
    %114 = vector.shape_cast %113 : vector<1x8x128xf32> to vector<8x128xf32>
    %cst_76 = arith.constant dense<0.000000e+00> : vector<8x128xf32>
    %115 = tpu.matmul %111, %110, %cst_76 {dimension_numbers = #tpu.dot_dimension_numbers<[1], [0], [0], [1], [0, 0, 1, 1], [], []>} : vector<8x128xf32>, vector<128x128xf32>, vector<8x128xf32> -> vector<8x128xf32>
    %116 = arith.addf %114, %115 : vector<8x128xf32>
    %117 = math.tanh %116 : vector<8x128xf32>
    %c1_i32_77 = arith.constant 1 : i32
    %118 = arith.index_cast %c1_i32_77 : i32 to index
    %c0_78 = arith.constant 0 : index
    %c0_79 = arith.constant 0 : index
    %119 = vector.load %arg10[%118, %c0_78, %c0_79] : memref<8x8x128xf32, #tpu.memory_space<vmem>>, vector<1x8x128xf32>
    %120 = vector.shape_cast %119 : vector<1x8x128xf32> to vector<8x128xf32>
    %cst_80 = arith.constant dense<0.000000e+00> : vector<8x128xf32>
    %121 = tpu.matmul %117, %110, %cst_80 {dimension_numbers = #tpu.dot_dimension_numbers<[1], [0], [0], [1], [0, 0, 1, 1], [], []>} : vector<8x128xf32>, vector<128x128xf32>, vector<8x128xf32> -> vector<8x128xf32>
    %122 = arith.addf %120, %121 : vector<8x128xf32>
    %123 = math.tanh %122 : vector<8x128xf32>
    %c2_i32_81 = arith.constant 2 : i32
    %124 = arith.index_cast %c2_i32_81 : i32 to index
    %c0_82 = arith.constant 0 : index
    %c0_83 = arith.constant 0 : index
    %125 = vector.load %arg10[%124, %c0_82, %c0_83] : memref<8x8x128xf32, #tpu.memory_space<vmem>>, vector<1x8x128xf32>
    %126 = vector.shape_cast %125 : vector<1x8x128xf32> to vector<8x128xf32>
    %cst_84 = arith.constant dense<0.000000e+00> : vector<8x128xf32>
    %127 = tpu.matmul %123, %110, %cst_84 {dimension_numbers = #tpu.dot_dimension_numbers<[1], [0], [0], [1], [0, 0, 1, 1], [], []>} : vector<8x128xf32>, vector<128x128xf32>, vector<8x128xf32> -> vector<8x128xf32>
    %128 = arith.addf %126, %127 : vector<8x128xf32>
    %129 = math.tanh %128 : vector<8x128xf32>
    %c3_i32_85 = arith.constant 3 : i32
    %130 = arith.index_cast %c3_i32_85 : i32 to index
    %c0_86 = arith.constant 0 : index
    %c0_87 = arith.constant 0 : index
    %131 = vector.load %arg10[%130, %c0_86, %c0_87] : memref<8x8x128xf32, #tpu.memory_space<vmem>>, vector<1x8x128xf32>
    %132 = vector.shape_cast %131 : vector<1x8x128xf32> to vector<8x128xf32>
    %cst_88 = arith.constant dense<0.000000e+00> : vector<8x128xf32>
    %133 = tpu.matmul %129, %110, %cst_88 {dimension_numbers = #tpu.dot_dimension_numbers<[1], [0], [0], [1], [0, 0, 1, 1], [], []>} : vector<8x128xf32>, vector<128x128xf32>, vector<8x128xf32> -> vector<8x128xf32>
    %134 = arith.addf %132, %133 : vector<8x128xf32>
    %135 = math.tanh %134 : vector<8x128xf32>
    %c4_i32_89 = arith.constant 4 : i32
    %136 = arith.index_cast %c4_i32_89 : i32 to index
    %c0_90 = arith.constant 0 : index
    %c0_91 = arith.constant 0 : index
    %137 = vector.load %arg10[%136, %c0_90, %c0_91] : memref<8x8x128xf32, #tpu.memory_space<vmem>>, vector<1x8x128xf32>
    %138 = vector.shape_cast %137 : vector<1x8x128xf32> to vector<8x128xf32>
    %cst_92 = arith.constant dense<0.000000e+00> : vector<8x128xf32>
    %139 = tpu.matmul %135, %110, %cst_92 {dimension_numbers = #tpu.dot_dimension_numbers<[1], [0], [0], [1], [0, 0, 1, 1], [], []>} : vector<8x128xf32>, vector<128x128xf32>, vector<8x128xf32> -> vector<8x128xf32>
    %140 = arith.addf %138, %139 : vector<8x128xf32>
    %141 = math.tanh %140 : vector<8x128xf32>
    %c5_i32_93 = arith.constant 5 : i32
    %142 = arith.index_cast %c5_i32_93 : i32 to index
    %c0_94 = arith.constant 0 : index
    %c0_95 = arith.constant 0 : index
    %143 = vector.load %arg10[%142, %c0_94, %c0_95] : memref<8x8x128xf32, #tpu.memory_space<vmem>>, vector<1x8x128xf32>
    %144 = vector.shape_cast %143 : vector<1x8x128xf32> to vector<8x128xf32>
    %cst_96 = arith.constant dense<0.000000e+00> : vector<8x128xf32>
    %145 = tpu.matmul %141, %110, %cst_96 {dimension_numbers = #tpu.dot_dimension_numbers<[1], [0], [0], [1], [0, 0, 1, 1], [], []>} : vector<8x128xf32>, vector<128x128xf32>, vector<8x128xf32> -> vector<8x128xf32>
    %146 = arith.addf %144, %145 : vector<8x128xf32>
    %147 = math.tanh %146 : vector<8x128xf32>
    %c6_i32_97 = arith.constant 6 : i32
    %148 = arith.index_cast %c6_i32_97 : i32 to index
    %c0_98 = arith.constant 0 : index
    %c0_99 = arith.constant 0 : index
    %149 = vector.load %arg10[%148, %c0_98, %c0_99] : memref<8x8x128xf32, #tpu.memory_space<vmem>>, vector<1x8x128xf32>
    %150 = vector.shape_cast %149 : vector<1x8x128xf32> to vector<8x128xf32>
    %cst_100 = arith.constant dense<0.000000e+00> : vector<8x128xf32>
    %151 = tpu.matmul %147, %110, %cst_100 {dimension_numbers = #tpu.dot_dimension_numbers<[1], [0], [0], [1], [0, 0, 1, 1], [], []>} : vector<8x128xf32>, vector<128x128xf32>, vector<8x128xf32> -> vector<8x128xf32>
    %152 = arith.addf %150, %151 : vector<8x128xf32>
    %153 = math.tanh %152 : vector<8x128xf32>
    %c7_i32_101 = arith.constant 7 : i32
    %154 = arith.index_cast %c7_i32_101 : i32 to index
    %c0_102 = arith.constant 0 : index
    %c0_103 = arith.constant 0 : index
    %155 = vector.load %arg10[%154, %c0_102, %c0_103] : memref<8x8x128xf32, #tpu.memory_space<vmem>>, vector<1x8x128xf32>
    %156 = vector.shape_cast %155 : vector<1x8x128xf32> to vector<8x128xf32>
    %cst_104 = arith.constant dense<0.000000e+00> : vector<8x128xf32>
    %157 = tpu.matmul %153, %110, %cst_104 {dimension_numbers = #tpu.dot_dimension_numbers<[1], [0], [0], [1], [0, 0, 1, 1], [], []>} : vector<8x128xf32>, vector<128x128xf32>, vector<8x128xf32> -> vector<8x128xf32>
    %158 = arith.addf %156, %157 : vector<8x128xf32>
    %159 = math.tanh %158 : vector<8x128xf32>
    %c8_i32_105 = arith.constant 8 : i32
    %c0_i32_106 = arith.constant 0 : i32
    %160 = tpu.memref_slice %arg13[%c0_i32_106] : memref<2x!tpu.dma_semaphore, #tpu.memory_space<semaphore_mem>> -> memref<1x!tpu.dma_semaphore, #tpu.memory_space<semaphore_mem>>
    %161 = tpu.memref_squeeze %160 : memref<1x!tpu.dma_semaphore, #tpu.memory_space<semaphore_mem>> -> memref<!tpu.dma_semaphore, #tpu.memory_space<semaphore_mem>>
    tpu.wait_dma2 semaphore(%161 : memref<!tpu.dma_semaphore, #tpu.memory_space<semaphore_mem>>) src(%arg4 : memref<128x4096xf32, #tpu.memory_space<any>>) dst(%arg11 : memref<128x4096xf32, #tpu.memory_space<vmem>>)
    %c1_i32_107 = arith.constant 1 : i32
    %162 = tpu.memref_slice %arg13[%c1_i32_107] : memref<2x!tpu.dma_semaphore, #tpu.memory_space<semaphore_mem>> -> memref<1x!tpu.dma_semaphore, #tpu.memory_space<semaphore_mem>>
    %163 = tpu.memref_squeeze %162 : memref<1x!tpu.dma_semaphore, #tpu.memory_space<semaphore_mem>> -> memref<!tpu.dma_semaphore, #tpu.memory_space<semaphore_mem>>
    tpu.wait_dma2 semaphore(%163 : memref<!tpu.dma_semaphore, #tpu.memory_space<semaphore_mem>>) src(%arg6 : memref<4096x128xf32, #tpu.memory_space<any>>) dst(%arg12 : memref<4096x128xf32, #tpu.memory_space<vmem>>)
    %cst_108 = arith.constant 0.000000e+00 : f32
    %164 = vector.broadcast %cst_108 : f32 to vector<8x128xf32>
    %165 = arith.maximumf %159, %164 : vector<8x128xf32>
    %c0_109 = arith.constant 0 : index
    %c0_110 = arith.constant 0 : index
    %166 = vector.load %arg11[%c0_109, %c0_110] : memref<128x4096xf32, #tpu.memory_space<vmem>>, vector<128x4096xf32>
    %cst_111 = arith.constant dense<0.000000e+00> : vector<8x4096xf32>
    %167 = tpu.matmul %165, %166, %cst_111 {dimension_numbers = #tpu.dot_dimension_numbers<[1], [0], [0], [1], [0, 0, 1, 1], [], []>} : vector<8x128xf32>, vector<128x4096xf32>, vector<8x4096xf32> -> vector<8x4096xf32>
    %c0_112 = arith.constant 0 : index
    %c0_113 = arith.constant 0 : index
    %168 = vector.load %arg5[%c0_112, %c0_113] : memref<1x4096xf32, #tpu.memory_space<vmem>>, vector<1x4096xf32>
    %169 = vector.broadcast %168 : vector<1x4096xf32> to vector<8x4096xf32>
    %170 = arith.addf %167, %169 : vector<8x4096xf32>
    %cst_114 = arith.constant 0.000000e+00 : f32
    %171 = vector.broadcast %cst_114 : f32 to vector<8x4096xf32>
    %172 = arith.maximumf %170, %171 : vector<8x4096xf32>
    %c0_115 = arith.constant 0 : index
    %c0_116 = arith.constant 0 : index
    %173 = vector.load %arg12[%c0_115, %c0_116] : memref<4096x128xf32, #tpu.memory_space<vmem>>, vector<4096x128xf32>
    %cst_117 = arith.constant dense<0.000000e+00> : vector<8x128xf32>
    %174 = tpu.matmul %172, %173, %cst_117 {dimension_numbers = #tpu.dot_dimension_numbers<[1], [0], [0], [1], [0, 0, 1, 1], [], []>} : vector<8x4096xf32>, vector<4096x128xf32>, vector<8x128xf32> -> vector<8x128xf32>
    %c0_118 = arith.constant 0 : index
    %c0_119 = arith.constant 0 : index
    %175 = vector.load %arg7[%c0_118, %c0_119] : memref<1x128xf32, #tpu.memory_space<vmem>>, vector<1x128xf32>
    %176 = vector.broadcast %175 : vector<1x128xf32> to vector<8x128xf32>
    %177 = arith.addf %174, %176 : vector<8x128xf32>
    %c0_120 = arith.constant 0 : index
    %c0_121 = arith.constant 0 : index
    %178 = vector.load %arg8[%c0_120, %c0_121] : memref<8x128xf32, #tpu.memory_space<vmem>>, vector<8x128xf32>
    tpu.vector_store %arg8[%c0_120, %c0_121], %177 {strides = array<i32>} : memref<8x128xf32, #tpu.memory_space<vmem>>, vector<8x128xf32>,
    return
  }
}

</mosaic_0001>

<bundles_post_ra>
// kernel: recurrent_model_forward.1
= control target key start
LH: loop header
LB: loop body
LE: loop exit
PB: predicated region body
PF: predicated region fallthrough
CT: control target
= control target key end

     0   :  { %13 = vsyncpa [#allocation8], 0  ;;  %s9117_s0 = inlined_call_operand.vmem [shape: f32[8,8,128], index: 0, kind: input, shape index: {}]   ;;  %s9118_s1 = inlined_call_operand.hbm [shape: f32[2,128,128], index: 1, kind: input, shape index: {}]   ;;  %s9119_s2 = inlined_call_operand.hbm [shape: f32[2,128,128], index: 2, kind: input, shape index: {}]   ;;  %s9120_s3 = inlined_call_operand.hbm [shape: f32[2,1,128], index: 3, kind: input, shape index: {}]   ;;  %s9121_s4 = inlined_call_operand.hbm [shape: f32[128,4096], index: 4, kind: input, shape index: {}]   ;;  %s9122_s5 = inlined_call_operand.hbm [shape: f32[1,4096], index: 5, kind: input, shape index: {}]   ;;  %s9123_s6 = inlined_call_operand.hbm [shape: f32[4096,128], index: 6, kind: input, shape index: {}]   ;;  %s9124_s7 = inlined_call_operand.hbm [shape: f32[1,128], index: 7, kind: input, shape index: {}]   ;;  %s9125_s8 = inlined_call_operand.vmem [shape: f32[8,128], index: 8, kind: output, shape index: {}]  }
   0x1   :  { %14 = vsyncpa [#allocation10], 0 }
   0x2   :  { %15 = vsyncpa [#allocation13], 0  ;;  %s8356_s27 = smov [#allocation9]   ;;  %s8357_s29 = smov [#allocation12]  }
   0x3   :  { %s35_s28 = sshll.u32 %s8356_s27, 4  ;;  %s60_s30 = sshll.u32 %s8357_s29, 4  ;;  %s36_s28 = int_to_ptr.vmem [resolvable:$true] %s35_s28  ;;  %s61_s30 = int_to_ptr.vmem [resolvable:$true] %s60_s30 }
   0x4   :  { %s8192_s11 = scalar_lea.hbm %s9119_s2, 4096 }
   0x5   :  { %p8193_p0 = scmp.ne.s32.totalorder %s9119_s2, %s8192_s11  ;;  %p8196_p1 = scmp.lt.u32.totalorder %s8192_s11, %s9119_s2 }
   0x7   :  { %p8198_p2 = pnand %p8196_p1, %p8193_p0 }
   0x9   :  { %8201 = shalt.err (!%p8198_p2)
}
   0xa   :  { %s8202_s16 = scalar_lea.vmem %s36_s28, 4096  ;;  %p8207_p4 = scmp.lt.s32.totalorder %s36_s28, %s36_s28 }
   0xb   :  { %p8203_p3 = scmp.ne.s32.totalorder %s36_s28, %s8202_s16  ;;  %p8208_p5 = scmp.lt.s32.totalorder %s8202_s16, %s8202_s16 }
   0xd   :  { %p8209_p6 = por %p8208_p5, %p8207_p4 }
   0xf   :  { %p8210_p7 = pnand %p8209_p6, %p8203_p3 }
  0x11   :  { %8213 = shalt.err (!%p8210_p7)
}
  0x12   :  { %s8358_s17 = smov 128   ;;  %s8359_s18 = smov 8  }
  0x13   :  { %41 = dma.hbm_to_vmem [thread:$0]  %s9119_s2, 4096, %s36_s28, [#allocation10], %s8358_s17, %s8358_s17, %s8359_s18  }
  0x14   :  { %s8214_s23 = scalar_lea.hbm %s9122_s5, 512 }
  0x15   :  { %p8215_p8 = scmp.ne.s32.totalorder %s9122_s5, %s8214_s23  ;;  %p8218_p9 = scmp.lt.u32.totalorder %s8214_s23, %s9122_s5 }
  0x17   :  { %p8220_p10 = pnand %p8218_p9, %p8215_p8 }
  0x19   :  { %8223 = shalt.err (!%p8220_p10)
}
  0x1a   :  { %s8224_s29 = scalar_lea.vmem %s61_s30, 512  ;;  %p8229_p12 = scmp.lt.s32.totalorder %s61_s30, %s61_s30 }
  0x1b   :  { %p8225_p11 = scmp.ne.s32.totalorder %s61_s30, %s8224_s29  ;;  %p8230_p13 = scmp.lt.s32.totalorder %s8224_s29, %s8224_s29 }
  0x1d   :  { %p8231_p0 = por %p8230_p13, %p8229_p12 }
  0x1f   :  { %p8232_p1 = pnand %p8231_p0, %p8225_p11 }
  0x21   :  { %8235 = shalt.err (!%p8232_p1)
}
  0x22   :  { %63 = dma.hbm_to_vmem [thread:$0]  %s9122_s5, 512, %s61_s30, [#allocation13]  }
  0x23   :  { %s8360_s9 = smov [#allocation7]   ;;  %s8361_s11 = smov [#allocation11]  }
  0x24   :  { %s23_s10 = sshll.u32 %s8360_s9, 4  ;;  %s47_s12 = sshll.u32 %s8361_s11, 4  ;;  %s24_s10 = int_to_ptr.vmem [resolvable:$true] %s23_s10  ;;  %s8442_s12 = int_to_ptr.vmem [resolvable:$true] %s47_s12 }
  0x25   :  { %s8236_s15 = scalar_lea.hbm %s9118_s1, 4096 }
  0x26   :  { %p8237_p2 = scmp.ne.s32.totalorder %s9118_s1, %s8236_s15  ;;  %p8240_p3 = scmp.lt.u32.totalorder %s8236_s15, %s9118_s1 }
  0x28   :  { %p8242_p4 = pnand %p8240_p3, %p8237_p2 }
  0x2a   :  { %8245 = shalt.err (!%p8242_p4)
}
  0x2b   :  { %s8246_s5 = scalar_lea.vmem %s24_s10, 4096  ;;  %p8251_p6 = scmp.lt.s32.totalorder %s24_s10, %s24_s10 }
  0x2c   :  { %p8247_p5 = scmp.ne.s32.totalorder %s24_s10, %s8246_s5  ;;  %p8252_p7 = scmp.lt.s32.totalorder %s8246_s5, %s8246_s5 }
  0x2e   :  { %p8253_p8 = por %p8252_p7, %p8251_p6 }
  0x30   :  { %p8254_p9 = pnand %p8253_p8, %p8247_p5 }
  0x32   :  { %8257 = shalt.err (!%p8254_p9)
}
  0x33   :  { %29 = dma.hbm_to_vmem [thread:$0]  %s9118_s1, 4096, %s24_s10, [#allocation8], %s8358_s17, %s8358_s17, %s8359_s18  }
  0x34   :  { %s8258_s25 = scalar_lea.hbm %s9120_s3, 32 }
  0x35   :  { %p8259_p10 = scmp.ne.s32.totalorder %s9120_s3, %s8258_s25  ;;  %p8262_p11 = scmp.lt.u32.totalorder %s8258_s25, %s9120_s3 }
  0x37   :  { %p8264_p12 = pnand %p8262_p11, %p8259_p10 }
  0x39   :  { %8267 = shalt.err (!%p8264_p12)
}
  0x3a   :  { %s8268_s28 = scalar_lea.vmem %s8442_s12, 32  ;;  %p8273_p0 = scmp.lt.s32.totalorder %s8442_s12, %s8442_s12 }
  0x3b   :  { %p8269_p13 = scmp.ne.s32.totalorder %s8442_s12, %s8268_s28  ;;  %p8274_p1 = scmp.lt.s32.totalorder %s8268_s28, %s8268_s28 }
  0x3d   :  { %p8275_p2 = por %p8274_p1, %p8273_p0 }
  0x3f   :  { %p8276_p3 = pnand %p8275_p2, %p8269_p13 }
  0x41   :  { %8279 = shalt.err (!%p8276_p3)
}
  0x42   :  { %s8362_s1 = smov 16   ;;  %s8363_s17 = smov 1  }
  0x43   :  { %53 = dma.hbm_to_vmem [thread:$0]  %s9120_s3, 32, %s8442_s12, [#allocation10], %s8362_s1, %s8362_s1, %s8363_s17  }
  0x44   :  { %s8364_s10 = smov [#allocation14]   ;;  %s8280_s15 = scalar_lea.hbm %s9124_s7, 16 }
  0x45   :  { %s70_s11 = sshll.u32 %s8364_s10, 4  ;;  %p8281_p4 = scmp.ne.s32.totalorder %s9124_s7, %s8280_s15  ;;  %s71_s11 = int_to_ptr.vmem [resolvable:$true] %s70_s11 }
  0x46   :  { %p8284_p5 = scmp.lt.u32.totalorder %s8280_s15, %s9124_s7 }
  0x48   :  { %p8286_p6 = pnand %p8284_p5, %p8281_p4 }
  0x4a   :  { %8289 = shalt.err (!%p8286_p6)
}
  0x4b   :  { %s8290_s5 = scalar_lea.vmem %s71_s11, 16  ;;  %s8294_s3 = scalar_lea.vmem %s71_s11, 32 }
  0x4c   :  { %p8291_p7 = scmp.ne.s32.totalorder %s71_s11, %s8290_s5  ;;  %p8295_p8 = scmp.lt.s32.totalorder %s71_s11, %s71_s11 }
  0x4d   :  { %p8296_p9 = scmp.lt.s32.totalorder %s8294_s3, %s8290_s5 }
  0x4f   :  { %p8297_p10 = por %p8296_p9, %p8295_p8 }
  0x51   :  { %p8298_p11 = pnand %p8297_p10, %p8291_p7 }
  0x53   :  { %8301 = shalt.err (!%p8298_p11)
}
  0x54   :  { %73 = dma.hbm_to_vmem [thread:$0]  %s9124_s7, 16, %s71_s11, [#allocation13]  }
  0x55   :  { %8346 = dma.done.wait [#allocation8], 4096  }
  0x56   :  { %8347 = vsyncadd [#allocation8], 4294963200 }
  0x57   :  { %8348 = dma.done.wait [#allocation10], 4128  }
  0x58   :  { %8349 = vsyncadd [#allocation10], 4294963168 }
  0x59   :  { %8350 = dma.done.wait [#allocation13], 528  }
  0x5a   :  { %8351 = vsyncadd [#allocation13], 4294966768  ;;  %v8365_v0 = vmov 0.0|0.0   ;;  %vm8366_vm0 = vmmov 0   ;;  %v8367_v1 = vmov 0.0   ;;  %v120_v2 = vld [vmem:[#allocation7] sm:$0xff] }
  0x5b   :  { %6706 = vmatprep.subr.bf16.mxu1 %v8365_v0  ;;  %6102 = vmatprep.mubr.msk.f32.mxu1 %vm8366_vm0, %v8367_v1  ;;  %v121_v3 = vld [vmem:[#allocation7 + $0x8] sm:$0xff]  ;;  %v256_v4 = vld [vmem:[#allocation9] sm:$0xff]  ;;  %v122_v7 = vld [vmem:[#allocation7 + $0x10] sm:$0xff]  ;;  %s8369_s14 = smov [#allocation5]   ;;  %s8302_s20 = scalar_lea.hbm %s9121_s4, 65536 }
  0x5c   :  { %v6674_v5 = vpack.c.bf16 %v121_v3, %v120_v2  ;;  %v257_v6 = vld [vmem:[#allocation9 + $0x8] sm:$0xff]  ;;  %v123_v8 = vld [vmem:[#allocation7 + $0x18] sm:$0xff]  ;;  %v258_v11 = vld [vmem:[#allocation9 + $0x10] sm:$0xff]  ;;  %s108_s15 = sshll.u32 %s8369_s14, 4  ;;  %p8303_p12 = scmp.ne.s32.totalorder %s9121_s4, %s8302_s20  ;;  %s109_s15 = int_to_ptr.vmem [resolvable:$true] %s108_s15 }
  0x5d   :  { %v8491_v9 = vpack.c.bf16 %v257_v6, %v256_v4  ;;  %v6678_v10 = vpack.c.bf16 %v123_v8, %v122_v7  ;;  %v259_v12 = vld [vmem:[#allocation9 + $0x18] sm:$0xff]  ;;  %v124_v13 = vld [vmem:[#allocation7 + $0x20] sm:$0xff]  ;;  %v125_v14 = vld [vmem:[#allocation7 + $0x28] sm:$0xff]  ;;  %p8306_p13 = scmp.lt.u32.totalorder %s8302_s20, %s9121_s4 }
  0x5e   :  { %6675 = vmatprep.subr.bf16.mxu0 %v6674_v5  ;;  %v8494_v15 = vpack.c.bf16 %v259_v12, %v258_v11  ;;  %v6682_v16 = vpack.c.bf16 %v125_v14, %v124_v13  ;;  %v260_v17 = vld [vmem:[#allocation9 + $0x20] sm:$0xff]  ;;  %v261_v18 = vld [vmem:[#allocation9 + $0x28] sm:$0xff]  ;;  %v126_v19 = vld [vmem:[#allocation7 + $0x30] sm:$0xff] }
  0x5f   :  { %6677 = vmatpush3.bf16.msra.mxu0 %v6674_v5  ;;  %6708 = vmatpush3.bf16.msra.mxu1 %v8491_v9  ;;  %v127_v20 = vld [vmem:[#allocation7 + $0x38] sm:$0xff]  ;;  %v8498_v21 = vpack.c.bf16 %v261_v18, %v260_v17  ;;  %v262_v23 = vld [vmem:[#allocation9 + $0x30] sm:$0xff]  ;;  %v128_v25 = vld [vmem:[#allocation7 + $0x40] sm:$0xff]  ;;  %p8308_p0 = pnand %p8306_p13, %p8303_p12 }
  0x60   :  { %6679 = vmatprep.subr.bf16.mxu0 %v6678_v10  ;;  %6709 = vmatprep.subr.bf16.mxu1 %v8365_v0  ;;  %v6686_v22 = vpack.c.bf16 %v127_v20, %v126_v19  ;;  %v263_v24 = vld [vmem:[#allocation9 + $0x38] sm:$0xff]  ;;  %v129_v26 = vld [vmem:[#allocation7 + $0x48] sm:$0xff]  ;;  %v112_v27 = vld [vmem:[%s9117_s0] sm:$0xff] }
  0x61   :  { %6058 = vmatprep.mubr.f32.mxu0 %v112_v27  ;;  %v8505_v28 = vpack.c.bf16 %v263_v24, %v262_v23  ;;  %v6690_v29 = vpack.c.bf16 %v129_v26, %v128_v25  ;;  %v264_v30 = vld [vmem:[#allocation9 + $0x40] sm:$0xff]  ;;  %v265_v31 = vld [vmem:[#allocation9 + $0x48] sm:$0xff]  ;;  %v130_v32 = vld [vmem:[#allocation7 + $0x50] sm:$0xff] }
  0x62   :  { %v131_v33 = vld [vmem:[#allocation7 + $0x58] sm:$0xff]  ;;  %v8509_v34 = vpack.c.bf16 %v265_v31, %v264_v30  ;;  %v266_v36 = vld [vmem:[#allocation9 + $0x50] sm:$0xff]  ;;  %v132_v38 = vld [vmem:[#allocation7 + $0x60] sm:$0xff] }
  0x63   :  { %6681 = vmatpush3.bf16.msra.mxu0 %v6678_v10  ;;  %6711 = vmatpush3.bf16.msra.mxu1 %v8494_v15  ;;  %v6694_v35 = vpack.c.bf16 %v131_v33, %v130_v32  ;;  %v267_v37 = vld [vmem:[#allocation9 + $0x58] sm:$0xff]  ;;  %v133_v39 = vld [vmem:[#allocation7 + $0x68] sm:$0xff]  ;;  %v268_v42 = vld [vmem:[#allocation9 + $0x60] sm:$0xff] }
  0x64   :  { %6683 = vmatprep.subr.bf16.mxu0 %v6682_v16  ;;  %6712 = vmatprep.subr.bf16.mxu1 %v8365_v0  ;;  %v8513_v40 = vpack.c.bf16 %v267_v37, %v266_v36  ;;  %v6698_v41 = vpack.c.bf16 %v133_v39, %v132_v38  ;;  %v269_v43 = vld [vmem:[#allocation9 + $0x68] sm:$0xff]  ;;  %v134_v44 = vld [vmem:[#allocation7 + $0x70] sm:$0xff]  ;;  %v135_v45 = vld [vmem:[#allocation7 + $0x78] sm:$0xff] }
  0x65   :  { %v8517_v46 = vpack.c.bf16 %v269_v43, %v268_v42  ;;  %v6702_v47 = vpack.c.bf16 %v135_v45, %v134_v44  ;;  %v270_v48 = vld [vmem:[#allocation9 + $0x70] sm:$0xff]  ;;  %v271_v49 = vld [vmem:[#allocation9 + $0x78] sm:$0xff]  ;;  %v113_v51 = vld [vmem:[%s9117_s0 + $0x8] sm:$0xff] }
  0x66   :  { %v8521_v50 = vpack.c.bf16 %v271_v49, %v270_v48  ;;  %v114_v52 = vld [vmem:[%s9117_s0 + $0x10] sm:$0xff]  ;;  %v115_v53 = vld [vmem:[%s9117_s0 + $0x18] sm:$0xff]  ;;  %v116_v54 = vld [vmem:[%s9117_s0 + $0x20] sm:$0xff] }
  0x67   :  { %6685 = vmatpush3.bf16.msra.mxu0 %v6682_v16  ;;  %6714 = vmatpush3.bf16.msra.mxu1 %v8498_v21  ;;  %v117_v55 = vld [vmem:[%s9117_s0 + $0x28] sm:$0xff]  ;;  %v118_v56 = vld [vmem:[%s9117_s0 + $0x30] sm:$0xff]  ;;  %v119_v57 = vld [vmem:[%s9117_s0 + $0x38] sm:$0xff]  ;;  %s8368_s0 = smov [#allocation4]  }
  0x68   :  { %6687 = vmatprep.subr.bf16.mxu0 %v6686_v22  ;;  %6715 = vmatprep.subr.bf16.mxu1 %v8365_v0  ;;  %v8585_v58 = vld [vmem:[#allocation11] ss:$0 sm:$0xff]  ;;  %v889_v37 = vld [vmem:[#allocation7 + $0x90] sm:$0xff]  ;;  %v890_v38 = vld [vmem:[#allocation7 + $0x98] sm:$0xff]  ;;  %s96_s13 = sshll.u32 %s8368_s0, 4  ;;  %s97_s13 = int_to_ptr.vmem [resolvable:$true] %s96_s13 }
  0x69   :  { %v6902_v39 = vpack.c.bf16 %v890_v38, %v889_v37  ;;  %v892_v42 = vld [vmem:[#allocation7 + $0xa8] sm:$0xff]  ;;  %v893_v44 = vld [vmem:[#allocation7 + $0xb0] sm:$0xff]  ;;  %v894_v45 = vld [vmem:[#allocation7 + $0xb8] sm:$0xff] }
  0x6a   :  { %v896_v48 = vld [vmem:[#allocation7 + $0xc8] sm:$0xff] }
  0x6b   :  { %6689 = vmatpush3.bf16.msra.mxu0 %v6686_v22  ;;  %6717 = vmatpush3.bf16.msra.mxu1 %v8505_v28 }
  0x6c   :  { %6691 = vmatprep.subr.bf16.mxu0 %v6690_v29  ;;  %6718 = vmatprep.subr.bf16.mxu1 %v8365_v0 }
  0x6f   :  { %6693 = vmatpush3.bf16.msra.mxu0 %v6690_v29  ;;  %6720 = vmatpush3.bf16.msra.mxu1 %v8509_v34 }
  0x70   :  { %6695 = vmatprep.subr.bf16.mxu0 %v6694_v35  ;;  %6721 = vmatprep.subr.bf16.mxu1 %v8365_v0 }
  0x73   :  { %6697 = vmatpush3.bf16.msra.mxu0 %v6694_v35  ;;  %6723 = vmatpush3.bf16.msra.mxu1 %v8513_v40 }
  0x74   :  { %6699 = vmatprep.subr.bf16.mxu0 %v6698_v41  ;;  %6724 = vmatprep.subr.bf16.mxu1 %v8365_v0 }
  0x77   :  { %6701 = vmatpush3.bf16.msra.mxu0 %v6698_v41  ;;  %6726 = vmatpush3.bf16.msra.mxu1 %v8517_v46  ;;  %v891_v41 = vld [vmem:[#allocation7 + $0xa0] sm:$0xff] }
  0x78   :  { %6703 = vmatprep.subr.bf16.mxu0 %v6702_v47  ;;  %6727 = vmatprep.subr.bf16.mxu1 %v8365_v0  ;;  %v6906_v43 = vpack.c.bf16 %v892_v42, %v891_v41 }
  0x7b   :  { %6705 = vmatpush3.bf16.msra.mxu0 %v6702_v47  ;;  %6729 = vmatpush3.bf16.msra.mxu1 %v8521_v50  ;;  %v895_v47 = vld [vmem:[#allocation7 + $0xc0] sm:$0xff] }
  0x7c   :  { %6730 = vmatprep.subr.bf16.mxu0 %v8365_v0  ;;  %6754 = vmatprep.subr.bf16.mxu1 %v8365_v0  ;;  %v6914_v49 = vpack.c.bf16 %v896_v48, %v895_v47 }
  0x7e   :  { %6059 = vmatmul.mubr.f32.vlgmr.msra.gmra.mrb[0].mxu0 %v113_v51  ;;  %6103 = vmatmul.mubr.f32.vlgmr.msra.gmra.mrb[0].mxu1 %v8367_v1  ;;  %v898_v51 = vld [vmem:[#allocation7 + $0xd8] sm:$0xff] }
  0x7f   :  { %6732 = vmatpush3.bf16.msra.mxu0 %v8491_v9  ;;  %6756 = vmatpush3.bf16.msra.mxu1 %v8491_v9 }
  0x80   :  { %6733 = vmatprep.subr.bf16.mxu0 %v8365_v0  ;;  %6757 = vmatprep.subr.bf16.mxu1 %v8365_v0 }
  0x81   :  { %6172 = vmatprep.mubr.msk.f32.mxu1 %vm8366_vm0, %v8367_v1  ;;  %6061 = vmatprep.mubr.f32.mxu0 %v114_v52 }
  0x82   :  { %6062 = vmatmul.mubr.f32.gmra.mrb[2].mxu0 %v115_v53  ;;  %v899_v53 = vld [vmem:[#allocation7 + $0xe0] sm:$0xff] }
  0x83   :  { %6735 = vmatpush3.bf16.msra.mxu0 %v8494_v15  ;;  %6759 = vmatpush3.bf16.msra.mxu1 %v8494_v15 }
  0x84   :  { %6736 = vmatprep.subr.bf16.mxu0 %v8365_v0  ;;  %6760 = vmatprep.subr.bf16.mxu1 %v8365_v0 }
  0x85   :  { %6064 = vmatprep.mubr.f32.mxu0 %v116_v54  ;;  %v900_v54 = vld [vmem:[#allocation7 + $0xe8] sm:$0xff] }
  0x86   :  { %6065 = vmatmul.mubr.f32.gmra.mrb[4].mxu0 %v117_v55  ;;  %v6922_v55 = vpack.c.bf16 %v900_v54, %v899_v53 }
  0x87   :  { %6738 = vmatpush3.bf16.msra.mxu0 %v8498_v21  ;;  %6762 = vmatpush3.bf16.msra.mxu1 %v8498_v21 }
  0x88   :  { %6739 = vmatprep.subr.bf16.mxu0 %v8365_v0  ;;  %6763 = vmatprep.subr.bf16.mxu1 %v8365_v0 }
  0x89   :  { %6067 = vmatprep.mubr.f32.mxu0 %v118_v56  ;;  %v901_v56 = vld [vmem:[#allocation7 + $0xf0] sm:$0xff] }
  0x8a   :  { %6068 = vmatmul.mubr.f32.gmra.mrb[6].mxu0 %v119_v57  ;;  %v902_v57 = vld [vmem:[#allocation7 + $0xf8] sm:$0xff] }
  0x8b   :  { %6741 = vmatpush3.bf16.msra.mxu0 %v8505_v28  ;;  %6765 = vmatpush3.bf16.msra.mxu1 %v8505_v28 }
  0x8c   :  { %6742 = vmatprep.subr.bf16.mxu0 %v8365_v0  ;;  %6766 = vmatprep.subr.bf16.mxu1 %v8365_v0 }
  0x8d   :  { %6137 = vmatprep.mubr.msk.f32.mxu0 %vm8366_vm0, %v8367_v1 }
  0x8f   :  { %6744 = vmatpush3.bf16.msra.mxu0 %v8509_v34  ;;  %6768 = vmatpush3.bf16.msra.mxu1 %v8509_v34 }
  0x90   :  { %6745 = vmatprep.subr.bf16.mxu0 %v8365_v0  ;;  %6769 = vmatprep.subr.bf16.mxu1 %v8365_v0 }
  0x93   :  { %6747 = vmatpush3.bf16.msra.mxu0 %v8513_v40  ;;  %6771 = vmatpush3.bf16.msra.mxu1 %v8513_v40 }
  0x94   :  { %6748 = vmatprep.subr.bf16.mxu0 %v8365_v0  ;;  %6772 = vmatprep.subr.bf16.mxu1 %v8365_v0 }
  0x97   :  { %6750 = vmatpush3.bf16.msra.mxu0 %v8517_v46  ;;  %6774 = vmatpush3.bf16.msra.mxu1 %v8517_v46 }
  0x98   :  { %6751 = vmatprep.subr.bf16.mxu0 %v8365_v0  ;;  %6775 = vmatprep.subr.bf16.mxu1 %v8365_v0 }
  0x9b   :  { %6753 = vmatpush3.bf16.msra.mxu0 %v8521_v50  ;;  %6777 = vmatpush3.bf16.msra.mxu1 %v8521_v50 }
  0x9c   :  { %6778 = vmatprep.subr.bf16.mxu0 %v8365_v0  ;;  %6802 = vmatprep.subr.bf16.mxu1 %v8365_v0 }
 0x151   :  { %v6060_v59 = vpop.f32.mrb[0].mxu0  ;;  %v339_v60 = vpop.f32.mrb[0].mxu1 }
 0x152   :  { %v209_v61 = vpop.f32.mrb[1].mxu0  ;;  %v6104_v62 = vpop.f32.mrb[1].mxu1  ;;  %v215_v11 = vadd.f32 %v6060_v59, %v8585_v58  ;;  %v6926_v59 = vpack.c.bf16 %v902_v57, %v901_v56 }
 0x153   :  { %v210_v63 = vadd.f32 %v8585_v58, %v209_v61  ;;  %v1026_v61 = vld [vmem:[#allocation9 + $0x88] sm:$0xff] }
 0x155   :  { %v343_v2 = vadd.f32 %v339_v60, %v210_v63  ;;  %v6063_v4 = vpop.f32.mrb[2].mxu0  ;;  %v1025_v60 = vld [vmem:[#allocation9 + $0x80] sm:$0xff]  ;;  %v1027_v63 = vld [vmem:[#allocation9 + $0x90] sm:$0xff] }
 0x156   :  { %v219_v5 = vpop.f32.mrb[3].mxu0  ;;  %v225_v23 = vadd.f32 %v6063_v4, %v8585_v58  ;;  %v8713_v62 = vpack.c.bf16 %v1026_v61, %v1025_v60  ;;  %v1029_v4 = vld [vmem:[#allocation9 + $0xa0] sm:$0xff] }
 0x157   :  { %8160 = vtanh.f32 %v343_v2  ;;  %v220_v17 = vadd.f32 %v8585_v58, %v219_v5  ;;  %v1028_v2 = vld [vmem:[#allocation9 + $0x98] sm:$0xff]  ;;  %v1030_v5 = vld [vmem:[#allocation9 + $0xa8] sm:$0xff] }
 0x159   :  { %v8609_v6 = vpop.f32.mrb[4].mxu0 }
 0x15a   :  { %v8611_v7 = vpop.f32.mrb[5].mxu0 }
 0x15b   :  { %v230_v29 = vadd.f32 %v8585_v58, %v8611_v7  ;;  %v1031_v7 = vld [vmem:[#allocation9 + $0xb0] sm:$0xff] }
 0x15d   :  { %v8613_v8 = vpop.f32.mrb[6].mxu0 }
 0x15e   :  { %v8615_v10 = vpop.f32.mrb[7].mxu0 }
 0x161   :  { %v8588_v3 = vpop.eup %8160 }
 0x162   :  { %6138 = vmatmul.mubr.f32.vlgmr.msra.gmra.mrb[8].mxu0 %v8588_v3 }
 0x163   :  { %6780 = vmatpush3.bf16.msra.mxu0 %v8491_v9  ;;  %6207 = vmatprep.mubr.msk.f32.mxu0 %vm8366_vm0, %v8367_v1 }
 0x164   :  { %6781 = vmatprep.subr.bf16.mxu0 %v8365_v0 }
 0x167   :  { %6783 = vmatpush3.bf16.msra.mxu0 %v8494_v15 }
 0x168   :  { %6784 = vmatprep.subr.bf16.mxu0 %v8365_v0 }
 0x16b   :  { %6786 = vmatpush3.bf16.msra.mxu0 %v8498_v21 }
 0x16c   :  { %6787 = vmatprep.subr.bf16.mxu0 %v8365_v0 }
 0x16f   :  { %6789 = vmatpush3.bf16.msra.mxu0 %v8505_v28 }
 0x170   :  { %6790 = vmatprep.subr.bf16.mxu0 %v8365_v0 }
 0x173   :  { %6792 = vmatpush3.bf16.msra.mxu0 %v8509_v34 }
 0x174   :  { %6793 = vmatprep.subr.bf16.mxu0 %v8365_v0 }
 0x177   :  { %6795 = vmatpush3.bf16.msra.mxu0 %v8513_v40 }
 0x178   :  { %6796 = vmatprep.subr.bf16.mxu0 %v8365_v0 }
 0x17b   :  { %6798 = vmatpush3.bf16.msra.mxu0 %v8517_v46 }
 0x17c   :  { %6799 = vmatprep.subr.bf16.mxu0 %v8365_v0 }
 0x17f   :  { %6801 = vmatpush3.bf16.msra.mxu0 %v8521_v50 }
 0x180   :  { %6826 = vmatprep.subr.bf16.mxu0 %v8365_v0 }
 0x235   :  { %v414_v12 = vpop.f32.mrb[8].mxu0 }
 0x236   :  { %v418_v13 = vadd.f32 %v414_v12, %v215_v11  ;;  %v6139_v14 = vpop.f32.mrb[9].mxu0  ;;  %v1032_v11 = vld [vmem:[#allocation9 + $0xb8] sm:$0xff] }
 0x237   :  { %v8725_v12 = vpack.c.bf16 %v1032_v11, %v1031_v7  ;;  %v1034_v14 = vld [vmem:[#allocation9 + $0xc8] sm:$0xff] }
 0x238   :  { %8162 = vtanh.f32 %v418_v13  ;;  %v1033_v13 = vld [vmem:[#allocation9 + $0xc0] sm:$0xff] }
 0x242   :  { %v8618_v16 = vpop.eup %8162 }
 0x243   :  { %6173 = vmatmul.mubr.f32.vlgmr.msra.gmra.mrb[2].mxu1 %v8618_v16 }
 0x244   :  { %6804 = vmatpush3.bf16.msra.mxu1 %v8491_v9  ;;  %6242 = vmatprep.mubr.msk.f32.mxu1 %vm8366_vm0, %v8367_v1 }
 0x245   :  { %6805 = vmatprep.subr.bf16.mxu1 %v8365_v0 }
 0x248   :  { %6807 = vmatpush3.bf16.msra.mxu1 %v8494_v15 }
 0x249   :  { %6808 = vmatprep.subr.bf16.mxu1 %v8365_v0 }
 0x24c   :  { %6810 = vmatpush3.bf16.msra.mxu1 %v8498_v21 }
 0x24d   :  { %6811 = vmatprep.subr.bf16.mxu1 %v8365_v0 }
 0x250   :  { %6813 = vmatpush3.bf16.msra.mxu1 %v8505_v28 }
 0x251   :  { %6814 = vmatprep.subr.bf16.mxu1 %v8365_v0 }
 0x254   :  { %6816 = vmatpush3.bf16.msra.mxu1 %v8509_v34 }
 0x255   :  { %6817 = vmatprep.subr.bf16.mxu1 %v8365_v0 }
 0x258   :  { %6819 = vmatpush3.bf16.msra.mxu1 %v8513_v40 }
 0x259   :  { %6820 = vmatprep.subr.bf16.mxu1 %v8365_v0 }
 0x25c   :  { %6822 = vmatpush3.bf16.msra.mxu1 %v8517_v46 }
 0x25d   :  { %6823 = vmatprep.subr.bf16.mxu1 %v8365_v0 }
 0x260   :  { %6825 = vmatpush3.bf16.msra.mxu1 %v8521_v50 }
 0x261   :  { %6850 = vmatprep.subr.bf16.mxu1 %v8365_v0 }
 0x316   :  { %v490_v18 = vpop.f32.mrb[2].mxu1 }
 0x317   :  { %v494_v19 = vadd.f32 %v490_v18, %v220_v17  ;;  %v6174_v20 = vpop.f32.mrb[3].mxu1  ;;  %v1035_v17 = vld [vmem:[#allocation9 + $0xd0] sm:$0xff]  ;;  %v1036_v18 = vld [vmem:[#allocation9 + $0xd8] sm:$0xff] }
 0x318   :  { %v1037_v20 = vld [vmem:[#allocation9 + $0xe0] sm:$0xff] }
 0x319   :  { %8164 = vtanh.f32 %v494_v19  ;;  %v8733_v19 = vpack.c.bf16 %v1036_v18, %v1035_v17 }
 0x323   :  { %v8640_v22 = vpop.eup %8164 }
 0x324   :  { %6208 = vmatmul.mubr.f32.vlgmr.msra.gmra.mrb[10].mxu0 %v8640_v22 }
 0x325   :  { %6828 = vmatpush3.bf16.msra.mxu0 %v8491_v9  ;;  %6277 = vmatprep.mubr.msk.f32.mxu0 %vm8366_vm0, %v8367_v1 }
 0x326   :  { %6829 = vmatprep.subr.bf16.mxu0 %v8365_v0 }
 0x329   :  { %6831 = vmatpush3.bf16.msra.mxu0 %v8494_v15 }
 0x32a   :  { %6832 = vmatprep.subr.bf16.mxu0 %v8365_v0 }
 0x32d   :  { %6834 = vmatpush3.bf16.msra.mxu0 %v8498_v21 }
 0x32e   :  { %6835 = vmatprep.subr.bf16.mxu0 %v8365_v0 }
 0x331   :  { %6837 = vmatpush3.bf16.msra.mxu0 %v8505_v28 }
 0x332   :  { %6838 = vmatprep.subr.bf16.mxu0 %v8365_v0 }
 0x335   :  { %6840 = vmatpush3.bf16.msra.mxu0 %v8509_v34 }
 0x336   :  { %6841 = vmatprep.subr.bf16.mxu0 %v8365_v0 }
 0x339   :  { %6843 = vmatpush3.bf16.msra.mxu0 %v8513_v40 }
 0x33a   :  { %6844 = vmatprep.subr.bf16.mxu0 %v8365_v0 }
 0x33d   :  { %6846 = vmatpush3.bf16.msra.mxu0 %v8517_v46 }
 0x33e   :  { %6847 = vmatprep.subr.bf16.mxu0 %v8365_v0 }
 0x341   :  { %6849 = vmatpush3.bf16.msra.mxu0 %v8521_v50 }
 0x342   :  { %6874 = vmatprep.subr.bf16.mxu0 %v8365_v0 }
 0x3f7   :  { %v566_v24 = vpop.f32.mrb[10].mxu0 }
 0x3f8   :  { %v570_v25 = vadd.f32 %v566_v24, %v225_v23  ;;  %v6209_v26 = vpop.f32.mrb[11].mxu0  ;;  %v1039_v24 = vld [vmem:[#allocation9 + $0xf0] sm:$0xff] }
 0x3fa   :  { %8166 = vtanh.f32 %v570_v25  ;;  %v1040_v25 = vld [vmem:[#allocation9 + $0xf8] sm:$0xff] }
 0x3fb   :  { %v8741_v26 = vpack.c.bf16 %v1040_v25, %v1039_v24 }
 0x404   :  { %v8662_v27 = vpop.eup %8166 }
 0x405   :  { %6243 = vmatmul.mubr.f32.vlgmr.msra.gmra.mrb[4].mxu1 %v8662_v27 }
 0x406   :  { %6852 = vmatpush3.bf16.msra.mxu1 %v8491_v9  ;;  %6312 = vmatprep.mubr.msk.f32.mxu1 %vm8366_vm0, %v8367_v1 }
 0x407   :  { %6853 = vmatprep.subr.bf16.mxu1 %v8365_v0 }
 0x40a   :  { %6855 = vmatpush3.bf16.msra.mxu1 %v8494_v15 }
 0x40b   :  { %6856 = vmatprep.subr.bf16.mxu1 %v8365_v0 }
 0x40e   :  { %6858 = vmatpush3.bf16.msra.mxu1 %v8498_v21 }
 0x40f   :  { %6859 = vmatprep.subr.bf16.mxu1 %v8365_v0 }
 0x412   :  { %6861 = vmatpush3.bf16.msra.mxu1 %v8505_v28 }
 0x413   :  { %6862 = vmatprep.subr.bf16.mxu1 %v8365_v0 }
 0x416   :  { %6864 = vmatpush3.bf16.msra.mxu1 %v8509_v34 }
 0x417   :  { %6865 = vmatprep.subr.bf16.mxu1 %v8365_v0 }
 0x41a   :  { %6867 = vmatpush3.bf16.msra.mxu1 %v8513_v40 }
 0x41b   :  { %6868 = vmatprep.subr.bf16.mxu1 %v8365_v0 }
 0x41e   :  { %6870 = vmatpush3.bf16.msra.mxu1 %v8517_v46 }
 0x41f   :  { %6871 = vmatprep.subr.bf16.mxu1 %v8365_v0 }
 0x422   :  { %6873 = vmatpush3.bf16.msra.mxu1 %v8521_v50 }
 0x4d8   :  { %v642_v30 = vpop.f32.mrb[4].mxu1 }
 0x4d9   :  { %v646_v31 = vadd.f32 %v642_v30, %v230_v29  ;;  %v6244_v32 = vpop.f32.mrb[5].mxu1 }
 0x4db   :  { %8168 = vtanh.f32 %v646_v31 }
 0x4e5   :  { %v8684_v33 = vpop.eup %8168 }
 0x4e6   :  { %6278 = vmatmul.mubr.f32.vlgmr.msra.gmra.mrb[12].mxu0 %v8684_v33 }
 0x4e7   :  { %6876 = vmatpush3.bf16.msra.mxu0 %v8491_v9  ;;  %6347 = vmatprep.mubr.msk.f32.mxu0 %vm8366_vm0, %v8367_v1  ;;  %v887_v9 = vld [vmem:[#allocation7 + $0x80] sm:$0xff] }
 0x4e8   :  { %6877 = vmatprep.subr.bf16.mxu0 %v8365_v0 }
 0x4eb   :  { %6879 = vmatpush3.bf16.msra.mxu0 %v8494_v15  ;;  %v888_v15 = vld [vmem:[#allocation7 + $0x88] sm:$0xff] }
 0x4ec   :  { %6880 = vmatprep.subr.bf16.mxu0 %v8365_v0 }
 0x4ef   :  { %6882 = vmatpush3.bf16.msra.mxu0 %v8498_v21  ;;  %v6898_v21 = vpack.c.bf16 %v888_v15, %v887_v9 }
 0x4f0   :  { %6883 = vmatprep.subr.bf16.mxu0 %v8365_v0 }
 0x4f1   :  { %6899 = vmatprep.subr.bf16.mxu1 %v6898_v21 }
 0x4f3   :  { %6885 = vmatpush3.bf16.msra.mxu0 %v8505_v28  ;;  %v235_v28 = vadd.f32 %v8609_v6, %v8585_v58  ;;  %v8721_v6 = vpack.c.bf16 %v1030_v5, %v1029_v4 }
 0x4f4   :  { %6886 = vmatprep.subr.bf16.mxu0 %v8365_v0 }
 0x4f7   :  { %6888 = vmatpush3.bf16.msra.mxu0 %v8509_v34 }
 0x4f8   :  { %6889 = vmatprep.subr.bf16.mxu0 %v8365_v0 }
 0x4fb   :  { %6891 = vmatpush3.bf16.msra.mxu0 %v8513_v40 }
 0x4fc   :  { %6892 = vmatprep.subr.bf16.mxu0 %v8365_v0 }
 0x4ff   :  { %6894 = vmatpush3.bf16.msra.mxu0 %v8517_v46  ;;  %v6910_v46 = vpack.c.bf16 %v894_v45, %v893_v44 }
 0x500   :  { %6895 = vmatprep.subr.bf16.mxu0 %v8365_v0 }
 0x503   :  { %6897 = vmatpush3.bf16.msra.mxu0 %v8521_v50  ;;  %v897_v50 = vld [vmem:[#allocation7 + $0xd0] sm:$0xff] }
 0x504   :  { %6930 = vmatprep.subr.bf16.mxu0 %v8365_v0  ;;  %v6918_v52 = vpack.c.bf16 %v898_v51, %v897_v50 }
 0x5b9   :  { %v718_v34 = vpop.f32.mrb[12].mxu0 }
 0x5ba   :  { %v722_v35 = vadd.f32 %v718_v34, %v235_v28  ;;  %v6279_v36 = vpop.f32.mrb[13].mxu0  ;;  %v245_v34 = vadd.f32 %v8613_v8, %v8585_v58 }
 0x5bc   :  { %8170 = vtanh.f32 %v722_v35 }
 0x5c6   :  { %v8171_v40 = vpop.eup %8170 }
 0x5c7   :  { %6313 = vmatmul.mubr.f32.vlgmr.msra.gmra.mrb[6].mxu1 %v8171_v40 }
 0x5c8   :  { %6901 = vmatpush3.bf16.msra.mxu1 %v6898_v21  ;;  %6382 = vmatprep.mubr.f32.mxu1 %v8588_v3  ;;  %v8717_v3 = vpack.c.bf16 %v1028_v2, %v1027_v63 }
 0x5c9   :  { %6903 = vmatprep.subr.bf16.mxu1 %v6902_v39 }
 0x5cc   :  { %6905 = vmatpush3.bf16.msra.mxu1 %v6902_v39  ;;  %v8798_v39 = vld [vmem:[#allocation11 + $0x1] ss:$0 sm:$0xff] }
 0x5cd   :  { %6907 = vmatprep.subr.bf16.mxu1 %v6906_v43 }
 0x5d0   :  { %6909 = vmatpush3.bf16.msra.mxu1 %v6906_v43 }
 0x5d1   :  { %6911 = vmatprep.subr.bf16.mxu1 %v6910_v46 }
 0x5d4   :  { %6913 = vmatpush3.bf16.msra.mxu1 %v6910_v46 }
 0x5d5   :  { %6915 = vmatprep.subr.bf16.mxu1 %v6914_v49 }
 0x5d8   :  { %6917 = vmatpush3.bf16.msra.mxu1 %v6914_v49 }
 0x5d9   :  { %6919 = vmatprep.subr.bf16.mxu1 %v6918_v52 }
 0x5dc   :  { %6921 = vmatpush3.bf16.msra.mxu1 %v6918_v52 }
 0x5dd   :  { %6923 = vmatprep.subr.bf16.mxu1 %v6922_v55 }
 0x5e0   :  { %6925 = vmatpush3.bf16.msra.mxu1 %v6922_v55 }
 0x5e1   :  { %6927 = vmatprep.subr.bf16.mxu1 %v6926_v59 }
 0x5e4   :  { %6929 = vmatpush3.bf16.msra.mxu1 %v6926_v59 }
 0x5e5   :  { %6954 = vmatprep.subr.bf16.mxu1 %v8365_v0 }
 0x5e7   :  { %6383 = vmatmul.mubr.f32.vlgmr.msra.gmra.mrb[8].mxu1 %v8618_v16  ;;  %v8729_v16 = vpack.c.bf16 %v1034_v14, %v1033_v13 }
 0x5e8   :  { %6385 = vmatprep.mubr.f32.mxu1 %v8640_v22  ;;  %6956 = vmatpush3.bf16.msra.mxu1 %v8713_v62  ;;  %v1038_v22 = vld [vmem:[#allocation9 + $0xe8] sm:$0xff] }
 0x5e9   :  { %6957 = vmatprep.subr.bf16.mxu1 %v8365_v0  ;;  %v8737_v23 = vpack.c.bf16 %v1038_v22, %v1037_v20 }
 0x5eb   :  { %6386 = vmatmul.mubr.f32.gmra.mrb[10].mxu1 %v8662_v27  ;;  %v240_v27 = vadd.f32 %v8585_v58, %v8615_v10 }
 0x5ec   :  { %6388 = vmatprep.mubr.f32.mxu1 %v8684_v33  ;;  %6959 = vmatpush3.bf16.msra.mxu1 %v8717_v3 }
 0x5ed   :  { %6960 = vmatprep.subr.bf16.mxu1 %v8365_v0 }
 0x5ef   :  { %6389 = vmatmul.mubr.f32.gmra.mrb[12].mxu1 %v8171_v40 }
 0x5f0   :  { %6962 = vmatpush3.bf16.msra.mxu1 %v8721_v6 }
 0x5f1   :  { %6963 = vmatprep.subr.bf16.mxu1 %v8365_v0 }
 0x5f4   :  { %6965 = vmatpush3.bf16.msra.mxu1 %v8725_v12 }
 0x5f5   :  { %6966 = vmatprep.subr.bf16.mxu1 %v8365_v0 }
 0x5f8   :  { %6968 = vmatpush3.bf16.msra.mxu1 %v8729_v16 }
 0x5f9   :  { %6969 = vmatprep.subr.bf16.mxu1 %v8365_v0 }
 0x5fc   :  { %6971 = vmatpush3.bf16.msra.mxu1 %v8733_v19 }
 0x5fd   :  { %6972 = vmatprep.subr.bf16.mxu1 %v8365_v0 }
 0x600   :  { %6974 = vmatpush3.bf16.msra.mxu1 %v8737_v23 }
 0x601   :  { %6975 = vmatprep.subr.bf16.mxu1 %v8365_v0 }
 0x604   :  { %6977 = vmatpush3.bf16.msra.mxu1 %v8741_v26 }
 0x605   :  { %7002 = vmatprep.subr.bf16.mxu1 %v8365_v0 }
 0x69a   :  { %v794_v29 = vpop.f32.mrb[6].mxu1 }
 0x69b   :  { %v798_v30 = vadd.f32 %v794_v29, %v240_v27  ;;  %v6314_v31 = vpop.f32.mrb[7].mxu1 }
 0x69d   :  { %8172 = vtanh.f32 %v798_v30 }
 0x6a7   :  { %v8173_v32 = vpop.eup %8172 }
 0x6a8   :  { %6348 = vmatmul.mubr.f32.vlgmr.msra.gmra.mrb[14].mxu0 %v8173_v32  ;;  %6391 = vmatprep.mubr.f32.mxu1 %v8173_v32 }
 0x6a9   :  { %6932 = vmatpush3.bf16.msra.mxu0 %v8713_v62  ;;  %6426 = vmatprep.mubr.msk.f32.mxu0 %vm8366_vm0, %v8367_v1 }
 0x6aa   :  { %6933 = vmatprep.subr.bf16.mxu0 %v8365_v0 }
 0x6ad   :  { %6935 = vmatpush3.bf16.msra.mxu0 %v8717_v3 }
 0x6ae   :  { %6936 = vmatprep.subr.bf16.mxu0 %v8365_v0 }
 0x6b1   :  { %6938 = vmatpush3.bf16.msra.mxu0 %v8721_v6 }
 0x6b2   :  { %6939 = vmatprep.subr.bf16.mxu0 %v8365_v0 }
 0x6b5   :  { %6941 = vmatpush3.bf16.msra.mxu0 %v8725_v12 }
 0x6b6   :  { %6942 = vmatprep.subr.bf16.mxu0 %v8365_v0 }
 0x6b9   :  { %6944 = vmatpush3.bf16.msra.mxu0 %v8729_v16 }
 0x6ba   :  { %v8758_v10 = vpop.f32.mrb[8].mxu1  ;;  %6945 = vmatprep.subr.bf16.mxu0 %v8365_v0 }
 0x6bb   :  { %v977_v33 = vpop.f32.mrb[9].mxu1  ;;  %v983_v45 = vadd.f32 %v8758_v10, %v8798_v39 }
 0x6bc   :  { %v978_v40 = vadd.f32 %v8798_v39, %v977_v33 }
 0x6bd   :  { %6947 = vmatpush3.bf16.msra.mxu0 %v8733_v19 }
 0x6be   :  { %v8762_v9 = vpop.f32.mrb[10].mxu1  ;;  %6948 = vmatprep.subr.bf16.mxu0 %v8365_v0 }
 0x6bf   :  { %v8765_v15 = vpop.f32.mrb[11].mxu1  ;;  %v993_v55 = vadd.f32 %v8762_v9, %v8798_v39 }
 0x6c0   :  { %v988_v50 = vadd.f32 %v8798_v39, %v8765_v15 }
 0x6c1   :  { %6950 = vmatpush3.bf16.msra.mxu0 %v8737_v23 }
 0x6c2   :  { %v8768_v21 = vpop.f32.mrb[12].mxu1  ;;  %6951 = vmatprep.subr.bf16.mxu0 %v8365_v0 }
 0x6c3   :  { %v8771_v28 = vpop.f32.mrb[13].mxu1 }
 0x6c4   :  { %v998_v61 = vadd.f32 %v8798_v39, %v8771_v28 }
 0x6c5   :  { %6953 = vmatpush3.bf16.msra.mxu0 %v8741_v26 }
 0x6c6   :  { %6978 = vmatprep.subr.bf16.mxu0 %v8365_v0 }
 0x6c8   :  { %6427 = vmatmul.mubr.f32.vlgmr.msra.gmra.mrb[16].mxu0 %v8367_v1 }
 0x6c9   :  { %6980 = vmatpush3.bf16.msra.mxu0 %v8713_v62  ;;  %6496 = vmatprep.mubr.msk.f32.mxu0 %vm8366_vm0, %v8367_v1 }
 0x6ca   :  { %6981 = vmatprep.subr.bf16.mxu0 %v8365_v0 }
 0x6cd   :  { %6983 = vmatpush3.bf16.msra.mxu0 %v8717_v3 }
 0x6ce   :  { %6984 = vmatprep.subr.bf16.mxu0 %v8365_v0 }
 0x6d1   :  { %6986 = vmatpush3.bf16.msra.mxu0 %v8721_v6 }
 0x6d2   :  { %6987 = vmatprep.subr.bf16.mxu0 %v8365_v0 }
 0x6d5   :  { %6989 = vmatpush3.bf16.msra.mxu0 %v8725_v12 }
 0x6d6   :  { %6990 = vmatprep.subr.bf16.mxu0 %v8365_v0 }
 0x6d9   :  { %6992 = vmatpush3.bf16.msra.mxu0 %v8729_v16 }
 0x6da   :  { %6993 = vmatprep.subr.bf16.mxu0 %v8365_v0 }
 0x6dd   :  { %6995 = vmatpush3.bf16.msra.mxu0 %v8733_v19 }
 0x6de   :  { %6996 = vmatprep.subr.bf16.mxu0 %v8365_v0 }
 0x6e1   :  { %6998 = vmatpush3.bf16.msra.mxu0 %v8737_v23 }
 0x6e2   :  { %6999 = vmatprep.subr.bf16.mxu0 %v8365_v0 }
 0x6e5   :  { %7001 = vmatpush3.bf16.msra.mxu0 %v8741_v26 }
 0x6e6   :  { %7026 = vmatprep.subr.bf16.mxu0 %v8365_v0 }
 0x77b   :  { %v870_v35 = vpop.f32.mrb[14].mxu0 }
 0x77c   :  { %v874_v36 = vadd.f32 %v870_v35, %v245_v34  ;;  %v6349_v37 = vpop.f32.mrb[15].mxu0 }
 0x77e   :  { %8174 = vtanh.f32 %v874_v36 }
 0x788   :  { %v8175_v38 = vpop.eup %8174 }
 0x789   :  { %6392 = vmatmul.mubr.f32.gmra.mrb[14].mxu1 %v8175_v38 }
 0x78a   :  { %6461 = vmatprep.mubr.msk.f32.mxu1 %vm8366_vm0, %v8367_v1 }
 0x79b   :  { %v1108_v41 = vpop.f32.mrb[16].mxu0 }
 0x79c   :  { %v1112_v42 = vadd.f32 %v1108_v41, %v978_v40  ;;  %v6428_v43 = vpop.f32.mrb[17].mxu0 }
 0x79e   :  { %8176 = vtanh.f32 %v1112_v42 }
 0x7a8   :  { %v8177_v44 = vpop.eup %8176 }
 0x7a9   :  { %6462 = vmatmul.mubr.f32.vlgmr.msra.gmra.mrb[16].mxu1 %v8177_v44 }
 0x7aa   :  { %7004 = vmatpush3.bf16.msra.mxu1 %v8713_v62  ;;  %6531 = vmatprep.mubr.msk.f32.mxu1 %vm8366_vm0, %v8367_v1 }
 0x7ab   :  { %7005 = vmatprep.subr.bf16.mxu1 %v8365_v0 }
 0x7ae   :  { %7007 = vmatpush3.bf16.msra.mxu1 %v8717_v3 }
 0x7af   :  { %7008 = vmatprep.subr.bf16.mxu1 %v8365_v0 }
 0x7b2   :  { %7010 = vmatpush3.bf16.msra.mxu1 %v8721_v6 }
 0x7b3   :  { %7011 = vmatprep.subr.bf16.mxu1 %v8365_v0 }
 0x7b6   :  { %7013 = vmatpush3.bf16.msra.mxu1 %v8725_v12 }
 0x7b7   :  { %7014 = vmatprep.subr.bf16.mxu1 %v8365_v0 }
 0x7ba   :  { %7016 = vmatpush3.bf16.msra.mxu1 %v8729_v16 }
 0x7bb   :  { %7017 = vmatprep.subr.bf16.mxu1 %v8365_v0 }
 0x7be   :  { %7019 = vmatpush3.bf16.msra.mxu1 %v8733_v19 }
 0x7bf   :  { %7020 = vmatprep.subr.bf16.mxu1 %v8365_v0 }
 0x7c2   :  { %7022 = vmatpush3.bf16.msra.mxu1 %v8737_v23 }
 0x7c3   :  { %7023 = vmatprep.subr.bf16.mxu1 %v8365_v0 }
 0x7c6   :  { %7025 = vmatpush3.bf16.msra.mxu1 %v8741_v26 }
 0x7c7   :  { %7050 = vmatprep.subr.bf16.mxu1 %v8365_v0 }
 0x85c   :  { %v8819_v58 = vpop.f32.mrb[14].mxu1 }
 0x85d   :  { %v8821_v8 = vpop.f32.mrb[15].mxu1 }
 0x87c   :  { %v1181_v46 = vpop.f32.mrb[16].mxu1 }
 0x87d   :  { %v1185_v47 = vadd.f32 %v1181_v46, %v983_v45  ;;  %v6463_v48 = vpop.f32.mrb[17].mxu1 }
 0x87f   :  { %8178 = vtanh.f32 %v1185_v47 }
 0x889   :  { %v8179_v49 = vpop.eup %8178 }
 0x88a   :  { %6497 = vmatmul.mubr.f32.vlgmr.msra.gmra.mrb[18].mxu0 %v8179_v49 }
 0x88b   :  { %7028 = vmatpush3.bf16.msra.mxu0 %v8713_v62  ;;  %6566 = vmatprep.mubr.msk.f32.mxu0 %vm8366_vm0, %v8367_v1 }
 0x88c   :  { %7029 = vmatprep.subr.bf16.mxu0 %v8365_v0 }
 0x88f   :  { %7031 = vmatpush3.bf16.msra.mxu0 %v8717_v3 }
 0x890   :  { %7032 = vmatprep.subr.bf16.mxu0 %v8365_v0 }
 0x893   :  { %7034 = vmatpush3.bf16.msra.mxu0 %v8721_v6 }
 0x894   :  { %7035 = vmatprep.subr.bf16.mxu0 %v8365_v0 }
 0x897   :  { %7037 = vmatpush3.bf16.msra.mxu0 %v8725_v12 }
 0x898   :  { %7038 = vmatprep.subr.bf16.mxu0 %v8365_v0 }
 0x89b   :  { %7040 = vmatpush3.bf16.msra.mxu0 %v8729_v16 }
 0x89c   :  { %7041 = vmatprep.subr.bf16.mxu0 %v8365_v0 }
 0x89f   :  { %7043 = vmatpush3.bf16.msra.mxu0 %v8733_v19 }
 0x8a0   :  { %7044 = vmatprep.subr.bf16.mxu0 %v8365_v0 }
 0x8a3   :  { %7046 = vmatpush3.bf16.msra.mxu0 %v8737_v23 }
 0x8a4   :  { %7047 = vmatprep.subr.bf16.mxu0 %v8365_v0 }
 0x8a7   :  { %7049 = vmatpush3.bf16.msra.mxu0 %v8741_v26 }
 0x8a8   :  { %7074 = vmatprep.subr.bf16.mxu0 %v8365_v0 }
 0x95d   :  { %v1254_v51 = vpop.f32.mrb[18].mxu0 }
 0x95e   :  { %v1258_v52 = vadd.f32 %v1254_v51, %v988_v50  ;;  %v6498_v53 = vpop.f32.mrb[19].mxu0 }
 0x960   :  { %8180 = vtanh.f32 %v1258_v52 }
 0x96a   :  { %v8181_v54 = vpop.eup %8180 }
 0x96b   :  { %6532 = vmatmul.mubr.f32.vlgmr.msra.gmra.mrb[18].mxu1 %v8181_v54 }
 0x96c   :  { %7052 = vmatpush3.bf16.msra.mxu1 %v8713_v62  ;;  %6601 = vmatprep.mubr.msk.f32.mxu1 %vm8366_vm0, %v8367_v1 }
 0x96d   :  { %7053 = vmatprep.subr.bf16.mxu1 %v8365_v0 }
 0x970   :  { %7055 = vmatpush3.bf16.msra.mxu1 %v8717_v3 }
 0x971   :  { %7056 = vmatprep.subr.bf16.mxu1 %v8365_v0 }
 0x974   :  { %7058 = vmatpush3.bf16.msra.mxu1 %v8721_v6 }
 0x975   :  { %7059 = vmatprep.subr.bf16.mxu1 %v8365_v0 }
 0x978   :  { %7061 = vmatpush3.bf16.msra.mxu1 %v8725_v12 }
 0x979   :  { %7062 = vmatprep.subr.bf16.mxu1 %v8365_v0 }
 0x97c   :  { %7064 = vmatpush3.bf16.msra.mxu1 %v8729_v16 }
 0x97d   :  { %7065 = vmatprep.subr.bf16.mxu1 %v8365_v0 }
 0x980   :  { %7067 = vmatpush3.bf16.msra.mxu1 %v8733_v19 }
 0x981   :  { %7068 = vmatprep.subr.bf16.mxu1 %v8365_v0 }
 0x984   :  { %7070 = vmatpush3.bf16.msra.mxu1 %v8737_v23 }
 0x985   :  { %7071 = vmatprep.subr.bf16.mxu1 %v8365_v0 }
 0x988   :  { %7073 = vmatpush3.bf16.msra.mxu1 %v8741_v26 }
 0x989   :  { %7098 = vmatprep.subr.bf16.mxu1 %v8365_v0 }
 0xa3e   :  { %v1327_v56 = vpop.f32.mrb[18].mxu1 }
 0xa3f   :  { %v1331_v57 = vadd.f32 %v1327_v56, %v993_v55  ;;  %v6533_v59 = vpop.f32.mrb[19].mxu1 }
 0xa41   :  { %8182 = vtanh.f32 %v1331_v57 }
 0xa4b   :  { %v8183_v60 = vpop.eup %8182 }
 0xa4c   :  { %6567 = vmatmul.mubr.f32.vlgmr.msra.gmra.mrb[20].mxu0 %v8183_v60 }
 0xa4d   :  { %7076 = vmatpush3.bf16.msra.mxu0 %v8713_v62  ;;  %6636 = vmatprep.mubr.msk.f32.mxu0 %vm8366_vm0, %v8367_v1 }
 0xa4e   :  { %7077 = vmatprep.subr.bf16.mxu0 %v8365_v0 }
 0xa51   :  { %7079 = vmatpush3.bf16.msra.mxu0 %v8717_v3 }
 0xa52   :  { %7080 = vmatprep.subr.bf16.mxu0 %v8365_v0 }
 0xa55   :  { %7082 = vmatpush3.bf16.msra.mxu0 %v8721_v6 }
 0xa56   :  { %7083 = vmatprep.subr.bf16.mxu0 %v8365_v0 }
 0xa59   :  { %7085 = vmatpush3.bf16.msra.mxu0 %v8725_v12 }
 0xa5a   :  { %7086 = vmatprep.subr.bf16.mxu0 %v8365_v0 }
 0xa5d   :  { %7088 = vmatpush3.bf16.msra.mxu0 %v8729_v16 }
 0xa5e   :  { %7089 = vmatprep.subr.bf16.mxu0 %v8365_v0 }
 0xa61   :  { %7091 = vmatpush3.bf16.msra.mxu0 %v8733_v19 }
 0xa62   :  { %7092 = vmatprep.subr.bf16.mxu0 %v8365_v0 }
 0xa65   :  { %7094 = vmatpush3.bf16.msra.mxu0 %v8737_v23 }
 0xa66   :  { %7095 = vmatprep.subr.bf16.mxu0 %v8365_v0 }
 0xa69   :  { %7097 = vmatpush3.bf16.msra.mxu0 %v8741_v26 }
 0xb1f   :  { %v1400_v63 = vpop.f32.mrb[20].mxu0 }
 0xb20   :  { %v1404_v2 = vadd.f32 %v1400_v63, %v998_v61  ;;  %v6568_v4 = vpop.f32.mrb[21].mxu0 }
 0xb22   :  { %8184 = vtanh.f32 %v1404_v2 }
 0xb2c   :  { %v8185_v5 = vpop.eup %8184 }
 0xb2d   :  { %6602 = vmatmul.mubr.f32.vlgmr.msra.gmra.mrb[20].mxu1 %v8185_v5 }
 0xb2e   :  { %7100 = vmatpush3.bf16.msra.mxu1 %v8713_v62  ;;  %6671 = vmatprep.mubr.msk.f32.mxu1 %vm8366_vm0, %v8367_v1  ;;  %v1003_v62 = vadd.f32 %v8768_v21, %v8798_v39 }
 0xb2f   :  { %7101 = vmatprep.subr.bf16.mxu1 %v8365_v0 }
 0xb32   :  { %7103 = vmatpush3.bf16.msra.mxu1 %v8717_v3 }
 0xb33   :  { %7104 = vmatprep.subr.bf16.mxu1 %v8365_v0 }
 0xb36   :  { %7106 = vmatpush3.bf16.msra.mxu1 %v8721_v6 }
 0xb37   :  { %7107 = vmatprep.subr.bf16.mxu1 %v8365_v0 }
 0xb3a   :  { %7109 = vmatpush3.bf16.msra.mxu1 %v8725_v12  ;;  %v1008_v12 = vadd.f32 %v8798_v39, %v8821_v8 }
 0xb3b   :  { %7110 = vmatprep.subr.bf16.mxu1 %v8365_v0 }
 0xb3e   :  { %7112 = vmatpush3.bf16.msra.mxu1 %v8729_v16 }
 0xb3f   :  { %7113 = vmatprep.subr.bf16.mxu1 %v8365_v0 }
 0xb42   :  { %7115 = vmatpush3.bf16.msra.mxu1 %v8733_v19 }
 0xb43   :  { %7116 = vmatprep.subr.bf16.mxu1 %v8365_v0 }
 0xb46   :  { %7118 = vmatpush3.bf16.msra.mxu1 %v8737_v23 }
 0xb47   :  { %7119 = vmatprep.subr.bf16.mxu1 %v8365_v0 }
 0xb4a   :  { %7121 = vmatpush3.bf16.msra.mxu1 %v8741_v26 }
 0xc00   :  { %v1473_v3 = vpop.f32.mrb[20].mxu1 }
 0xc01   :  { %v1477_v6 = vadd.f32 %v1473_v3, %v1003_v62  ;;  %v6603_v7 = vpop.f32.mrb[21].mxu1 }
 0xc03   :  { %8186 = vtanh.f32 %v1477_v6 }
 0xc0d   :  { %v8187_v11 = vpop.eup %8186 }
 0xc0e   :  { %6637 = vmatmul.mubr.f32.vlgmr.msra.gmra.mrb[22].mxu0 %v8187_v11 }
 0xce1   :  { %v1546_v13 = vpop.f32.mrb[22].mxu0 }
 0xce2   :  { %v1550_v14 = vadd.f32 %v1546_v13, %v1008_v12  ;;  %v6638_v16 = vpop.f32.mrb[23].mxu0 }
 0xce4   :  { %8188 = vtanh.f32 %v1550_v14 }
 0xcee   :  { %v8189_v17 = vpop.eup %8188 }
 0xcef   :  { %6672 = vmatmul.mubr.f32.vlgmr.msra.gmra.mrb[22].mxu1 %v8189_v17 }
 0xcf0   :  { %8311 = shalt.err (!%p8308_p0)  }
 0xcf1   :  { %s8312_s30 = scalar_lea.vmem %s97_s13, 65536  ;;  %p8317_p2 = scmp.lt.s32.totalorder %s97_s13, %s97_s13 }
 0xcf2   :  { %p8313_p1 = scmp.ne.s32.totalorder %s97_s13, %s8312_s30  ;;  %p8318_p3 = scmp.lt.s32.totalorder %s8312_s30, %s8312_s30 }
 0xcf4   :  { %p8319_p4 = por %p8318_p3, %p8317_p2 }
 0xcf6   :  { %p8320_p5 = pnand %p8319_p4, %p8313_p1 }
 0xcf8   :  { %8323 = shalt.err (!%p8320_p5)  }
 0xcf9   :  { %99 = dma.hbm_to_vmem [thread:$0]  %s9121_s4, 65536, %s97_s13, [#allocation6] }
 0xcfa   :  { %s8324_s25 = scalar_lea.hbm %s9123_s6, 65536 }
 0xcfb   :  { %p8325_p6 = scmp.ne.s32.totalorder %s9123_s6, %s8324_s25  ;;  %p8328_p7 = scmp.lt.u32.totalorder %s8324_s25, %s9123_s6 }
 0xcfd   :  { %p8330_p8 = pnand %p8328_p7, %p8325_p6 }
 0xcff   :  { %8333 = shalt.err (!%p8330_p8)  }
 0xd00   :  { %s8334_s28 = scalar_lea.vmem %s109_s15, 65536  ;;  %p8339_p10 = scmp.lt.s32.totalorder %s109_s15, %s109_s15 }
 0xd01   :  { %p8335_p9 = scmp.ne.s32.totalorder %s109_s15, %s8334_s28  ;;  %p8340_p11 = scmp.lt.s32.totalorder %s8334_s28, %s8334_s28 }
 0xd03   :  { %p8341_p12 = por %p8340_p11, %p8339_p10 }
 0xd05   :  { %p8342_p13 = pnand %p8341_p12, %p8335_p9 }
 0xd07   :  { %8345 = shalt.err (!%p8342_p13)  }
 0xd08   :  { %111 = dma.hbm_to_vmem [thread:$0]  %s9123_s6, 65536, %s109_s15, [#allocation6 + $0x1]  ;;  %v1013_v0 = vadd.f32 %v8819_v58, %v8798_v39 }
 0xdc2   :  { %v1619_v18 = vpop.f32.mrb[22].mxu1 }
 0xdc3   :  { %v1623_v19 = vadd.f32 %v1619_v18, %v1013_v0  ;;  %v6673_v20 = vpop.f32.mrb[23].mxu1 }
 0xdc5   :  { %8190 = vtanh.f32 %v1623_v19 }
 0xdcf   :  { %v8931_v22 = vpop.eup %8190 }
 0xdd0   :  { %8352 = dma.done.wait [#allocation6], 65536 }
 0xdd1   :  { %8353 = vsyncadd [#allocation6], 4294901760 }
 0xdd2   :  { %8354 = dma.done.wait [#allocation6 + $0x1], 65536 }
 0xdd3   :  { %8355 = vsyncadd [#allocation6 + $0x1], 4294901760  ;;  %2377 = vmatprep.mubr.f32.mxu0 %v8367_v1  ;;  %2448 = vmatprep.mubr.f32.mxu1 %v8367_v1  ;;  %v1634_v23 = vld [vmem:[#allocation4 + $0x8] sm:$0xff]  ;;  %v1636_v25 = vld [vmem:[#allocation4 + $0x18] sm:$0xff] }
 0xdd4   :  { %v1666_v24 = vld [vmem:[#allocation4 + $0x108] sm:$0xff]  ;;  %v1668_v27 = vld [vmem:[#allocation4 + $0x118] sm:$0xff]  ;;  %v1633_v29 = vld [vmem:[#allocation4] sm:$0xff] }
 0xdd5   :  { %v7122_v26 = vpack.c.bf16 %v1666_v24, %v1634_v23  ;;  %v1665_v30 = vld [vmem:[#allocation4 + $0x100] sm:$0xff]  ;;  %v7154_v31 = vpack.c.bf16 %v1668_v27, %v1636_v25  ;;  %v1635_v10 = vld [vmem:[#allocation4 + $0x10] sm:$0xff]  ;;  %v1698_v9 = vld [vmem:[#allocation4 + $0x208] sm:$0xff] }
 0xdd6   :  { %v7124_v32 = vpack.c.bf16 %v1665_v30, %v1633_v29  ;;  %v1667_v33 = vld [vmem:[#allocation4 + $0x110] sm:$0xff]  ;;  %v1730_v21 = vld [vmem:[#allocation4 + $0x308] sm:$0xff]  ;;  %v1700_v28 = vld [vmem:[#allocation4 + $0x218] sm:$0xff] }
 0xdd7   :  { %7123 = vmatprep.subr.bf16.mxu0 %v7122_v26  ;;  %v7156_v15 = vpack.c.bf16 %v1667_v33, %v1635_v10  ;;  %v1732_v34 = vld [vmem:[#allocation4 + $0x318] sm:$0xff]  ;;  %7155 = vmatprep.subr.bf16.mxu1 %v7154_v31  ;;  %v7126_v35 = vpack.c.bf16 %v1730_v21, %v1698_v9  ;;  %v1697_v37 = vld [vmem:[#allocation4 + $0x200] sm:$0xff]  ;;  %v1699_v39 = vld [vmem:[#allocation4 + $0x210] sm:$0xff] }
 0xdd8   :  { %7125 = vmatpush1.bf16.msra.mxu0 %v7124_v32  ;;  %v7158_v36 = vpack.c.bf16 %v1732_v34, %v1700_v28  ;;  %v1729_v38 = vld [vmem:[#allocation4 + $0x300] sm:$0xff]  ;;  %v1731_v41 = vld [vmem:[#allocation4 + $0x310] sm:$0xff]  ;;  %v1762_v42 = vld [vmem:[#allocation4 + $0x408] sm:$0xff] }
 0xdd9   :  { %7157 = vmatpush1.bf16.msra.mxu1 %v7156_v15  ;;  %v7128_v40 = vpack.c.bf16 %v1729_v38, %v1697_v37  ;;  %v1794_v43 = vld [vmem:[#allocation4 + $0x508] sm:$0xff]  ;;  %7127 = vmatprep.subr.bf16.mxu0 %v7126_v35  ;;  %v7160_v44 = vpack.c.bf16 %v1731_v41, %v1699_v39  ;;  %v1764_v8 = vld [vmem:[#allocation4 + $0x418] sm:$0xff]  ;;  %v1761_v46 = vld [vmem:[#allocation4 + $0x400] sm:$0xff] }
 0xdda   :  { %7159 = vmatprep.subr.bf16.mxu1 %v7158_v36  ;;  %v7130_v58 = vpack.c.bf16 %v1794_v43, %v1762_v42  ;;  %v1796_v45 = vld [vmem:[#allocation4 + $0x518] sm:$0xff]  ;;  %v1793_v48 = vld [vmem:[#allocation4 + $0x500] sm:$0xff]  ;;  %v1763_v49 = vld [vmem:[#allocation4 + $0x410] sm:$0xff] }
 0xddb   :  { %v7162_v47 = vpack.c.bf16 %v1796_v45, %v1764_v8  ;;  %v1795_v50 = vld [vmem:[#allocation4 + $0x510] sm:$0xff]  ;;  %v7132_v51 = vpack.c.bf16 %v1793_v48, %v1761_v46  ;;  %v1826_v52 = vld [vmem:[#allocation4 + $0x608] sm:$0xff]  ;;  %v1828_v54 = vld [vmem:[#allocation4 + $0x618] sm:$0xff] }
 0xddc   :  { %7129 = vmatpush1.bf16.msra.mxu0 %v7128_v40  ;;  %v1858_v53 = vld [vmem:[#allocation4 + $0x708] sm:$0xff]  ;;  %v7164_v55 = vpack.c.bf16 %v1795_v50, %v1763_v49  ;;  %v1860_v57 = vld [vmem:[#allocation4 + $0x718] sm:$0xff]  ;;  %v1825_v59 = vld [vmem:[#allocation4 + $0x600] sm:$0xff] }
 0xddd   :  { %7161 = vmatpush1.bf16.msra.mxu1 %v7160_v44  ;;  %7131 = vmatprep.subr.bf16.mxu0 %v7130_v58  ;;  %v7134_v56 = vpack.c.bf16 %v1858_v53, %v1826_v52  ;;  %v1857_v60 = vld [vmem:[#allocation4 + $0x700] sm:$0xff]  ;;  %v7166_v61 = vpack.c.bf16 %v1860_v57, %v1828_v54  ;;  %v1827_v63 = vld [vmem:[#allocation4 + $0x610] sm:$0xff]  ;;  %v1890_v4 = vld [vmem:[#allocation4 + $0x808] sm:$0xff] }
 0xdde   :  { %7163 = vmatprep.subr.bf16.mxu1 %v7162_v47  ;;  %v1859_v2 = vld [vmem:[#allocation4 + $0x710] sm:$0xff]  ;;  %v1922_v5 = vld [vmem:[#allocation4 + $0x908] sm:$0xff]  ;;  %v1892_v62 = vld [vmem:[#allocation4 + $0x818] sm:$0xff]  ;;  %v7136_v6 = vpack.c.bf16 %v1857_v60, %v1825_v59 }
 0xddf   :  { %v1924_v3 = vld [vmem:[#allocation4 + $0x918] sm:$0xff]  ;;  %v7168_v7 = vpack.c.bf16 %v1859_v2, %v1827_v63  ;;  %v7138_v11 = vpack.c.bf16 %v1922_v5, %v1890_v4  ;;  %v1889_v12 = vld [vmem:[#allocation4 + $0x800] sm:$0xff]  ;;  %v1891_v14 = vld [vmem:[#allocation4 + $0x810] sm:$0xff]  ;;  %v8936_v4 = vmax.f32 %v8931_v22, 0.0 }
 0xde0   :  { %7133 = vmatpush1.bf16.msra.mxu0 %v7132_v51  ;;  %v1921_v13 = vld [vmem:[#allocation4 + $0x900] sm:$0xff]  ;;  %v7170_v16 = vpack.c.bf16 %v1924_v3, %v1892_v62  ;;  %v1923_v17 = vld [vmem:[#allocation4 + $0x910] sm:$0xff]  ;;  %v1954_v0 = vld [vmem:[#allocation4 + $0xa08] sm:$0xff] }
 0xde1   :  { %7165 = vmatpush1.bf16.msra.mxu1 %v7164_v55  ;;  %7135 = vmatprep.subr.bf16.mxu0 %v7134_v56  ;;  %v1986_v18 = vld [vmem:[#allocation4 + $0xb08] sm:$0xff]  ;;  %v1956_v19 = vld [vmem:[#allocation4 + $0xa18] sm:$0xff]  ;;  %v7140_v23 = vpack.c.bf16 %v1921_v13, %v1889_v12  ;;  %v7172_v24 = vpack.c.bf16 %v1923_v17, %v1891_v14  ;;  %v1953_v26 = vld [vmem:[#allocation4 + $0xa00] sm:$0xff] }
 0xde2   :  { %7167 = vmatprep.subr.bf16.mxu1 %v7166_v61  ;;  %v1988_v20 = vld [vmem:[#allocation4 + $0xb18] sm:$0xff]  ;;  %v7142_v25 = vpack.c.bf16 %v1986_v18, %v1954_v0  ;;  %v1985_v27 = vld [vmem:[#allocation4 + $0xb00] sm:$0xff]  ;;  %v1955_v29 = vld [vmem:[#allocation4 + $0xa10] sm:$0xff] }
 0xde3   :  { %v7174_v30 = vpack.c.bf16 %v1988_v20, %v1956_v19  ;;  %v1987_v31 = vld [vmem:[#allocation4 + $0xb10] sm:$0xff]  ;;  %v2018_v32 = vld [vmem:[#allocation4 + $0xc08] sm:$0xff]  ;;  %v2020_v33 = vld [vmem:[#allocation4 + $0xc18] sm:$0xff]  ;;  %v7144_v15 = vpack.c.bf16 %v1985_v27, %v1953_v26 }
 0xde4   :  { %7137 = vmatpush1.bf16.msra.mxu0 %v7136_v6  ;;  %v2050_v10 = vld [vmem:[#allocation4 + $0xd08] sm:$0xff]  ;;  %v2052_v9 = vld [vmem:[#allocation4 + $0xd18] sm:$0xff]  ;;  %v7176_v21 = vpack.c.bf16 %v1987_v31, %v1955_v29  ;;  %v2017_v34 = vld [vmem:[#allocation4 + $0xc00] sm:$0xff] }
 0xde5   :  { %7169 = vmatpush1.bf16.msra.mxu1 %v7168_v7  ;;  %7139 = vmatprep.subr.bf16.mxu0 %v7138_v11  ;;  %v7146_v28 = vpack.c.bf16 %v2050_v10, %v2018_v32  ;;  %v2049_v35 = vld [vmem:[#allocation4 + $0xd00] sm:$0xff]  ;;  %v2019_v36 = vld [vmem:[#allocation4 + $0xc10] sm:$0xff]  ;;  %v7178_v37 = vpack.c.bf16 %v2052_v9, %v2020_v33  ;;  %v2082_v39 = vld [vmem:[#allocation4 + $0xe08] sm:$0xff] }
 0xde6   :  { %7171 = vmatprep.subr.bf16.mxu1 %v7170_v16  ;;  %v2051_v38 = vld [vmem:[#allocation4 + $0xd10] sm:$0xff]  ;;  %v2114_v40 = vld [vmem:[#allocation4 + $0xf08] sm:$0xff]  ;;  %v2084_v41 = vld [vmem:[#allocation4 + $0xe18] sm:$0xff]  ;;  %v7148_v43 = vpack.c.bf16 %v2049_v35, %v2017_v34 }
 0xde7   :  { %v2116_v42 = vld [vmem:[#allocation4 + $0xf18] sm:$0xff]  ;;  %v7180_v44 = vpack.c.bf16 %v2051_v38, %v2019_v36  ;;  %v7150_v58 = vpack.c.bf16 %v2114_v40, %v2082_v39  ;;  %v2081_v8 = vld [vmem:[#allocation4 + $0xe00] sm:$0xff]  ;;  %v2083_v46 = vld [vmem:[#allocation4 + $0xe10] sm:$0xff] }
 0xde8   :  { %7141 = vmatpush1.bf16.msra.mxu0 %v7140_v23  ;;  %v2113_v45 = vld [vmem:[#allocation4 + $0xf00] sm:$0xff]  ;;  %v7182_v47 = vpack.c.bf16 %v2116_v42, %v2084_v41  ;;  %v2115_v48 = vld [vmem:[#allocation4 + $0xf10] sm:$0xff]  ;;  %v1638_v49 = vld [vmem:[#allocation4 + $0x28] sm:$0xff] }
 0xde9   :  { %7173 = vmatpush1.bf16.msra.mxu1 %v7172_v24  ;;  %7143 = vmatprep.subr.bf16.mxu0 %v7142_v25  ;;  %v1670_v50 = vld [vmem:[#allocation4 + $0x128] sm:$0xff]  ;;  %v1640_v51 = vld [vmem:[#allocation4 + $0x38] sm:$0xff]  ;;  %v7152_v53 = vpack.c.bf16 %v2113_v45, %v2081_v8  ;;  %v7184_v54 = vpack.c.bf16 %v2115_v48, %v2083_v46  ;;  %v1637_v56 = vld [vmem:[#allocation4 + $0x20] sm:$0xff] }
 0xdea   :  { %7175 = vmatprep.subr.bf16.mxu1 %v7174_v30  ;;  %v1672_v52 = vld [vmem:[#allocation4 + $0x138] sm:$0xff]  ;;  %v7186_v55 = vpack.c.bf16 %v1670_v50, %v1638_v49  ;;  %v1669_v57 = vld [vmem:[#allocation4 + $0x120] sm:$0xff]  ;;  %v1639_v59 = vld [vmem:[#allocation4 + $0x30] sm:$0xff] }
 0xdeb   :  { %v7218_v60 = vpack.c.bf16 %v1672_v52, %v1640_v51  ;;  %v1671_v61 = vld [vmem:[#allocation4 + $0x130] sm:$0xff]  ;;  %v1702_v63 = vld [vmem:[#allocation4 + $0x228] sm:$0xff]  ;;  %v1704_v5 = vld [vmem:[#allocation4 + $0x238] sm:$0xff]  ;;  %v7188_v3 = vpack.c.bf16 %v1669_v57, %v1637_v56 }
 0xdec   :  { %7145 = vmatpush1.bf16.msra.mxu0 %v7144_v15  ;;  %v1734_v2 = vld [vmem:[#allocation4 + $0x328] sm:$0xff]  ;;  %v1736_v62 = vld [vmem:[#allocation4 + $0x338] sm:$0xff]  ;;  %v7220_v6 = vpack.c.bf16 %v1671_v61, %v1639_v59  ;;  %v1701_v11 = vld [vmem:[#allocation4 + $0x220] sm:$0xff] }
 0xded   :  { %7177 = vmatpush1.bf16.msra.mxu1 %v7176_v21  ;;  %7147 = vmatprep.subr.bf16.mxu0 %v7146_v28  ;;  %v7190_v7 = vpack.c.bf16 %v1734_v2, %v1702_v63  ;;  %v1733_v12 = vld [vmem:[#allocation4 + $0x320] sm:$0xff]  ;;  %v1703_v13 = vld [vmem:[#allocation4 + $0x230] sm:$0xff]  ;;  %v7222_v14 = vpack.c.bf16 %v1736_v62, %v1704_v5  ;;  %v1766_v17 = vld [vmem:[#allocation4 + $0x428] sm:$0xff] }
 0xdee   :  { %7179 = vmatprep.subr.bf16.mxu1 %v7178_v37  ;;  %v1735_v16 = vld [vmem:[#allocation4 + $0x330] sm:$0xff]  ;;  %v1798_v0 = vld [vmem:[#allocation4 + $0x528] sm:$0xff]  ;;  %v1768_v22 = vld [vmem:[#allocation4 + $0x438] sm:$0xff]  ;;  %v7192_v19 = vpack.c.bf16 %v1733_v12, %v1701_v11 }
 0xdef   :  { %v1800_v18 = vld [vmem:[#allocation4 + $0x538] sm:$0xff]  ;;  %v7224_v20 = vpack.c.bf16 %v1735_v16, %v1703_v13  ;;  %v7194_v23 = vpack.c.bf16 %v1798_v0, %v1766_v17  ;;  %v1765_v24 = vld [vmem:[#allocation4 + $0x420] sm:$0xff]  ;;  %v1767_v26 = vld [vmem:[#allocation4 + $0x430] sm:$0xff] }
 0xdf0   :  { %7149 = vmatpush1.bf16.msra.mxu0 %v7148_v43  ;;  %v1797_v25 = vld [vmem:[#allocation4 + $0x520] sm:$0xff]  ;;  %v7226_v27 = vpack.c.bf16 %v1800_v18, %v1768_v22  ;;  %v1799_v29 = vld [vmem:[#allocation4 + $0x530] sm:$0xff]  ;;  %v1830_v30 = vld [vmem:[#allocation4 + $0x628] sm:$0xff] }
 0xdf1   :  { %7181 = vmatpush1.bf16.msra.mxu1 %v7180_v44  ;;  %7151 = vmatprep.subr.bf16.mxu0 %v7150_v58  ;;  %v1862_v31 = vld [vmem:[#allocation4 + $0x728] sm:$0xff]  ;;  %v1832_v32 = vld [vmem:[#allocation4 + $0x638] sm:$0xff]  ;;  %v7196_v33 = vpack.c.bf16 %v1797_v25, %v1765_v24  ;;  %v7228_v9 = vpack.c.bf16 %v1799_v29, %v1767_v26  ;;  %v1829_v21 = vld [vmem:[#allocation4 + $0x620] sm:$0xff] }
 0xdf2   :  { %7183 = vmatprep.subr.bf16.mxu1 %v7182_v47  ;;  %v1864_v10 = vld [vmem:[#allocation4 + $0x738] sm:$0xff]  ;;  %v7198_v15 = vpack.c.bf16 %v1862_v31, %v1830_v30  ;;  %v1861_v28 = vld [vmem:[#allocation4 + $0x720] sm:$0xff]  ;;  %v1831_v34 = vld [vmem:[#allocation4 + $0x630] sm:$0xff] }
 0xdf3   :  { %v7230_v35 = vpack.c.bf16 %v1864_v10, %v1832_v32  ;;  %v1863_v36 = vld [vmem:[#allocation4 + $0x730] sm:$0xff]  ;;  %v1894_v37 = vld [vmem:[#allocation4 + $0x828] sm:$0xff]  ;;  %v1896_v39 = vld [vmem:[#allocation4 + $0x838] sm:$0xff]  ;;  %v7200_v41 = vpack.c.bf16 %v1861_v28, %v1829_v21 }
 0xdf4   :  { %7153 = vmatpush1.bf16.msra.mxu0 %v7152_v53  ;;  %v1926_v38 = vld [vmem:[#allocation4 + $0x928] sm:$0xff]  ;;  %v1928_v40 = vld [vmem:[#allocation4 + $0x938] sm:$0xff]  ;;  %v7232_v42 = vpack.c.bf16 %v1863_v36, %v1831_v34  ;;  %v1893_v44 = vld [vmem:[#allocation4 + $0x820] sm:$0xff] }
 0xdf5   :  { %7185 = vmatpush1.bf16.msra.mxu1 %v7184_v54  ;;  %7187 = vmatprep.subr.bf16.mxu0 %v7186_v55  ;;  %v7202_v43 = vpack.c.bf16 %v1926_v38, %v1894_v37  ;;  %v1925_v58 = vld [vmem:[#allocation4 + $0x920] sm:$0xff]  ;;  %v1895_v8 = vld [vmem:[#allocation4 + $0x830] sm:$0xff]  ;;  %v7234_v45 = vpack.c.bf16 %v1928_v40, %v1896_v39  ;;  %v1958_v47 = vld [vmem:[#allocation4 + $0xa28] sm:$0xff] }
 0xdf6   :  { %7219 = vmatprep.subr.bf16.mxu1 %v7218_v60  ;;  %v1927_v46 = vld [vmem:[#allocation4 + $0x930] sm:$0xff]  ;;  %v1990_v48 = vld [vmem:[#allocation4 + $0xb28] sm:$0xff]  ;;  %v1960_v49 = vld [vmem:[#allocation4 + $0xa38] sm:$0xff]  ;;  %v7204_v51 = vpack.c.bf16 %v1925_v58, %v1893_v44 }
 0xdf7   :  { %2378 = vmatmul.mubr.f32.vlgmr.msra.gmra.mrb[24].mxu0 %v8936_v4  ;;  %v1992_v50 = vld [vmem:[#allocation4 + $0xb38] sm:$0xff]  ;;  %v7236_v52 = vpack.c.bf16 %v1927_v46, %v1895_v8  ;;  %v7206_v53 = vpack.c.bf16 %v1990_v48, %v1958_v47  ;;  %v1957_v54 = vld [vmem:[#allocation4 + $0xa20] sm:$0xff]  ;;  %v1959_v56 = vld [vmem:[#allocation4 + $0xa30] sm:$0xff] }
 0xdf8   :  { %2449 = vmatmul.mubr.f32.vlgmr.msra.gmra.mrb[24].mxu1 %v8936_v4  ;;  %7189 = vmatpush1.bf16.msra.mxu0 %v7188_v3  ;;  %v1989_v55 = vld [vmem:[#allocation4 + $0xb20] sm:$0xff]  ;;  %v7238_v57 = vpack.c.bf16 %v1992_v50, %v1960_v49  ;;  %v1991_v59 = vld [vmem:[#allocation4 + $0xb30] sm:$0xff]  ;;  %v2022_v60 = vld [vmem:[#allocation4 + $0xc28] sm:$0xff] }
 0xdf9   :  { %7221 = vmatpush1.bf16.msra.mxu1 %v7220_v6  ;;  %7191 = vmatprep.subr.bf16.mxu0 %v7190_v7  ;;  %v2054_v61 = vld [vmem:[#allocation4 + $0xd28] sm:$0xff]  ;;  %v2024_v63 = vld [vmem:[#allocation4 + $0xc38] sm:$0xff]  ;;  %v7208_v5 = vpack.c.bf16 %v1989_v55, %v1957_v54  ;;  %v7240_v62 = vpack.c.bf16 %v1991_v59, %v1959_v56  ;;  %v2021_v6 = vld [vmem:[#allocation4 + $0xc20] sm:$0xff] }
 0xdfa   :  { %7223 = vmatprep.subr.bf16.mxu1 %v7222_v14  ;;  %2519 = vmatprep.mubr.f32.mxu0 %v8367_v1  ;;  %v2056_v2 = vld [vmem:[#allocation4 + $0xd38] sm:$0xff]  ;;  %v7210_v3 = vpack.c.bf16 %v2054_v61, %v2022_v60  ;;  %v2053_v7 = vld [vmem:[#allocation4 + $0xd20] sm:$0xff]  ;;  %v2023_v11 = vld [vmem:[#allocation4 + $0xc30] sm:$0xff] }
 0xdfb   :  { %2590 = vmatprep.mubr.f32.mxu1 %v8367_v1  ;;  %v7242_v12 = vpack.c.bf16 %v2056_v2, %v2024_v63  ;;  %v2055_v13 = vld [vmem:[#allocation4 + $0xd30] sm:$0xff]  ;;  %v2086_v14 = vld [vmem:[#allocation4 + $0xe28] sm:$0xff]  ;;  %v2088_v17 = vld [vmem:[#allocation4 + $0xe38] sm:$0xff]  ;;  %v7212_v22 = vpack.c.bf16 %v2053_v7, %v2021_v6 }
 0xdfc   :  { %7193 = vmatpush1.bf16.msra.mxu0 %v7192_v19  ;;  %v2118_v16 = vld [vmem:[#allocation4 + $0xf28] sm:$0xff]  ;;  %v2120_v0 = vld [vmem:[#allocation4 + $0xf38] sm:$0xff]  ;;  %v7244_v18 = vpack.c.bf16 %v2055_v13, %v2023_v11  ;;  %v2087_v24 = vld [vmem:[#allocation4 + $0xe30] sm:$0xff] }
 0xdfd   :  { %7225 = vmatpush1.bf16.msra.mxu1 %v7224_v20  ;;  %7195 = vmatprep.subr.bf16.mxu0 %v7194_v23  ;;  %v7214_v19 = vpack.c.bf16 %v2118_v16, %v2086_v14  ;;  %v2085_v20 = vld [vmem:[#allocation4 + $0xe20] sm:$0xff]  ;;  %v7246_v25 = vpack.c.bf16 %v2120_v0, %v2088_v17  ;;  %v2119_v26 = vld [vmem:[#allocation4 + $0xf30] sm:$0xff]  ;;  %v1674_v29 = vld [vmem:[#allocation4 + $0x148] sm:$0xff] }
 0xdfe   :  { %7227 = vmatprep.subr.bf16.mxu1 %v7226_v27  ;;  %v2117_v23 = vld [vmem:[#allocation4 + $0xf20] sm:$0xff]  ;;  %v1642_v27 = vld [vmem:[#allocation4 + $0x48] sm:$0xff]  ;;  %v1644_v30 = vld [vmem:[#allocation4 + $0x58] sm:$0xff]  ;;  %v7248_v10 = vpack.c.bf16 %v2119_v26, %v2087_v24 }
 0xdff   :  { %v1676_v31 = vld [vmem:[#allocation4 + $0x158] sm:$0xff]  ;;  %v7216_v32 = vpack.c.bf16 %v2117_v23, %v2085_v20  ;;  %v1643_v21 = vld [vmem:[#allocation4 + $0x50] sm:$0xff]  ;;  %v1738_v36 = vld [vmem:[#allocation4 + $0x348] sm:$0xff] }
 0xe00   :  { %7197 = vmatpush1.bf16.msra.mxu0 %v7196_v33  ;;  %v7250_v33 = vpack.c.bf16 %v1674_v29, %v1642_v27  ;;  %v7282_v28 = vpack.c.bf16 %v1676_v31, %v1644_v30  ;;  %v1675_v34 = vld [vmem:[#allocation4 + $0x150] sm:$0xff]  ;;  %v1708_v37 = vld [vmem:[#allocation4 + $0x258] sm:$0xff]  ;;  %v1802_v46 = vld [vmem:[#allocation4 + $0x548] sm:$0xff] }
 0xe01   :  { %7229 = vmatpush1.bf16.msra.mxu1 %v7228_v9  ;;  %7199 = vmatprep.subr.bf16.mxu0 %v7198_v15  ;;  %v1641_v9 = vld [vmem:[#allocation4 + $0x40] sm:$0xff]  ;;  %v1740_v38 = vld [vmem:[#allocation4 + $0x358] sm:$0xff]  ;;  %v7284_v40 = vpack.c.bf16 %v1675_v34, %v1643_v21  ;;  %v1707_v44 = vld [vmem:[#allocation4 + $0x250] sm:$0xff] }
 0xe02   :  { %7231 = vmatprep.subr.bf16.mxu1 %v7230_v35  ;;  %v1673_v15 = vld [vmem:[#allocation4 + $0x140] sm:$0xff]  ;;  %v1706_v35 = vld [vmem:[#allocation4 + $0x248] sm:$0xff]  ;;  %v7286_v58 = vpack.c.bf16 %v1740_v38, %v1708_v37  ;;  %v1739_v8 = vld [vmem:[#allocation4 + $0x350] sm:$0xff] }
 0xe03   :  { %v7252_v39 = vpack.c.bf16 %v1673_v15, %v1641_v9  ;;  %v1772_v47 = vld [vmem:[#allocation4 + $0x458] sm:$0xff]  ;;  %v7288_v50 = vpack.c.bf16 %v1739_v8, %v1707_v44  ;;  %v1771_v54 = vld [vmem:[#allocation4 + $0x450] sm:$0xff]  ;;  %v1866_v59 = vld [vmem:[#allocation4 + $0x748] sm:$0xff] }
 0xe04   :  { %7201 = vmatpush1.bf16.msra.mxu0 %v7200_v41  ;;  %v7254_v41 = vpack.c.bf16 %v1738_v36, %v1706_v35  ;;  %v1804_v48 = vld [vmem:[#allocation4 + $0x558] sm:$0xff]  ;;  %v1803_v56 = vld [vmem:[#allocation4 + $0x550] sm:$0xff]  ;;  %v1930_v13 = vld [vmem:[#allocation4 + $0x948] sm:$0xff] }
 0xe05   :  { %7233 = vmatpush1.bf16.msra.mxu1 %v7232_v42  ;;  %7203 = vmatprep.subr.bf16.mxu0 %v7202_v43  ;;  %v1705_v42 = vld [vmem:[#allocation4 + $0x240] sm:$0xff]  ;;  %v7290_v55 = vpack.c.bf16 %v1804_v48, %v1772_v47  ;;  %v1836_v60 = vld [vmem:[#allocation4 + $0x658] sm:$0xff]  ;;  %v7292_v2 = vpack.c.bf16 %v1803_v56, %v1771_v54  ;;  %v1835_v6 = vld [vmem:[#allocation4 + $0x650] sm:$0xff] }
 0xe06   :  { %7235 = vmatprep.subr.bf16.mxu1 %v7234_v45  ;;  %v1737_v43 = vld [vmem:[#allocation4 + $0x340] sm:$0xff]  ;;  %v1770_v45 = vld [vmem:[#allocation4 + $0x448] sm:$0xff]  ;;  %v1868_v61 = vld [vmem:[#allocation4 + $0x758] sm:$0xff] }
 0xe07   :  { %v7256_v49 = vpack.c.bf16 %v1737_v43, %v1705_v42  ;;  %v7294_v7 = vpack.c.bf16 %v1868_v61, %v1836_v60  ;;  %v1867_v11 = vld [vmem:[#allocation4 + $0x750] sm:$0xff]  ;;  %v1900_v14 = vld [vmem:[#allocation4 + $0x858] sm:$0xff]  ;;  %v1994_v26 = vld [vmem:[#allocation4 + $0xb48] sm:$0xff] }
 0xe08   :  { %7205 = vmatpush1.bf16.msra.mxu0 %v7204_v51  ;;  %v7258_v51 = vpack.c.bf16 %v1802_v46, %v1770_v45  ;;  %v1932_v16 = vld [vmem:[#allocation4 + $0x958] sm:$0xff]  ;;  %v7296_v0 = vpack.c.bf16 %v1867_v11, %v1835_v6  ;;  %v1899_v20 = vld [vmem:[#allocation4 + $0x850] sm:$0xff]  ;;  %v2058_v34 = vld [vmem:[#allocation4 + $0xd48] sm:$0xff] }
 0xe09   :  { %7237 = vmatpush1.bf16.msra.mxu1 %v7236_v52  ;;  %7207 = vmatprep.subr.bf16.mxu0 %v7206_v53  ;;  %v1769_v52 = vld [vmem:[#allocation4 + $0x440] sm:$0xff]  ;;  %v7298_v23 = vpack.c.bf16 %v1932_v16, %v1900_v14  ;;  %v1931_v24 = vld [vmem:[#allocation4 + $0x950] sm:$0xff]  ;;  %v1964_v27 = vld [vmem:[#allocation4 + $0xa58] sm:$0xff] }
 0xe0a   :  { %7239 = vmatprep.subr.bf16.mxu1 %v7238_v57  ;;  %v1801_v53 = vld [vmem:[#allocation4 + $0x540] sm:$0xff]  ;;  %v1834_v57 = vld [vmem:[#allocation4 + $0x648] sm:$0xff]  ;;  %v1996_v29 = vld [vmem:[#allocation4 + $0xb58] sm:$0xff]  ;;  %v7300_v31 = vpack.c.bf16 %v1931_v24, %v1899_v20 }
 0xe0b   :  { %v7260_v63 = vpack.c.bf16 %v1801_v53, %v1769_v52  ;;  %v1963_v9 = vld [vmem:[#allocation4 + $0xa50] sm:$0xff]  ;;  %v7302_v15 = vpack.c.bf16 %v1996_v29, %v1964_v27  ;;  %v2028_v35 = vld [vmem:[#allocation4 + $0xc58] sm:$0xff]  ;;  %v2122_v8 = vld [vmem:[#allocation4 + $0xf48] sm:$0xff] }
 0xe0c   :  { %7209 = vmatpush1.bf16.msra.mxu0 %v7208_v5  ;;  %v7262_v5 = vpack.c.bf16 %v1866_v59, %v1834_v57  ;;  %v1995_v21 = vld [vmem:[#allocation4 + $0xb50] sm:$0xff]  ;;  %v2060_v36 = vld [vmem:[#allocation4 + $0xd58] sm:$0xff]  ;;  %v1678_v56 = vld [vmem:[#allocation4 + $0x168] sm:$0xff] }
 0xe0d   :  { %7241 = vmatpush1.bf16.msra.mxu1 %v7240_v62  ;;  %7211 = vmatprep.subr.bf16.mxu0 %v7210_v3  ;;  %v1833_v62 = vld [vmem:[#allocation4 + $0x640] sm:$0xff]  ;;  %v7304_v38 = vpack.c.bf16 %v1995_v21, %v1963_v9  ;;  %v2027_v42 = vld [vmem:[#allocation4 + $0xc50] sm:$0xff]  ;;  %v7306_v43 = vpack.c.bf16 %v2060_v36, %v2028_v35  ;;  %v2092_v45 = vld [vmem:[#allocation4 + $0xe58] sm:$0xff] }
 0xe0e   :  { %7243 = vmatprep.subr.bf16.mxu1 %v7242_v12  ;;  %v1865_v3 = vld [vmem:[#allocation4 + $0x740] sm:$0xff]  ;;  %v1898_v12 = vld [vmem:[#allocation4 + $0x848] sm:$0xff]  ;;  %v2059_v44 = vld [vmem:[#allocation4 + $0xd50] sm:$0xff] }
 0xe0f   :  { %v7264_v17 = vpack.c.bf16 %v1865_v3, %v1833_v62  ;;  %v2124_v46 = vld [vmem:[#allocation4 + $0xf58] sm:$0xff]  ;;  %v7308_v48 = vpack.c.bf16 %v2059_v44, %v2027_v42  ;;  %v2091_v52 = vld [vmem:[#allocation4 + $0xe50] sm:$0xff]  ;;  %v1742_v11 = vld [vmem:[#allocation4 + $0x368] sm:$0xff] }
 0xe10   :  { %7213 = vmatpush1.bf16.msra.mxu0 %v7212_v22  ;;  %v7266_v22 = vpack.c.bf16 %v1930_v13, %v1898_v12  ;;  %v7310_v53 = vpack.c.bf16 %v2124_v46, %v2092_v45  ;;  %v2123_v54 = vld [vmem:[#allocation4 + $0xf50] sm:$0xff]  ;;  %v1648_v57 = vld [vmem:[#allocation4 + $0x78] sm:$0xff]  ;;  %v1806_v24 = vld [vmem:[#allocation4 + $0x568] sm:$0xff] }
 0xe11   :  { %7245 = vmatpush1.bf16.msra.mxu1 %v7244_v18  ;;  %7215 = vmatprep.subr.bf16.mxu0 %v7214_v19  ;;  %v1897_v18 = vld [vmem:[#allocation4 + $0x840] sm:$0xff]  ;;  %v1680_v59 = vld [vmem:[#allocation4 + $0x178] sm:$0xff]  ;;  %v7312_v61 = vpack.c.bf16 %v2123_v54, %v2091_v52  ;;  %v1647_v62 = vld [vmem:[#allocation4 + $0x70] sm:$0xff] }
 0xe12   :  { %7247 = vmatprep.subr.bf16.mxu1 %v7246_v25  ;;  %v1929_v19 = vld [vmem:[#allocation4 + $0x940] sm:$0xff]  ;;  %v1962_v25 = vld [vmem:[#allocation4 + $0xa48] sm:$0xff]  ;;  %v7346_v3 = vpack.c.bf16 %v1680_v59, %v1648_v57  ;;  %v1679_v6 = vld [vmem:[#allocation4 + $0x170] sm:$0xff] }
 0xe13   :  { %v7268_v30 = vpack.c.bf16 %v1929_v19, %v1897_v18  ;;  %v1712_v12 = vld [vmem:[#allocation4 + $0x278] sm:$0xff]  ;;  %v7348_v16 = vpack.c.bf16 %v1679_v6, %v1647_v62  ;;  %v1711_v18 = vld [vmem:[#allocation4 + $0x270] sm:$0xff]  ;;  %v1870_v21 = vld [vmem:[#allocation4 + $0x768] sm:$0xff] }
 0xe14   :  { %7217 = vmatpush1.bf16.msra.mxu0 %v7216_v32  ;;  %v7270_v32 = vpack.c.bf16 %v1994_v26, %v1962_v25  ;;  %v1744_v13 = vld [vmem:[#allocation4 + $0x378] sm:$0xff]  ;;  %v1743_v20 = vld [vmem:[#allocation4 + $0x370] sm:$0xff]  ;;  %v1934_v44 = vld [vmem:[#allocation4 + $0x968] sm:$0xff] }
 0xe15   :  { %7249 = vmatpush1.bf16.msra.mxu1 %v7248_v10  ;;  %7251 = vmatprep.subr.bf16.mxu0 %v7250_v33  ;;  %v1961_v10 = vld [vmem:[#allocation4 + $0xa40] sm:$0xff]  ;;  %v7350_v19 = vpack.c.bf16 %v1744_v13, %v1712_v12  ;;  %v1776_v25 = vld [vmem:[#allocation4 + $0x478] sm:$0xff]  ;;  %v7352_v29 = vpack.c.bf16 %v1743_v20, %v1711_v18  ;;  %v1807_v9 = vld [vmem:[#allocation4 + $0x570] sm:$0xff] }
 0xe16   :  { %7283 = vmatprep.subr.bf16.mxu1 %v7282_v28  ;;  %v1993_v33 = vld [vmem:[#allocation4 + $0xb40] sm:$0xff]  ;;  %v2026_v28 = vld [vmem:[#allocation4 + $0xc48] sm:$0xff]  ;;  %v1808_v26 = vld [vmem:[#allocation4 + $0x578] sm:$0xff] }
 0xe17   :  { %2520 = vmatmul.mubr.f32.vlgmr.msra.gmra.mrb[26].mxu0 %v8936_v4  ;;  %v7272_v37 = vpack.c.bf16 %v1993_v33, %v1961_v10  ;;  %v1775_v10 = vld [vmem:[#allocation4 + $0x470] sm:$0xff]  ;;  %v7354_v33 = vpack.c.bf16 %v1808_v26, %v1776_v25  ;;  %v1998_v54 = vld [vmem:[#allocation4 + $0xb68] sm:$0xff] }
 0xe18   :  { %2591 = vmatmul.mubr.f32.vlgmr.msra.gmra.mrb[26].mxu1 %v8936_v4  ;;  %7253 = vmatpush1.bf16.msra.mxu0 %v7252_v39  ;;  %v7274_v39 = vpack.c.bf16 %v2058_v34, %v2026_v28  ;;  %v1840_v28 = vld [vmem:[#allocation4 + $0x678] sm:$0xff]  ;;  %v7356_v36 = vpack.c.bf16 %v1807_v9, %v1775_v10  ;;  %v1871_v42 = vld [vmem:[#allocation4 + $0x770] sm:$0xff]  ;;  %v2062_v6 = vld [vmem:[#allocation4 + $0xd68] sm:$0xff] }
 0xe19   :  { %7285 = vmatpush1.bf16.msra.mxu1 %v7284_v40  ;;  %7255 = vmatprep.subr.bf16.mxu0 %v7254_v41  ;;  %v2025_v40 = vld [vmem:[#allocation4 + $0xc40] sm:$0xff]  ;;  %v1872_v34 = vld [vmem:[#allocation4 + $0x778] sm:$0xff]  ;;  %v1935_v52 = vld [vmem:[#allocation4 + $0x970] sm:$0xff] }
 0xe1a   :  { %7287 = vmatprep.subr.bf16.mxu1 %v7286_v58  ;;  %2661 = vmatprep.mubr.f32.mxu0 %v8367_v1  ;;  %v2057_v41 = vld [vmem:[#allocation4 + $0xd40] sm:$0xff]  ;;  %v2090_v58 = vld [vmem:[#allocation4 + $0xe48] sm:$0xff]  ;;  %v1999_v62 = vld [vmem:[#allocation4 + $0xb70] sm:$0xff] }
 0xe1b   :  { %2732 = vmatprep.mubr.f32.mxu1 %v8367_v1  ;;  %v7276_v47 = vpack.c.bf16 %v2057_v41, %v2025_v40  ;;  %v1839_v40 = vld [vmem:[#allocation4 + $0x670] sm:$0xff]  ;;  %v7358_v41 = vpack.c.bf16 %v1872_v34, %v1840_v28  ;;  %v2126_v20 = vld [vmem:[#allocation4 + $0xf68] sm:$0xff] }
 0xe1c   :  { %7257 = vmatpush1.bf16.msra.mxu0 %v7256_v49  ;;  %v7278_v49 = vpack.c.bf16 %v2122_v8, %v2090_v58  ;;  %v1904_v58 = vld [vmem:[#allocation4 + $0x878] sm:$0xff]  ;;  %v7360_v46 = vpack.c.bf16 %v1871_v42, %v1839_v40  ;;  %v2063_v18 = vld [vmem:[#allocation4 + $0xd70] sm:$0xff]  ;;  %v1682_v9 = vld [vmem:[#allocation4 + $0x188] sm:$0xff] }
 0xe1d   :  { %7289 = vmatpush1.bf16.msra.mxu1 %v7288_v50  ;;  %7259 = vmatprep.subr.bf16.mxu0 %v7258_v51  ;;  %v2089_v50 = vld [vmem:[#allocation4 + $0xe40] sm:$0xff]  ;;  %v1936_v8 = vld [vmem:[#allocation4 + $0x978] sm:$0xff]  ;;  %v2127_v10 = vld [vmem:[#allocation4 + $0xf70] sm:$0xff] }
 0xe1e   :  { %7291 = vmatprep.subr.bf16.mxu1 %v7290_v55  ;;  %v2121_v51 = vld [vmem:[#allocation4 + $0xf40] sm:$0xff]  ;;  %v1646_v55 = vld [vmem:[#allocation4 + $0x68] sm:$0xff]  ;;  %v1683_v40 = vld [vmem:[#allocation4 + $0x190] sm:$0xff] }
 0xe1f   :  { %v7280_v60 = vpack.c.bf16 %v2121_v51, %v2089_v50  ;;  %v1903_v50 = vld [vmem:[#allocation4 + $0x870] sm:$0xff]  ;;  %v7362_v51 = vpack.c.bf16 %v1936_v8, %v1904_v58  ;;  %v1746_v42 = vld [vmem:[#allocation4 + $0x388] sm:$0xff] }
 0xe20   :  { %7261 = vmatpush1.bf16.msra.mxu0 %v7260_v63  ;;  %v7314_v63 = vpack.c.bf16 %v1678_v56, %v1646_v55  ;;  %v1968_v55 = vld [vmem:[#allocation4 + $0xa78] sm:$0xff]  ;;  %v7364_v59 = vpack.c.bf16 %v1935_v52, %v1903_v50  ;;  %v1747_v50 = vld [vmem:[#allocation4 + $0x390] sm:$0xff]  ;;  %v1810_v52 = vld [vmem:[#allocation4 + $0x588] sm:$0xff] }
 0xe21   :  { %7293 = vmatpush1.bf16.msra.mxu1 %v7292_v2  ;;  %7263 = vmatprep.subr.bf16.mxu0 %v7262_v5  ;;  %v1645_v2 = vld [vmem:[#allocation4 + $0x60] sm:$0xff]  ;;  %v2000_v56 = vld [vmem:[#allocation4 + $0xb78] sm:$0xff] }
 0xe22   :  { %7295 = vmatprep.subr.bf16.mxu1 %v7294_v7  ;;  %v1677_v5 = vld [vmem:[#allocation4 + $0x160] sm:$0xff]  ;;  %v1710_v7 = vld [vmem:[#allocation4 + $0x268] sm:$0xff] }
 0xe23   :  { %v7316_v14 = vpack.c.bf16 %v1677_v5, %v1645_v2  ;;  %v1967_v2 = vld [vmem:[#allocation4 + $0xa70] sm:$0xff]  ;;  %v7366_v5 = vpack.c.bf16 %v2000_v56, %v1968_v55 }
 0xe24   :  { %7265 = vmatpush1.bf16.msra.mxu0 %v7264_v17  ;;  %v7318_v17 = vpack.c.bf16 %v1742_v11, %v1710_v7  ;;  %v2032_v7 = vld [vmem:[#allocation4 + $0xc78] sm:$0xff]  ;;  %v7368_v13 = vpack.c.bf16 %v1999_v62, %v1967_v2  ;;  %v1811_v2 = vld [vmem:[#allocation4 + $0x590] sm:$0xff]  ;;  %v1874_v62 = vld [vmem:[#allocation4 + $0x788] sm:$0xff] }
 0xe25   :  { %7297 = vmatpush1.bf16.msra.mxu1 %v7296_v0  ;;  %7267 = vmatprep.subr.bf16.mxu0 %v7266_v22  ;;  %v1709_v0 = vld [vmem:[#allocation4 + $0x260] sm:$0xff]  ;;  %v2064_v11 = vld [vmem:[#allocation4 + $0xd78] sm:$0xff] }
 0xe26   :  { %7299 = vmatprep.subr.bf16.mxu1 %v7298_v23  ;;  %v1741_v22 = vld [vmem:[#allocation4 + $0x360] sm:$0xff]  ;;  %v1774_v23 = vld [vmem:[#allocation4 + $0x468] sm:$0xff] }
 0xe27   :  { %v7320_v27 = vpack.c.bf16 %v1741_v22, %v1709_v0  ;;  %v2031_v0 = vld [vmem:[#allocation4 + $0xc70] sm:$0xff]  ;;  %v7370_v22 = vpack.c.bf16 %v2064_v11, %v2032_v7 }
 0xe28   :  { %7269 = vmatpush1.bf16.msra.mxu0 %v7268_v30  ;;  %v7322_v30 = vpack.c.bf16 %v1806_v24, %v1774_v23  ;;  %v2096_v23 = vld [vmem:[#allocation4 + $0xe78] sm:$0xff]  ;;  %v7372_v26 = vpack.c.bf16 %v2063_v18, %v2031_v0  ;;  %v1875_v0 = vld [vmem:[#allocation4 + $0x790] sm:$0xff]  ;;  %v1938_v18 = vld [vmem:[#allocation4 + $0x988] sm:$0xff] }
 0xe29   :  { %7301 = vmatpush1.bf16.msra.mxu1 %v7300_v31  ;;  %7271 = vmatprep.subr.bf16.mxu0 %v7270_v32  ;;  %v1773_v31 = vld [vmem:[#allocation4 + $0x460] sm:$0xff]  ;;  %v2128_v24 = vld [vmem:[#allocation4 + $0xf78] sm:$0xff] }
 0xe2a   :  { %7303 = vmatprep.subr.bf16.mxu1 %v7302_v15  ;;  %v1805_v32 = vld [vmem:[#allocation4 + $0x560] sm:$0xff]  ;;  %v1838_v15 = vld [vmem:[#allocation4 + $0x668] sm:$0xff] }
 0xe2b   :  { %v7324_v35 = vpack.c.bf16 %v1805_v32, %v1773_v31  ;;  %v2095_v31 = vld [vmem:[#allocation4 + $0xe70] sm:$0xff]  ;;  %v7374_v32 = vpack.c.bf16 %v2128_v24, %v2096_v23 }
 0xe2c   :  { %7273 = vmatpush1.bf16.msra.mxu0 %v7272_v37  ;;  %v7326_v37 = vpack.c.bf16 %v1870_v21, %v1838_v15  ;;  %v1652_v15 = vld [vmem:[#allocation4 + $0x98] sm:$0xff]  ;;  %v7376_v34 = vpack.c.bf16 %v2127_v10, %v2095_v31  ;;  %v1939_v31 = vld [vmem:[#allocation4 + $0x990] sm:$0xff]  ;;  %v2002_v10 = vld [vmem:[#allocation4 + $0xb88] sm:$0xff] }
 0xe2d   :  { %7305 = vmatpush1.bf16.msra.mxu1 %v7304_v38  ;;  %7275 = vmatprep.subr.bf16.mxu0 %v7274_v39  ;;  %v1837_v38 = vld [vmem:[#allocation4 + $0x660] sm:$0xff]  ;;  %v1684_v21 = vld [vmem:[#allocation4 + $0x198] sm:$0xff] }
 0xe2e   :  { %7307 = vmatprep.subr.bf16.mxu1 %v7306_v43  ;;  %v1869_v39 = vld [vmem:[#allocation4 + $0x760] sm:$0xff]  ;;  %v1902_v43 = vld [vmem:[#allocation4 + $0x868] sm:$0xff] }
 0xe2f   :  { %v7328_v45 = vpack.c.bf16 %v1869_v39, %v1837_v38  ;;  %v1651_v38 = vld [vmem:[#allocation4 + $0x90] sm:$0xff]  ;;  %v7410_v39 = vpack.c.bf16 %v1684_v21, %v1652_v15 }
 0xe30   :  { %7277 = vmatpush1.bf16.msra.mxu0 %v7276_v47  ;;  %v7330_v47 = vpack.c.bf16 %v1934_v44, %v1902_v43  ;;  %v1716_v43 = vld [vmem:[#allocation4 + $0x298] sm:$0xff]  ;;  %v7412_v8 = vpack.c.bf16 %v1683_v40, %v1651_v38  ;;  %v2003_v38 = vld [vmem:[#allocation4 + $0xb90] sm:$0xff]  ;;  %v2066_v40 = vld [vmem:[#allocation4 + $0xd88] sm:$0xff] }
 0xe31   :  { %7309 = vmatpush1.bf16.msra.mxu1 %v7308_v48  ;;  %7279 = vmatprep.subr.bf16.mxu0 %v7278_v49  ;;  %v1901_v48 = vld [vmem:[#allocation4 + $0x860] sm:$0xff]  ;;  %v1748_v44 = vld [vmem:[#allocation4 + $0x398] sm:$0xff] }
 0xe32   :  { %7311 = vmatprep.subr.bf16.mxu1 %v7310_v53  ;;  %v1933_v49 = vld [vmem:[#allocation4 + $0x960] sm:$0xff]  ;;  %v1966_v53 = vld [vmem:[#allocation4 + $0xa68] sm:$0xff] }
 0xe33   :  { %v7332_v57 = vpack.c.bf16 %v1933_v49, %v1901_v48  ;;  %v1715_v48 = vld [vmem:[#allocation4 + $0x290] sm:$0xff]  ;;  %v7414_v49 = vpack.c.bf16 %v1748_v44, %v1716_v43 }
 0xe34   :  { %7281 = vmatpush1.bf16.msra.mxu0 %v7280_v60  ;;  %v7334_v60 = vpack.c.bf16 %v1998_v54, %v1966_v53  ;;  %v1780_v53 = vld [vmem:[#allocation4 + $0x498] sm:$0xff]  ;;  %v7416_v56 = vpack.c.bf16 %v1747_v50, %v1715_v48  ;;  %v2067_v48 = vld [vmem:[#allocation4 + $0xd90] sm:$0xff]  ;;  %v2130_v50 = vld [vmem:[#allocation4 + $0xf88] sm:$0xff] }
 0xe35   :  { %7313 = vmatpush1.bf16.msra.mxu1 %v7312_v61  ;;  %7315 = vmatprep.subr.bf16.mxu0 %v7314_v63  ;;  %v1965_v61 = vld [vmem:[#allocation4 + $0xa60] sm:$0xff]  ;;  %v1812_v54 = vld [vmem:[#allocation4 + $0x598] sm:$0xff] }
 0xe36   :  { %7347 = vmatprep.subr.bf16.mxu1 %v7346_v3  ;;  %v1997_v63 = vld [vmem:[#allocation4 + $0xb60] sm:$0xff]  ;;  %v2030_v3 = vld [vmem:[#allocation4 + $0xc68] sm:$0xff] }
 0xe37   :  { %2662 = vmatmul.mubr.f32.vlgmr.msra.gmra.mrb[28].mxu0 %v8936_v4  ;;  %v7336_v12 = vpack.c.bf16 %v1997_v63, %v1965_v61  ;;  %v1779_v61 = vld [vmem:[#allocation4 + $0x490] sm:$0xff]  ;;  %v7418_v63 = vpack.c.bf16 %v1812_v54, %v1780_v53 }
 0xe38   :  { %2733 = vmatmul.mubr.f32.vlgmr.msra.gmra.mrb[28].mxu1 %v8936_v4  ;;  %7317 = vmatpush1.bf16.msra.mxu0 %v7316_v14  ;;  %v7338_v14 = vpack.c.bf16 %v2062_v6, %v2030_v3  ;;  %v1844_v3 = vld [vmem:[#allocation4 + $0x698] sm:$0xff]  ;;  %v7420_v11 = vpack.c.bf16 %v1811_v2, %v1779_v61  ;;  %v2131_v61 = vld [vmem:[#allocation4 + $0xf90] sm:$0xff]  ;;  %v1686_v2 = vld [vmem:[#allocation4 + $0x1a8] sm:$0xff] }
 0xe39   :  { %7349 = vmatpush1.bf16.msra.mxu1 %v7348_v16  ;;  %7319 = vmatprep.subr.bf16.mxu0 %v7318_v17  ;;  %v2029_v16 = vld [vmem:[#allocation4 + $0xc60] sm:$0xff]  ;;  %v1876_v6 = vld [vmem:[#allocation4 + $0x798] sm:$0xff] }
 0xe3a   :  { %7351 = vmatprep.subr.bf16.mxu1 %v7350_v19  ;;  %2803 = vmatprep.mubr.f32.mxu0 %v8367_v1  ;;  %v2061_v17 = vld [vmem:[#allocation4 + $0xd60] sm:$0xff]  ;;  %v2094_v19 = vld [vmem:[#allocation4 + $0xe68] sm:$0xff] }
 0xe3b   :  { %2874 = vmatprep.mubr.f32.mxu1 %v8367_v1  ;;  %v7340_v25 = vpack.c.bf16 %v2061_v17, %v2029_v16  ;;  %v1843_v16 = vld [vmem:[#allocation4 + $0x690] sm:$0xff]  ;;  %v7422_v17 = vpack.c.bf16 %v1876_v6, %v1844_v3 }
 0xe3c   :  { %7321 = vmatpush1.bf16.msra.mxu0 %v7320_v27  ;;  %v7342_v27 = vpack.c.bf16 %v2126_v20, %v2094_v19  ;;  %v1908_v19 = vld [vmem:[#allocation4 + $0x898] sm:$0xff]  ;;  %v7424_v24 = vpack.c.bf16 %v1875_v0, %v1843_v16  ;;  %v1687_v16 = vld [vmem:[#allocation4 + $0x1b0] sm:$0xff]  ;;  %v1750_v0 = vld [vmem:[#allocation4 + $0x3a8] sm:$0xff] }
 0xe3d   :  { %7353 = vmatpush1.bf16.msra.mxu1 %v7352_v29  ;;  %7323 = vmatprep.subr.bf16.mxu0 %v7322_v30  ;;  %v2093_v29 = vld [vmem:[#allocation4 + $0xe60] sm:$0xff]  ;;  %v1940_v20 = vld [vmem:[#allocation4 + $0x998] sm:$0xff] }
 0xe3e   :  { %7355 = vmatprep.subr.bf16.mxu1 %v7354_v33  ;;  %v2125_v30 = vld [vmem:[#allocation4 + $0xf60] sm:$0xff]  ;;  %v1650_v33 = vld [vmem:[#allocation4 + $0x88] sm:$0xff] }
 0xe3f   :  { %v7344_v28 = vpack.c.bf16 %v2125_v30, %v2093_v29  ;;  %v1907_v29 = vld [vmem:[#allocation4 + $0x890] sm:$0xff]  ;;  %v7426_v30 = vpack.c.bf16 %v1940_v20, %v1908_v19 }
 0xe40   :  { %7325 = vmatpush1.bf16.msra.mxu0 %v7324_v35  ;;  %v7378_v35 = vpack.c.bf16 %v1682_v9, %v1650_v33  ;;  %v1972_v33 = vld [vmem:[#allocation4 + $0xa98] sm:$0xff]  ;;  %v7428_v21 = vpack.c.bf16 %v1939_v31, %v1907_v29  ;;  %v1751_v29 = vld [vmem:[#allocation4 + $0x3b0] sm:$0xff]  ;;  %v1814_v31 = vld [vmem:[#allocation4 + $0x5a8] sm:$0xff] }
 0xe41   :  { %7357 = vmatpush1.bf16.msra.mxu1 %v7356_v36  ;;  %7327 = vmatprep.subr.bf16.mxu0 %v7326_v37  ;;  %v1649_v36 = vld [vmem:[#allocation4 + $0x80] sm:$0xff]  ;;  %v2004_v9 = vld [vmem:[#allocation4 + $0xb98] sm:$0xff] }
 0xe42   :  { %7359 = vmatprep.subr.bf16.mxu1 %v7358_v41  ;;  %v1681_v37 = vld [vmem:[#allocation4 + $0x180] sm:$0xff]  ;;  %v1714_v41 = vld [vmem:[#allocation4 + $0x288] sm:$0xff] }
 0xe43   :  { %v7380_v58 = vpack.c.bf16 %v1681_v37, %v1649_v36  ;;  %v1971_v36 = vld [vmem:[#allocation4 + $0xa90] sm:$0xff]  ;;  %v7430_v37 = vpack.c.bf16 %v2004_v9, %v1972_v33 }
 0xe44   :  { %7329 = vmatpush1.bf16.msra.mxu0 %v7328_v45  ;;  %v7382_v45 = vpack.c.bf16 %v1746_v42, %v1714_v41  ;;  %v2036_v41 = vld [vmem:[#allocation4 + $0xc98] sm:$0xff]  ;;  %v7432_v44 = vpack.c.bf16 %v2003_v38, %v1971_v36  ;;  %v1815_v36 = vld [vmem:[#allocation4 + $0x5b0] sm:$0xff]  ;;  %v1878_v38 = vld [vmem:[#allocation4 + $0x7a8] sm:$0xff] }
 0xe45   :  { %7361 = vmatpush1.bf16.msra.mxu1 %v7360_v46  ;;  %7331 = vmatprep.subr.bf16.mxu0 %v7330_v47  ;;  %v1713_v46 = vld [vmem:[#allocation4 + $0x280] sm:$0xff]  ;;  %v2068_v42 = vld [vmem:[#allocation4 + $0xd98] sm:$0xff] }
 0xe46   :  { %7363 = vmatprep.subr.bf16.mxu1 %v7362_v51  ;;  %v1745_v47 = vld [vmem:[#allocation4 + $0x380] sm:$0xff]  ;;  %v1778_v51 = vld [vmem:[#allocation4 + $0x488] sm:$0xff] }
 0xe47   :  { %v7384_v55 = vpack.c.bf16 %v1745_v47, %v1713_v46  ;;  %v2035_v46 = vld [vmem:[#allocation4 + $0xc90] sm:$0xff]  ;;  %v7434_v47 = vpack.c.bf16 %v2068_v42, %v2036_v41 }
 0xe48   :  { %7333 = vmatpush1.bf16.msra.mxu0 %v7332_v57  ;;  %v7386_v57 = vpack.c.bf16 %v1810_v52, %v1778_v51  ;;  %v2100_v51 = vld [vmem:[#allocation4 + $0xe98] sm:$0xff]  ;;  %v7436_v54 = vpack.c.bf16 %v2067_v48, %v2035_v46  ;;  %v1879_v46 = vld [vmem:[#allocation4 + $0x7b0] sm:$0xff]  ;;  %v1942_v48 = vld [vmem:[#allocation4 + $0x9a8] sm:$0xff] }
 0xe49   :  { %7365 = vmatpush1.bf16.msra.mxu1 %v7364_v59  ;;  %7335 = vmatprep.subr.bf16.mxu0 %v7334_v60  ;;  %v1777_v59 = vld [vmem:[#allocation4 + $0x480] sm:$0xff]  ;;  %v2132_v52 = vld [vmem:[#allocation4 + $0xf98] sm:$0xff] }
 0xe4a   :  { %7367 = vmatprep.subr.bf16.mxu1 %v7366_v5  ;;  %v1809_v60 = vld [vmem:[#allocation4 + $0x580] sm:$0xff]  ;;  %v1842_v5 = vld [vmem:[#allocation4 + $0x688] sm:$0xff] }
 0xe4b   :  { %v7388_v7 = vpack.c.bf16 %v1809_v60, %v1777_v59  ;;  %v2099_v59 = vld [vmem:[#allocation4 + $0xe90] sm:$0xff]  ;;  %v7438_v60 = vpack.c.bf16 %v2132_v52, %v2100_v51 }
 0xe4c   :  { %7337 = vmatpush1.bf16.msra.mxu0 %v7336_v12  ;;  %v7390_v12 = vpack.c.bf16 %v1874_v62, %v1842_v5  ;;  %v1656_v5 = vld [vmem:[#allocation4 + $0xb8] sm:$0xff]  ;;  %v7440_v6 = vpack.c.bf16 %v2131_v61, %v2099_v59  ;;  %v1943_v59 = vld [vmem:[#allocation4 + $0x9b0] sm:$0xff]  ;;  %v2006_v61 = vld [vmem:[#allocation4 + $0xba8] sm:$0xff] }
 0xe4d   :  { %7369 = vmatpush1.bf16.msra.mxu1 %v7368_v13  ;;  %7339 = vmatprep.subr.bf16.mxu0 %v7338_v14  ;;  %v1841_v13 = vld [vmem:[#allocation4 + $0x680] sm:$0xff]  ;;  %v1688_v62 = vld [vmem:[#allocation4 + $0x1b8] sm:$0xff] }
 0xe4e   :  { %7371 = vmatprep.subr.bf16.mxu1 %v7370_v22  ;;  %v1873_v14 = vld [vmem:[#allocation4 + $0x780] sm:$0xff]  ;;  %v1906_v22 = vld [vmem:[#allocation4 + $0x888] sm:$0xff] }
 0xe4f   :  { %v7392_v23 = vpack.c.bf16 %v1873_v14, %v1841_v13  ;;  %v1655_v13 = vld [vmem:[#allocation4 + $0xb0] sm:$0xff]  ;;  %v7474_v14 = vpack.c.bf16 %v1688_v62, %v1656_v5 }
 0xe50   :  { %7341 = vmatpush1.bf16.msra.mxu0 %v7340_v25  ;;  %v7394_v25 = vpack.c.bf16 %v1938_v18, %v1906_v22  ;;  %v1720_v22 = vld [vmem:[#allocation4 + $0x2b8] sm:$0xff]  ;;  %v7476_v20 = vpack.c.bf16 %v1687_v16, %v1655_v13  ;;  %v2007_v13 = vld [vmem:[#allocation4 + $0xbb0] sm:$0xff]  ;;  %v2070_v16 = vld [vmem:[#allocation4 + $0xda8] sm:$0xff] }
 0xe51   :  { %7373 = vmatpush1.bf16.msra.mxu1 %v7372_v26  ;;  %7343 = vmatprep.subr.bf16.mxu0 %v7342_v27  ;;  %v1905_v26 = vld [vmem:[#allocation4 + $0x880] sm:$0xff]  ;;  %v1752_v18 = vld [vmem:[#allocation4 + $0x3b8] sm:$0xff] }
 0xe52   :  { %7375 = vmatprep.subr.bf16.mxu1 %v7374_v32  ;;  %v1937_v27 = vld [vmem:[#allocation4 + $0x980] sm:$0xff]  ;;  %v1970_v32 = vld [vmem:[#allocation4 + $0xa88] sm:$0xff] }
 0xe53   :  { %v7396_v15 = vpack.c.bf16 %v1937_v27, %v1905_v26  ;;  %v1719_v26 = vld [vmem:[#allocation4 + $0x2b0] sm:$0xff]  ;;  %v7478_v27 = vpack.c.bf16 %v1752_v18, %v1720_v22 }
 0xe54   :  { %7345 = vmatpush1.bf16.msra.mxu0 %v7344_v28  ;;  %v7398_v28 = vpack.c.bf16 %v2002_v10, %v1970_v32  ;;  %v1784_v32 = vld [vmem:[#allocation4 + $0x4b8] sm:$0xff]  ;;  %v7480_v9 = vpack.c.bf16 %v1751_v29, %v1719_v26  ;;  %v2071_v26 = vld [vmem:[#allocation4 + $0xdb0] sm:$0xff]  ;;  %v2134_v29 = vld [vmem:[#allocation4 + $0xfa8] sm:$0xff] }
 0xe55   :  { %7377 = vmatpush1.bf16.msra.mxu1 %v7376_v34  ;;  %7379 = vmatprep.subr.bf16.mxu0 %v7378_v35  ;;  %v1969_v34 = vld [vmem:[#allocation4 + $0xa80] sm:$0xff]  ;;  %v1816_v10 = vld [vmem:[#allocation4 + $0x5b8] sm:$0xff] }
 0xe56   :  { %7411 = vmatprep.subr.bf16.mxu1 %v7410_v39  ;;  %v2001_v35 = vld [vmem:[#allocation4 + $0xb80] sm:$0xff]  ;;  %v2034_v39 = vld [vmem:[#allocation4 + $0xc88] sm:$0xff] }
 0xe57   :  { %2804 = vmatmul.mubr.f32.vlgmr.msra.gmra.mrb[30].mxu0 %v8936_v4  ;;  %v7400_v43 = vpack.c.bf16 %v2001_v35, %v1969_v34  ;;  %v1783_v34 = vld [vmem:[#allocation4 + $0x4b0] sm:$0xff]  ;;  %v7482_v35 = vpack.c.bf16 %v1816_v10, %v1784_v32 }
 0xe58   :  { %2875 = vmatmul.mubr.f32.vlgmr.msra.gmra.mrb[30].mxu1 %v8936_v4  ;;  %7381 = vmatpush1.bf16.msra.mxu0 %v7380_v58  ;;  %v7402_v58 = vpack.c.bf16 %v2066_v40, %v2034_v39  ;;  %v1848_v39 = vld [vmem:[#allocation4 + $0x6b8] sm:$0xff]  ;;  %v7484_v42 = vpack.c.bf16 %v1815_v36, %v1783_v34  ;;  %v2135_v34 = vld [vmem:[#allocation4 + $0xfb0] sm:$0xff]  ;;  %v1690_v36 = vld [vmem:[#allocation4 + $0x1c8] sm:$0xff] }
 0xe59   :  { %7413 = vmatpush1.bf16.msra.mxu1 %v7412_v8  ;;  %7383 = vmatprep.subr.bf16.mxu0 %v7382_v45  ;;  %v2033_v8 = vld [vmem:[#allocation4 + $0xc80] sm:$0xff]  ;;  %v1880_v40 = vld [vmem:[#allocation4 + $0x7b8] sm:$0xff] }
 0xe5a   :  { %7415 = vmatprep.subr.bf16.mxu1 %v7414_v49  ;;  %2945 = vmatprep.mubr.f32.mxu0 %v8367_v1  ;;  %v2065_v45 = vld [vmem:[#allocation4 + $0xd80] sm:$0xff]  ;;  %v2098_v49 = vld [vmem:[#allocation4 + $0xe88] sm:$0xff] }
 0xe5b   :  { %3016 = vmatprep.mubr.f32.mxu1 %v8367_v1  ;;  %v7404_v53 = vpack.c.bf16 %v2065_v45, %v2033_v8  ;;  %v1847_v8 = vld [vmem:[#allocation4 + $0x6b0] sm:$0xff]  ;;  %v7486_v45 = vpack.c.bf16 %v1880_v40, %v1848_v39 }
 0xe5c   :  { %7385 = vmatpush1.bf16.msra.mxu0 %v7384_v55  ;;  %v7406_v55 = vpack.c.bf16 %v2130_v50, %v2098_v49  ;;  %v1912_v49 = vld [vmem:[#allocation4 + $0x8b8] sm:$0xff]  ;;  %v7488_v52 = vpack.c.bf16 %v1879_v46, %v1847_v8  ;;  %v1691_v8 = vld [vmem:[#allocation4 + $0x1d0] sm:$0xff]  ;;  %v1754_v46 = vld [vmem:[#allocation4 + $0x3c8] sm:$0xff] }
 0xe5d   :  { %7417 = vmatpush1.bf16.msra.mxu1 %v7416_v56  ;;  %7387 = vmatprep.subr.bf16.mxu0 %v7386_v57  ;;  %v2097_v56 = vld [vmem:[#allocation4 + $0xe80] sm:$0xff]  ;;  %v1944_v50 = vld [vmem:[#allocation4 + $0x9b8] sm:$0xff] }
 0xe5e   :  { %7419 = vmatprep.subr.bf16.mxu1 %v7418_v63  ;;  %v2129_v57 = vld [vmem:[#allocation4 + $0xf80] sm:$0xff]  ;;  %v1654_v63 = vld [vmem:[#allocation4 + $0xa8] sm:$0xff] }
 0xe5f   :  { %v7408_v3 = vpack.c.bf16 %v2129_v57, %v2097_v56  ;;  %v1911_v56 = vld [vmem:[#allocation4 + $0x8b0] sm:$0xff]  ;;  %v7490_v57 = vpack.c.bf16 %v1944_v50, %v1912_v49 }
 0xe60   :  { %7389 = vmatpush1.bf16.msra.mxu0 %v7388_v7  ;;  %v7442_v7 = vpack.c.bf16 %v1686_v2, %v1654_v63  ;;  %v1976_v63 = vld [vmem:[#allocation4 + $0xab8] sm:$0xff]  ;;  %v7492_v62 = vpack.c.bf16 %v1943_v59, %v1911_v56  ;;  %v1755_v56 = vld [vmem:[#allocation4 + $0x3d0] sm:$0xff]  ;;  %v1818_v59 = vld [vmem:[#allocation4 + $0x5c8] sm:$0xff] }
 0xe61   :  { %7421 = vmatpush1.bf16.msra.mxu1 %v7420_v11  ;;  %7391 = vmatprep.subr.bf16.mxu0 %v7390_v12  ;;  %v1653_v11 = vld [vmem:[#allocation4 + $0xa0] sm:$0xff]  ;;  %v2008_v2 = vld [vmem:[#allocation4 + $0xbb8] sm:$0xff] }
 0xe62   :  { %7423 = vmatprep.subr.bf16.mxu1 %v7422_v17  ;;  %v1685_v12 = vld [vmem:[#allocation4 + $0x1a0] sm:$0xff]  ;;  %v1718_v17 = vld [vmem:[#allocation4 + $0x2a8] sm:$0xff] }
 0xe63   :  { %v7444_v19 = vpack.c.bf16 %v1685_v12, %v1653_v11  ;;  %v1975_v11 = vld [vmem:[#allocation4 + $0xab0] sm:$0xff]  ;;  %v7494_v12 = vpack.c.bf16 %v2008_v2, %v1976_v63 }
 0xe64   :  { %7393 = vmatpush1.bf16.msra.mxu0 %v7392_v23  ;;  %v7446_v23 = vpack.c.bf16 %v1750_v0, %v1718_v17  ;;  %v2040_v17 = vld [vmem:[#allocation4 + $0xcb8] sm:$0xff]  ;;  %v7496_v18 = vpack.c.bf16 %v2007_v13, %v1975_v11  ;;  %v1819_v11 = vld [vmem:[#allocation4 + $0x5d0] sm:$0xff]  ;;  %v1882_v13 = vld [vmem:[#allocation4 + $0x7c8] sm:$0xff] }
 0xe65   :  { %7425 = vmatpush1.bf16.msra.mxu1 %v7424_v24  ;;  %7395 = vmatprep.subr.bf16.mxu0 %v7394_v25  ;;  %v1717_v24 = vld [vmem:[#allocation4 + $0x2a0] sm:$0xff]  ;;  %v2072_v0 = vld [vmem:[#allocation4 + $0xdb8] sm:$0xff] }
 0xe66   :  { %7427 = vmatprep.subr.bf16.mxu1 %v7426_v30  ;;  %v1749_v25 = vld [vmem:[#allocation4 + $0x3a0] sm:$0xff]  ;;  %v1782_v30 = vld [vmem:[#allocation4 + $0x4a8] sm:$0xff] }
 0xe67   :  { %v7448_v33 = vpack.c.bf16 %v1749_v25, %v1717_v24  ;;  %v2039_v24 = vld [vmem:[#allocation4 + $0xcb0] sm:$0xff]  ;;  %v7498_v25 = vpack.c.bf16 %v2072_v0, %v2040_v17 }
 0xe68   :  { %7397 = vmatpush1.bf16.msra.mxu0 %v7396_v15  ;;  %v7450_v15 = vpack.c.bf16 %v1814_v31, %v1782_v30  ;;  %v2104_v30 = vld [vmem:[#allocation4 + $0xeb8] sm:$0xff]  ;;  %v7500_v10 = vpack.c.bf16 %v2071_v26, %v2039_v24  ;;  %v1883_v24 = vld [vmem:[#allocation4 + $0x7d0] sm:$0xff]  ;;  %v1946_v26 = vld [vmem:[#allocation4 + $0x9c8] sm:$0xff] }
 0xe69   :  { %7429 = vmatpush1.bf16.msra.mxu1 %v7428_v21  ;;  %7399 = vmatprep.subr.bf16.mxu0 %v7398_v28  ;;  %v1781_v21 = vld [vmem:[#allocation4 + $0x4a0] sm:$0xff]  ;;  %v2136_v31 = vld [vmem:[#allocation4 + $0xfb8] sm:$0xff] }
 0xe6a   :  { %7431 = vmatprep.subr.bf16.mxu1 %v7430_v37  ;;  %v1813_v28 = vld [vmem:[#allocation4 + $0x5a0] sm:$0xff]  ;;  %v1846_v37 = vld [vmem:[#allocation4 + $0x6a8] sm:$0xff] }
 0xe6b   :  { %v7452_v41 = vpack.c.bf16 %v1813_v28, %v1781_v21  ;;  %v2103_v21 = vld [vmem:[#allocation4 + $0xeb0] sm:$0xff]  ;;  %v7502_v28 = vpack.c.bf16 %v2136_v31, %v2104_v30 }
 0xe6c   :  { %7401 = vmatpush1.bf16.msra.mxu0 %v7400_v43  ;;  %v7454_v43 = vpack.c.bf16 %v1878_v38, %v1846_v37  ;;  %v1660_v37 = vld [vmem:[#allocation4 + $0xd8] sm:$0xff]  ;;  %v7504_v40 = vpack.c.bf16 %v2135_v34, %v2103_v21  ;;  %v1947_v21 = vld [vmem:[#allocation4 + $0x9d0] sm:$0xff]  ;;  %v2010_v34 = vld [vmem:[#allocation4 + $0xbc8] sm:$0xff] }
 0xe6d   :  { %7433 = vmatpush1.bf16.msra.mxu1 %v7432_v44  ;;  %7403 = vmatprep.subr.bf16.mxu0 %v7402_v58  ;;  %v1845_v44 = vld [vmem:[#allocation4 + $0x6a0] sm:$0xff]  ;;  %v1692_v38 = vld [vmem:[#allocation4 + $0x1d8] sm:$0xff] }
 0xe6e   :  { %7435 = vmatprep.subr.bf16.mxu1 %v7434_v47  ;;  %v1877_v58 = vld [vmem:[#allocation4 + $0x7a0] sm:$0xff]  ;;  %v1910_v47 = vld [vmem:[#allocation4 + $0x8a8] sm:$0xff] }
 0xe6f   :  { %v7456_v51 = vpack.c.bf16 %v1877_v58, %v1845_v44  ;;  %v1659_v44 = vld [vmem:[#allocation4 + $0xd0] sm:$0xff]  ;;  %v7538_v58 = vpack.c.bf16 %v1692_v38, %v1660_v37 }
 0xe70   :  { %7405 = vmatpush1.bf16.msra.mxu0 %v7404_v53  ;;  %v7458_v53 = vpack.c.bf16 %v1942_v48, %v1910_v47  ;;  %v1724_v47 = vld [vmem:[#allocation4 + $0x2d8] sm:$0xff]  ;;  %v7540_v50 = vpack.c.bf16 %v1691_v8, %v1659_v44  ;;  %v2011_v44 = vld [vmem:[#allocation4 + $0xbd0] sm:$0xff]  ;;  %v2074_v8 = vld [vmem:[#allocation4 + $0xdc8] sm:$0xff] }
 0xe71   :  { %7437 = vmatpush1.bf16.msra.mxu1 %v7436_v54  ;;  %7407 = vmatprep.subr.bf16.mxu0 %v7406_v55  ;;  %v1909_v54 = vld [vmem:[#allocation4 + $0x8a0] sm:$0xff]  ;;  %v1756_v48 = vld [vmem:[#allocation4 + $0x3d8] sm:$0xff] }
 0xe72   :  { %7439 = vmatprep.subr.bf16.mxu1 %v7438_v60  ;;  %v1941_v55 = vld [vmem:[#allocation4 + $0x9a0] sm:$0xff]  ;;  %v1974_v60 = vld [vmem:[#allocation4 + $0xaa8] sm:$0xff] }
 0xe73   :  { %v7460_v5 = vpack.c.bf16 %v1941_v55, %v1909_v54  ;;  %v1723_v54 = vld [vmem:[#allocation4 + $0x2d0] sm:$0xff]  ;;  %v7542_v55 = vpack.c.bf16 %v1756_v48, %v1724_v47 }
 0xe74   :  { %7409 = vmatpush1.bf16.msra.mxu0 %v7408_v3  ;;  %v7462_v3 = vpack.c.bf16 %v2006_v61, %v1974_v60  ;;  %v1788_v60 = vld [vmem:[#allocation4 + $0x4d8] sm:$0xff]  ;;  %v7544_v2 = vpack.c.bf16 %v1755_v56, %v1723_v54  ;;  %v2075_v54 = vld [vmem:[#allocation4 + $0xdd0] sm:$0xff]  ;;  %v2138_v56 = vld [vmem:[#allocation4 + $0xfc8] sm:$0xff] }
 0xe75   :  { %7441 = vmatpush1.bf16.msra.mxu1 %v7440_v6  ;;  %7443 = vmatprep.subr.bf16.mxu0 %v7442_v7  ;;  %v1973_v6 = vld [vmem:[#allocation4 + $0xaa0] sm:$0xff]  ;;  %v1820_v61 = vld [vmem:[#allocation4 + $0x5d8] sm:$0xff] }
 0xe76   :  { %7475 = vmatprep.subr.bf16.mxu1 %v7474_v14  ;;  %v2005_v7 = vld [vmem:[#allocation4 + $0xba0] sm:$0xff]  ;;  %v2038_v14 = vld [vmem:[#allocation4 + $0xca8] sm:$0xff] }
 0xe77   :  { %2946 = vmatmul.mubr.f32.vlgmr.msra.gmra.mrb[32].mxu0 %v8936_v4  ;;  %v7464_v22 = vpack.c.bf16 %v2005_v7, %v1973_v6  ;;  %v1787_v6 = vld [vmem:[#allocation4 + $0x4d0] sm:$0xff]  ;;  %v7546_v7 = vpack.c.bf16 %v1820_v61, %v1788_v60 }
 0xe78   :  { %3017 = vmatmul.mubr.f32.vlgmr.msra.gmra.mrb[32].mxu1 %v8936_v4  ;;  %7445 = vmatpush1.bf16.msra.mxu0 %v7444_v19  ;;  %v7466_v19 = vpack.c.bf16 %v2070_v16, %v2038_v14  ;;  %v1852_v14 = vld [vmem:[#allocation4 + $0x6d8] sm:$0xff]  ;;  %v7548_v0 = vpack.c.bf16 %v1819_v11, %v1787_v6  ;;  %v2139_v6 = vld [vmem:[#allocation4 + $0xfd0] sm:$0xff]  ;;  %v1694_v11 = vld [vmem:[#allocation4 + $0x1e8] sm:$0xff] }
 0xe79   :  { %7477 = vmatpush1.bf16.msra.mxu1 %v7476_v20  ;;  %7447 = vmatprep.subr.bf16.mxu0 %v7446_v23  ;;  %v2037_v20 = vld [vmem:[#allocation4 + $0xca0] sm:$0xff]  ;;  %v1884_v16 = vld [vmem:[#allocation4 + $0x7d8] sm:$0xff] }
 0xe7a   :  { %7479 = vmatprep.subr.bf16.mxu1 %v7478_v27  ;;  %3087 = vmatprep.mubr.f32.mxu0 %v8367_v1  ;;  %v2069_v23 = vld [vmem:[#allocation4 + $0xda0] sm:$0xff]  ;;  %v2102_v27 = vld [vmem:[#allocation4 + $0xea8] sm:$0xff] }
 0xe7b   :  { %3158 = vmatprep.mubr.f32.mxu1 %v8367_v1  ;;  %v7468_v32 = vpack.c.bf16 %v2069_v23, %v2037_v20  ;;  %v1851_v20 = vld [vmem:[#allocation4 + $0x6d0] sm:$0xff]  ;;  %v7550_v23 = vpack.c.bf16 %v1884_v16, %v1852_v14 }
 0xe7c   :  { %7449 = vmatpush1.bf16.msra.mxu0 %v7448_v33  ;;  %v7470_v33 = vpack.c.bf16 %v2134_v29, %v2102_v27  ;;  %v1916_v27 = vld [vmem:[#allocation4 + $0x8d8] sm:$0xff]  ;;  %v7552_v31 = vpack.c.bf16 %v1883_v24, %v1851_v20  ;;  %v1695_v20 = vld [vmem:[#allocation4 + $0x1f0] sm:$0xff]  ;;  %v1758_v24 = vld [vmem:[#allocation4 + $0x3e8] sm:$0xff] }
 0xe7d   :  { %7481 = vmatpush1.bf16.msra.mxu1 %v7480_v9  ;;  %7451 = vmatprep.subr.bf16.mxu0 %v7450_v15  ;;  %v2101_v9 = vld [vmem:[#allocation4 + $0xea0] sm:$0xff]  ;;  %v1948_v29 = vld [vmem:[#allocation4 + $0x9d8] sm:$0xff] }
 0xe7e   :  { %7483 = vmatprep.subr.bf16.mxu1 %v7482_v35  ;;  %v2133_v15 = vld [vmem:[#allocation4 + $0xfa0] sm:$0xff]  ;;  %v1658_v35 = vld [vmem:[#allocation4 + $0xc8] sm:$0xff] }
 0xe7f   :  { %v7472_v39 = vpack.c.bf16 %v2133_v15, %v2101_v9  ;;  %v1915_v9 = vld [vmem:[#allocation4 + $0x8d0] sm:$0xff]  ;;  %v7554_v15 = vpack.c.bf16 %v1948_v29, %v1916_v27 }
 0xe80   :  { %7453 = vmatpush1.bf16.msra.mxu0 %v7452_v41  ;;  %v7506_v41 = vpack.c.bf16 %v1690_v36, %v1658_v35  ;;  %v1980_v35 = vld [vmem:[#allocation4 + $0xad8] sm:$0xff]  ;;  %v7556_v38 = vpack.c.bf16 %v1947_v21, %v1915_v9  ;;  %v1759_v9 = vld [vmem:[#allocation4 + $0x3f0] sm:$0xff]  ;;  %v1822_v21 = vld [vmem:[#allocation4 + $0x5e8] sm:$0xff] }
 0xe81   :  { %7485 = vmatpush1.bf16.msra.mxu1 %v7484_v42  ;;  %7455 = vmatprep.subr.bf16.mxu0 %v7454_v43  ;;  %v1657_v42 = vld [vmem:[#allocation4 + $0xc0] sm:$0xff]  ;;  %v2012_v36 = vld [vmem:[#allocation4 + $0xbd8] sm:$0xff] }
 0xe82   :  { %7487 = vmatprep.subr.bf16.mxu1 %v7486_v45  ;;  %v1689_v43 = vld [vmem:[#allocation4 + $0x1c0] sm:$0xff]  ;;  %v1722_v45 = vld [vmem:[#allocation4 + $0x2c8] sm:$0xff] }
 0xe83   :  { %v7508_v49 = vpack.c.bf16 %v1689_v43, %v1657_v42  ;;  %v1979_v42 = vld [vmem:[#allocation4 + $0xad0] sm:$0xff]  ;;  %v7558_v43 = vpack.c.bf16 %v2012_v36, %v1980_v35 }
 0xe84   :  { %7457 = vmatpush1.bf16.msra.mxu0 %v7456_v51  ;;  %v7510_v51 = vpack.c.bf16 %v1754_v46, %v1722_v45  ;;  %v2044_v45 = vld [vmem:[#allocation4 + $0xcd8] sm:$0xff]  ;;  %v7560_v48 = vpack.c.bf16 %v2011_v44, %v1979_v42  ;;  %v1823_v42 = vld [vmem:[#allocation4 + $0x5f0] sm:$0xff]  ;;  %v1886_v44 = vld [vmem:[#allocation4 + $0x7e8] sm:$0xff] }
 0xe85   :  { %7489 = vmatpush1.bf16.msra.mxu1 %v7488_v52  ;;  %7459 = vmatprep.subr.bf16.mxu0 %v7458_v53  ;;  %v1721_v52 = vld [vmem:[#allocation4 + $0x2c0] sm:$0xff]  ;;  %v2076_v46 = vld [vmem:[#allocation4 + $0xdd8] sm:$0xff] }
 0xe86   :  { %7491 = vmatprep.subr.bf16.mxu1 %v7490_v57  ;;  %v1753_v53 = vld [vmem:[#allocation4 + $0x3c0] sm:$0xff]  ;;  %v1786_v57 = vld [vmem:[#allocation4 + $0x4c8] sm:$0xff] }
 0xe87   :  { %v7512_v63 = vpack.c.bf16 %v1753_v53, %v1721_v52  ;;  %v2043_v52 = vld [vmem:[#allocation4 + $0xcd0] sm:$0xff]  ;;  %v7562_v53 = vpack.c.bf16 %v2076_v46, %v2044_v45 }
 0xe88   :  { %7461 = vmatpush1.bf16.msra.mxu0 %v7460_v5  ;;  %v7514_v5 = vpack.c.bf16 %v1818_v59, %v1786_v57  ;;  %v2108_v57 = vld [vmem:[#allocation4 + $0xed8] sm:$0xff]  ;;  %v7564_v61 = vpack.c.bf16 %v2075_v54, %v2043_v52  ;;  %v1887_v52 = vld [vmem:[#allocation4 + $0x7f0] sm:$0xff]  ;;  %v1950_v54 = vld [vmem:[#allocation4 + $0x9e8] sm:$0xff] }
 0xe89   :  { %7493 = vmatpush1.bf16.msra.mxu1 %v7492_v62  ;;  %7463 = vmatprep.subr.bf16.mxu0 %v7462_v3  ;;  %v1785_v62 = vld [vmem:[#allocation4 + $0x4c0] sm:$0xff]  ;;  %v2140_v59 = vld [vmem:[#allocation4 + $0xfd8] sm:$0xff] }
 0xe8a   :  { %7495 = vmatprep.subr.bf16.mxu1 %v7494_v12  ;;  %v1817_v3 = vld [vmem:[#allocation4 + $0x5c0] sm:$0xff]  ;;  %v1850_v12 = vld [vmem:[#allocation4 + $0x6c8] sm:$0xff] }
 0xe8b   :  { %v7516_v17 = vpack.c.bf16 %v1817_v3, %v1785_v62  ;;  %v2107_v62 = vld [vmem:[#allocation4 + $0xed0] sm:$0xff]  ;;  %v7566_v3 = vpack.c.bf16 %v2140_v59, %v2108_v57 }
 0xe8c   :  { %7465 = vmatpush1.bf16.msra.mxu0 %v7464_v22  ;;  %v7518_v22 = vpack.c.bf16 %v1882_v13, %v1850_v12  ;;  %v1664_v12 = vld [vmem:[#allocation4 + $0xf8] sm:$0xff]  ;;  %v7568_v16 = vpack.c.bf16 %v2139_v6, %v2107_v62  ;;  %v1982_v62 = vld [vmem:[#allocation4 + $0xae8] sm:$0xff]  ;;  %v2153_v6 = vlaneseq }
 0xe8d   :  { %7497 = vmatpush1.bf16.msra.mxu1 %v7496_v18  ;;  %7467 = vmatprep.subr.bf16.mxu0 %v7466_v19  ;;  %v1849_v18 = vld [vmem:[#allocation4 + $0x6c0] sm:$0xff]  ;;  %v1696_v13 = vld [vmem:[#allocation4 + $0x1f8] sm:$0xff] }
 0xe8e   :  { %7499 = vmatprep.subr.bf16.mxu1 %v7498_v25  ;;  %v1881_v19 = vld [vmem:[#allocation4 + $0x7c0] sm:$0xff]  ;;  %v1914_v25 = vld [vmem:[#allocation4 + $0x8c8] sm:$0xff] }
 0xe8f   :  { %v7520_v30 = vpack.c.bf16 %v1881_v19, %v1849_v18  ;;  %v1663_v18 = vld [vmem:[#allocation4 + $0xf0] sm:$0xff]  ;;  %v7602_v19 = vpack.c.bf16 %v1696_v13, %v1664_v12 }
 0xe90   :  { %7469 = vmatpush1.bf16.msra.mxu0 %v7468_v32  ;;  %v7522_v32 = vpack.c.bf16 %v1946_v26, %v1914_v25  ;;  %v1728_v25 = vld [vmem:[#allocation4 + $0x2f8] sm:$0xff]  ;;  %v7604_v29 = vpack.c.bf16 %v1695_v20, %v1663_v18  ;;  %v2015_v18 = vld [vmem:[#allocation4 + $0xbf0] sm:$0xff]  ;;  %v2078_v20 = vld [vmem:[#allocation4 + $0xde8] sm:$0xff] }
 0xe91   :  { %7501 = vmatpush1.bf16.msra.mxu1 %v7500_v10  ;;  %7471 = vmatprep.subr.bf16.mxu0 %v7470_v33  ;;  %v1913_v10 = vld [vmem:[#allocation4 + $0x8c0] sm:$0xff]  ;;  %v1760_v26 = vld [vmem:[#allocation4 + $0x3f8] sm:$0xff] }
 0xe92   :  { %7503 = vmatprep.subr.bf16.mxu1 %v7502_v28  ;;  %v1945_v33 = vld [vmem:[#allocation4 + $0x9c0] sm:$0xff]  ;;  %v1978_v28 = vld [vmem:[#allocation4 + $0xac8] sm:$0xff] }
 0xe93   :  { %v7524_v37 = vpack.c.bf16 %v1945_v33, %v1913_v10  ;;  %v1727_v10 = vld [vmem:[#allocation4 + $0x2f0] sm:$0xff]  ;;  %v7606_v33 = vpack.c.bf16 %v1760_v26, %v1728_v25  ;;  %v2080_v25 = vld [vmem:[#allocation4 + $0xdf8] sm:$0xff] }
 0xe94   :  { %7473 = vmatpush1.bf16.msra.mxu0 %v7472_v39  ;;  %v7526_v39 = vpack.c.bf16 %v2010_v34, %v1978_v28  ;;  %v1792_v28 = vld [vmem:[#allocation4 + $0x4f8] sm:$0xff]  ;;  %v7608_v36 = vpack.c.bf16 %v1759_v9, %v1727_v10  ;;  %v2079_v9 = vld [vmem:[#allocation4 + $0xdf0] sm:$0xff] }
 0xe95   :  { %7505 = vmatpush1.bf16.msra.mxu1 %v7504_v40  ;;  %7507 = vmatprep.subr.bf16.mxu0 %v7506_v41  ;;  %v1977_v40 = vld [vmem:[#allocation4 + $0xac0] sm:$0xff]  ;;  %v1824_v34 = vld [vmem:[#allocation4 + $0x5f8] sm:$0xff] }
 0xe96   :  { %7539 = vmatprep.subr.bf16.mxu1 %v7538_v58  ;;  %v2009_v41 = vld [vmem:[#allocation4 + $0xbc0] sm:$0xff]  ;;  %v2042_v58 = vld [vmem:[#allocation4 + $0xcc8] sm:$0xff] }
 0xe97   :  { %3088 = vmatmul.mubr.f32.vlgmr.msra.gmra.mrb[34].mxu0 %v8936_v4  ;;  %v7528_v47 = vpack.c.bf16 %v2009_v41, %v1977_v40  ;;  %v1791_v40 = vld [vmem:[#allocation4 + $0x4f0] sm:$0xff]  ;;  %v7610_v41 = vpack.c.bf16 %v1824_v34, %v1792_v28 }
 0xe98   :  { %3159 = vmatmul.mubr.f32.vlgmr.msra.gmra.mrb[34].mxu1 %v8936_v4  ;;  %7509 = vmatpush1.bf16.msra.mxu0 %v7508_v49  ;;  %v7530_v49 = vpack.c.bf16 %v2074_v8, %v2042_v58  ;;  %v1856_v58 = vld [vmem:[#allocation4 + $0x6f8] sm:$0xff]  ;;  %v7612_v46 = vpack.c.bf16 %v1823_v42, %v1791_v40 }
 0xe99   :  { %7541 = vmatpush1.bf16.msra.mxu1 %v7540_v50  ;;  %7511 = vmatprep.subr.bf16.mxu0 %v7510_v51  ;;  %v2041_v50 = vld [vmem:[#allocation4 + $0xcc0] sm:$0xff]  ;;  %v1888_v8 = vld [vmem:[#allocation4 + $0x7f8] sm:$0xff] }
 0xe9a   :  { %7543 = vmatprep.subr.bf16.mxu1 %v7542_v55  ;;  %3229 = vmatprep.mubr.f32.mxu0 %v8367_v1  ;;  %v2073_v51 = vld [vmem:[#allocation4 + $0xdc0] sm:$0xff]  ;;  %v2106_v55 = vld [vmem:[#allocation4 + $0xec8] sm:$0xff] }
 0xe9b   :  { %3300 = vmatprep.mubr.f32.mxu1 %v8367_v1  ;;  %v7532_v60 = vpack.c.bf16 %v2073_v51, %v2041_v50  ;;  %v1855_v50 = vld [vmem:[#allocation4 + $0x6f0] sm:$0xff]  ;;  %v7614_v51 = vpack.c.bf16 %v1888_v8, %v1856_v58  ;;  %v2141_v58 = vld [vmem:[#allocation4 + $0xfe0] sm:$0xff] }
 0xe9c   :  { %7513 = vmatpush1.bf16.msra.mxu0 %v7512_v63  ;;  %v7534_v63 = vpack.c.bf16 %v2138_v56, %v2106_v55  ;;  %v1920_v55 = vld [vmem:[#allocation4 + $0x8f8] sm:$0xff]  ;;  %v2111_v8 = vld [vmem:[#allocation4 + $0xef0] sm:$0xff] }
 0xe9d   :  { %7545 = vmatpush1.bf16.msra.mxu1 %v7544_v2  ;;  %7515 = vmatprep.subr.bf16.mxu0 %v7514_v5  ;;  %v2105_v2 = vld [vmem:[#allocation4 + $0xec0] sm:$0xff]  ;;  %v1952_v56 = vld [vmem:[#allocation4 + $0x9f8] sm:$0xff] }
 0xe9e   :  { %7547 = vmatprep.subr.bf16.mxu1 %v7546_v7  ;;  %v2137_v5 = vld [vmem:[#allocation4 + $0xfc0] sm:$0xff]  ;;  %v1662_v7 = vld [vmem:[#allocation4 + $0xe8] sm:$0xff] }
 0xe9f   :  { %v7536_v14 = vpack.c.bf16 %v2137_v5, %v2105_v2  ;;  %v7618_v2 = vpack.c.bf16 %v1952_v56, %v1920_v55  ;;  %v1951_v5 = vld [vmem:[#allocation4 + $0x9f0] sm:$0xff]  ;;  %v3481_v56 = vld [vmem:[#allocation5] sm:$0xff] }
 0xea0   :  { %7517 = vmatpush1.bf16.msra.mxu0 %v7516_v17  ;;  %v7570_v17 = vpack.c.bf16 %v1694_v11, %v1662_v7  ;;  %v1984_v7 = vld [vmem:[#allocation4 + $0xaf8] sm:$0xff] }
 0xea1   :  { %7549 = vmatpush1.bf16.msra.mxu1 %v7548_v0  ;;  %7519 = vmatprep.subr.bf16.mxu0 %v7518_v22  ;;  %v1661_v0 = vld [vmem:[#allocation4 + $0xe0] sm:$0xff]  ;;  %v2016_v11 = vld [vmem:[#allocation4 + $0xbf8] sm:$0xff] }
 0xea2   :  { %7551 = vmatprep.subr.bf16.mxu1 %v7550_v23  ;;  %v1693_v22 = vld [vmem:[#allocation4 + $0x1e0] sm:$0xff]  ;;  %v1726_v23 = vld [vmem:[#allocation4 + $0x2e8] sm:$0xff] }
 0xea3   :  { %v7572_v27 = vpack.c.bf16 %v1693_v22, %v1661_v0  ;;  %v1983_v0 = vld [vmem:[#allocation4 + $0xaf0] sm:$0xff]  ;;  %v7622_v22 = vpack.c.bf16 %v2016_v11, %v1984_v7 }
 0xea4   :  { %7521 = vmatpush1.bf16.msra.mxu0 %v7520_v30  ;;  %v7574_v30 = vpack.c.bf16 %v1758_v24, %v1726_v23  ;;  %v8966_v23 = vshrl.u32 %v2153_v6, 7  ;;  %v2048_v24 = vld [vmem:[#allocation4 + $0xcf8] sm:$0xff]  ;;  %v3483_v11 = vld [vmem:[#allocation5 + $0x10] sm:$0xff] }
 0xea5   :  { %7553 = vmatpush1.bf16.msra.mxu1 %v7552_v31  ;;  %7523 = vmatprep.subr.bf16.mxu0 %v7522_v32  ;;  %v1725_v31 = vld [vmem:[#allocation4 + $0x2e0] sm:$0xff]  ;;  %v3532_v6 = vld [vmem:[#allocation5 + $0x198] sm:$0xff] }
 0xea6   :  { %7555 = vmatprep.subr.bf16.mxu1 %v7554_v15  ;;  %v1757_v32 = vld [vmem:[#allocation4 + $0x3e0] sm:$0xff]  ;;  %v1790_v15 = vld [vmem:[#allocation4 + $0x4e8] sm:$0xff]  ;;  %v8971_v28 = vsub.s32 1, %v8966_v23 }
 0xea7   :  { %v7576_v35 = vpack.c.bf16 %v1757_v32, %v1725_v31  ;;  %v2077_v31 = vld [vmem:[#allocation4 + $0xde0] sm:$0xff]  ;;  %v2047_v32 = vld [vmem:[#allocation4 + $0xcf0] sm:$0xff] }
 0xea8   :  { %7525 = vmatpush1.bf16.msra.mxu0 %v7524_v37  ;;  %v7578_v37 = vpack.c.bf16 %v1822_v21, %v1790_v15  ;;  %v2110_v15 = vld [vmem:[#allocation4 + $0xee8] sm:$0xff]  ;;  %v7628_v42 = vpack.c.bf16 %v2079_v9, %v2047_v32  ;;  %v3503_v9 = vld [vmem:[#allocation5 + $0xb0] sm:$0xff] }
 0xea9   :  { %7557 = vmatpush1.bf16.msra.mxu1 %v7556_v38  ;;  %7527 = vmatprep.subr.bf16.mxu0 %v7526_v39  ;;  %v1789_v38 = vld [vmem:[#allocation4 + $0x4e0] sm:$0xff]  ;;  %v2142_v21 = vld [vmem:[#allocation4 + $0xfe8] sm:$0xff] }
 0xeaa   :  { %7559 = vmatprep.subr.bf16.mxu1 %v7558_v43  ;;  %v1821_v39 = vld [vmem:[#allocation4 + $0x5e0] sm:$0xff]  ;;  %v1854_v43 = vld [vmem:[#allocation4 + $0x6e8] sm:$0xff] }
 0xeab   :  { %v7580_v45 = vpack.c.bf16 %v1821_v39, %v1789_v38  ;;  %v8975_v38 = vld [vmem:[#allocation12] sm:$0xff]  ;;  %v8978_v39 = vsub.s32 3, %v8966_v23 }
 0xeac   :  { %7529 = vmatpush1.bf16.msra.mxu0 %v7528_v47  ;;  %v7582_v47 = vpack.c.bf16 %v1886_v44, %v1854_v43  ;;  %v7598_v43 = vpack.c.bf16 %v2142_v21, %v2110_v15  ;;  %v2109_v44 = vld [vmem:[#allocation4 + $0xee0] sm:$0xff]  ;;  %v3504_v15 = vld [vmem:[#allocation5 + $0xb8] sm:$0xff]  ;;  %v3535_v21 = vld [vmem:[#allocation5 + $0x1b0] sm:$0xff] }
 0xead   :  { %7561 = vmatpush1.bf16.msra.mxu1 %v7560_v48  ;;  %7531 = vmatprep.subr.bf16.mxu0 %v7530_v49  ;;  %v1853_v48 = vld [vmem:[#allocation4 + $0x6e0] sm:$0xff] }
 0xeae   :  { %7563 = vmatprep.subr.bf16.mxu1 %v7562_v53  ;;  %v1885_v49 = vld [vmem:[#allocation4 + $0x7e0] sm:$0xff]  ;;  %v1918_v53 = vld [vmem:[#allocation4 + $0x8e8] sm:$0xff] }
 0xeaf   :  { %v7584_v57 = vpack.c.bf16 %v1885_v49, %v1853_v48  ;;  %v7586_v59 = vpack.c.bf16 %v1950_v54, %v1918_v53  ;;  %v3498_v48 = vld [vmem:[#allocation5 + $0x88] sm:$0xff]  ;;  %v2160_v49 = vrot.slane %v8975_v38, %v8971_v28  ;;  %v7600_v53 = vpack.c.bf16 %v2141_v58, %v2109_v44  ;;  %v3520_v44 = vld [vmem:[#allocation5 + $0x138] sm:$0xff]  ;;  %v3505_v58 = vld [vmem:[#allocation5 + $0xc0] sm:$0xff] }
 0xeb0   :  { %7533 = vmatpush1.bf16.msra.mxu0 %v7532_v60  ;;  %v1917_v60 = vld [vmem:[#allocation4 + $0x8e0] sm:$0xff] }
 0xeb1   :  { %7565 = vmatpush1.bf16.msra.mxu1 %v7564_v61  ;;  %7535 = vmatprep.subr.bf16.mxu0 %v7534_v63  ;;  %v1949_v61 = vld [vmem:[#allocation4 + $0x9e0] sm:$0xff]  ;;  %v1919_v63 = vld [vmem:[#allocation4 + $0x8f0] sm:$0xff] }
 0xeb2   :  { %7567 = vmatprep.subr.bf16.mxu1 %v7566_v3  ;;  %v2014_v3 = vld [vmem:[#allocation4 + $0xbe8] sm:$0xff]  ;;  %v7588_v12 = vpack.c.bf16 %v1949_v61, %v1917_v60  ;;  %v7620_v13 = vpack.c.bf16 %v1951_v5, %v1919_v63  ;;  %v3499_v63 = vld [vmem:[#allocation5 + $0x90] sm:$0xff] }
 0xeb3   :  { %v3514_v60 = vld [vmem:[#allocation5 + $0x108] sm:$0xff] }
 0xeb4   :  { %7537 = vmatpush1.bf16.msra.mxu0 %v7536_v14  ;;  %v7590_v14 = vpack.c.bf16 %v2014_v3, %v1982_v62  ;;  %v3531_v3 = vld [vmem:[#allocation5 + $0x190] sm:$0xff] }
 0xeb5   :  { %7569 = vmatpush1.bf16.msra.mxu1 %v7568_v16  ;;  %7571 = vmatprep.subr.bf16.mxu0 %v7570_v17  ;;  %v1981_v16 = vld [vmem:[#allocation4 + $0xae0] sm:$0xff] }
 0xeb6   :  { %7603 = vmatprep.subr.bf16.mxu1 %v7602_v19  ;;  %v2013_v17 = vld [vmem:[#allocation4 + $0xbe0] sm:$0xff]  ;;  %v2046_v19 = vld [vmem:[#allocation4 + $0xce8] sm:$0xff] }
 0xeb7   :  { %3230 = vmatmul.mubr.f32.vlgmr.msra.gmra.mrb[36].mxu0 %v8936_v4  ;;  %v7592_v26 = vpack.c.bf16 %v2013_v17, %v1981_v16  ;;  %v3516_v16 = vld [vmem:[#allocation5 + $0x118] sm:$0xff]  ;;  %v3501_v17 = vld [vmem:[#allocation5 + $0xa0] sm:$0xff] }
 0xeb8   :  { %3301 = vmatmul.mubr.f32.vlgmr.msra.gmra.mrb[36].mxu1 %v8936_v4  ;;  %7573 = vmatpush1.bf16.msra.mxu0 %v7572_v27  ;;  %v7624_v27 = vpack.c.bf16 %v2015_v18, %v1983_v0  ;;  %v3502_v0 = vld [vmem:[#allocation5 + $0xa8] sm:$0xff]  ;;  %v7670_v18 = vpack.c.bf16 %v3532_v6, %v3531_v3  ;;  %v3524_v3 = vld [vmem:[#allocation5 + $0x158] sm:$0xff]  ;;  %v3509_v6 = vld [vmem:[#allocation5 + $0xe0] sm:$0xff] }
 0xeb9   :  { %7605 = vmatpush1.bf16.msra.mxu1 %v7604_v29  ;;  %7575 = vmatprep.subr.bf16.mxu0 %v7574_v30  ;;  %v7594_v29 = vpack.c.bf16 %v2078_v20, %v2046_v19  ;;  %v2045_v30 = vld [vmem:[#allocation4 + $0xce0] sm:$0xff]  ;;  %v3534_v20 = vld [vmem:[#allocation5 + $0x1a8] sm:$0xff] }
 0xeba   :  { %7607 = vmatprep.subr.bf16.mxu1 %v7606_v33  ;;  %3371 = vmatprep.mubr.f32.mxu0 %v8367_v1  ;;  %v7626_v33 = vpack.c.bf16 %v2080_v25, %v2048_v24  ;;  %v3533_v19 = vld [vmem:[#allocation5 + $0x1a0] sm:$0xff] }
 0xebb   :  { %3442 = vmatprep.mubr.f32.mxu1 %v8367_v1  ;;  %v7616_v1 = vpack.c.bf16 %v1887_v52, %v1855_v50  ;;  %v3529_v50 = vld [vmem:[#allocation5 + $0x180] sm:$0xff]  ;;  %v2168_v52 = vrot.slane %v8975_v38, %v8978_v39  ;;  %v7674_v32 = vpack.c.bf16 %v3534_v20, %v3533_v19  ;;  %v8990_v19 = vsub.s32 2, %v8966_v23 }
 0xebc   :  { %7577 = vmatpush1.bf16.msra.mxu0 %v7576_v35 }
 0xebd   :  { %7609 = vmatpush1.bf16.msra.mxu1 %v7608_v36  ;;  %7579 = vmatprep.subr.bf16.mxu0 %v7578_v37  ;;  %v2112_v36 = vld [vmem:[#allocation4 + $0xef8] sm:$0xff] }
 0xebe   :  { %7611 = vmatprep.subr.bf16.mxu1 %v7610_v41  ;;  %v2144_v37 = vld [vmem:[#allocation4 + $0xff8] sm:$0xff]  ;;  %v7596_v41 = vpack.c.bf16 %v2077_v31, %v2045_v30  ;;  %v3486_v30 = vld [vmem:[#allocation5 + $0x28] sm:$0xff]  ;;  %v3517_v31 = vld [vmem:[#allocation5 + $0x120] sm:$0xff] }
 0xec0   :  { %7581 = vmatpush1.bf16.msra.mxu0 %v7580_v45  ;;  %v7630_v45 = vpack.c.bf16 %v2144_v37, %v2112_v36  ;;  %v7646_v37 = vpack.c.bf16 %v3504_v15, %v3503_v9  ;;  %v9000_v9 = vsub.s32 7, %v8966_v23 }
 0xec1   :  { %7613 = vmatpush1.bf16.msra.mxu1 %v7612_v46  ;;  %7583 = vmatprep.subr.bf16.mxu0 %v7582_v47  ;;  %v2143_v46 = vld [vmem:[#allocation4 + $0xff0] sm:$0xff]  ;;  %v3497_v47 = vld [vmem:[#allocation5 + $0x80] sm:$0xff] }
 0xec2   :  { %7615 = vmatprep.subr.bf16.mxu1 %v7614_v51  ;;  %v3530_v51 = vld [vmem:[#allocation5 + $0x188] sm:$0xff]  ;;  %v7632_v54 = vpack.c.bf16 %v2143_v46, %v2111_v8  ;;  %v7634_v55 = vpack.c.bf16 %v3498_v48, %v3497_v47 }
 0xec3   :  { %v3506_v8 = vld [vmem:[#allocation5 + $0xc8] sm:$0xff] }
 0xec4   :  { %7585 = vmatpush1.bf16.msra.mxu0 %v7584_v57  ;;  %v3482_v57 = vld [vmem:[#allocation5 + $0x8] sm:$0xff] }
 0xec5   :  { %7617 = vmatpush1.bf16.msra.mxu1 %v7616_v1  ;;  %7587 = vmatprep.subr.bf16.mxu0 %v7586_v59  ;;  %v7666_v1 = vpack.c.bf16 %v3530_v51, %v3529_v50  ;;  %v3513_v59 = vld [vmem:[#allocation5 + $0x100] sm:$0xff]  ;;  %v7636_v62 = vpack.c.bf16 %v3482_v57, %v3481_v56  ;;  %v3538_v46 = vld [vmem:[#allocation5 + $0x1c8] sm:$0xff]  ;;  %v3508_v56 = vld [vmem:[#allocation5 + $0xd8] sm:$0xff] }
 0xec6   :  { %7619 = vmatprep.subr.bf16.mxu1 %v7618_v2  ;;  %v3500_v2 = vld [vmem:[#allocation5 + $0x98] sm:$0xff]  ;;  %v7668_v7 = vpack.c.bf16 %v3514_v60, %v3513_v59  ;;  %v3489_v50 = vld [vmem:[#allocation5 + $0x40] sm:$0xff]  ;;  %v3490_v51 = vld [vmem:[#allocation5 + $0x48] sm:$0xff] }
 0xec7   :  { %v3539_v57 = vld [vmem:[#allocation5 + $0x1d0] sm:$0xff]  ;;  %v7652_v59 = vpack.c.bf16 %v3490_v51, %v3489_v50 }
 0xec8   :  { %7589 = vmatpush1.bf16.msra.mxu0 %v7588_v12  ;;  %v3484_v12 = vld [vmem:[#allocation5 + $0x18] sm:$0xff] }
 0xec9   :  { %7621 = vmatpush1.bf16.msra.mxu1 %v7620_v13  ;;  %7591 = vmatprep.subr.bf16.mxu0 %v7590_v14  ;;  %v3515_v13 = vld [vmem:[#allocation5 + $0x110] sm:$0xff]  ;;  %v7638_v14 = vpack.c.bf16 %v3500_v2, %v3499_v63  ;;  %v7640_v25 = vpack.c.bf16 %v3484_v12, %v3483_v11  ;;  %v3492_v2 = vld [vmem:[#allocation5 + $0x58] sm:$0xff]  ;;  %v3541_v11 = vld [vmem:[#allocation5 + $0x1e0] sm:$0xff] }
 0xeca   :  { %v8968_v10 = vpop.f32.mrb[24].mxu0  ;;  %7623 = vmatprep.subr.bf16.mxu1 %v7622_v22  ;;  %v3491_v63 = vld [vmem:[#allocation5 + $0x50] sm:$0xff]  ;;  %v3542_v12 = vld [vmem:[#allocation5 + $0x1e8] sm:$0xff] }
 0xecb   :  { %v2381_v34 = vpop.f32.mrb[25].mxu0  ;;  %v8973_v35 = vpop.f32.mrb[24].mxu1 }
 0xecc   :  { %7593 = vmatpush1.bf16.msra.mxu0 %v7592_v26  ;;  %v2452_v40 = vpop.f32.mrb[25].mxu1  ;;  %v2382_v61 = vadd.f32 %v2381_v34, %v2160_v49  ;;  %v7672_v26 = vpack.c.bf16 %v3516_v16, %v3515_v13  ;;  %v3536_v34 = vld [vmem:[#allocation5 + $0x1b8] sm:$0xff]  ;;  %v7650_v49 = vpack.c.bf16 %v3506_v8, %v3505_v58  ;;  %v7656_v13 = vpack.c.bf16 %v3492_v2, %v3491_v63  ;;  %v3561_v58 = vld [vmem:[#allocation5 + $0x280] sm:$0xff]  ;;  %v3562_v8 = vld [vmem:[#allocation5 + $0x288] sm:$0xff] }
 0xecd   :  { %7625 = vmatpush1.bf16.msra.mxu1 %v7624_v27  ;;  %7595 = vmatprep.subr.bf16.mxu0 %v7594_v29  ;;  %v2453_v5 = vadd.f32 %v2452_v40, %v2168_v52  ;;  %v7642_v27 = vpack.c.bf16 %v3502_v0, %v3501_v17  ;;  %v3485_v29 = vld [vmem:[#allocation5 + $0x20] sm:$0xff]  ;;  %v3487_v40 = vld [vmem:[#allocation5 + $0x30] sm:$0xff] }
 0xece   :  { %7627 = vmatprep.subr.bf16.mxu1 %v7626_v33  ;;  %v3450_v22 = vmax.f32 %v2382_v61, 0.0  ;;  %v3518_v33 = vld [vmem:[#allocation5 + $0x128] sm:$0xff]  ;;  %v3521_v52 = vld [vmem:[#allocation5 + $0x140] sm:$0xff] }
 0xecf   :  { %v3452_v24 = vmax.f32 %v2453_v5, 0.0  ;;  %v7676_v36 = vpack.c.bf16 %v3518_v33, %v3517_v31  ;;  %v3523_v5 = vld [vmem:[#allocation5 + $0x150] sm:$0xff]  ;;  %v3493_v0 = vld [vmem:[#allocation5 + $0x60] sm:$0xff]  ;;  %v3544_v33 = vld [vmem:[#allocation5 + $0x1f8] sm:$0xff] }
 0xed0   :  { %7597 = vmatpush1.bf16.msra.mxu0 %v7596_v41  ;;  %v3488_v41 = vld [vmem:[#allocation5 + $0x38] sm:$0xff]  ;;  %v7688_v16 = vpack.c.bf16 %v3524_v3, %v3523_v5  ;;  %v3595_v5 = vld [vmem:[#allocation5 + $0x390] sm:$0xff] }
 0xed1   :  { %7629 = vmatpush1.bf16.msra.mxu1 %v7628_v42  ;;  %7599 = vmatprep.subr.bf16.mxu0 %v7598_v43  ;;  %v3519_v42 = vld [vmem:[#allocation5 + $0x130] sm:$0xff]  ;;  %v7678_v43 = vpack.c.bf16 %v3536_v34, %v3535_v21  ;;  %v7648_v47 = vpack.c.bf16 %v3488_v41, %v3487_v40  ;;  %v3496_v40 = vld [vmem:[#allocation5 + $0x78] sm:$0xff] }
 0xed2   :  { %7631 = vmatprep.subr.bf16.mxu1 %v7630_v45  ;;  %v3537_v45 = vld [vmem:[#allocation5 + $0x1c0] sm:$0xff]  ;;  %v7680_v48 = vpack.c.bf16 %v3520_v44, %v3519_v42  ;;  %v3527_v41 = vld [vmem:[#allocation5 + $0x170] sm:$0xff]  ;;  %v2164_v42 = vrot.slane %v8975_v38, %v8990_v19  ;;  %v3528_v44 = vld [vmem:[#allocation5 + $0x178] sm:$0xff] }
 0xed3   :  { %v7696_v51 = vpack.c.bf16 %v3528_v44, %v3527_v41  ;;  %v3551_v44 = vld [vmem:[#allocation5 + $0x230] sm:$0xff] }
 0xed4   :  { %7601 = vmatpush1.bf16.msra.mxu0 %v7600_v53  ;;  %v7682_v53 = vpack.c.bf16 %v3538_v46, %v3537_v45  ;;  %v3593_v46 = vld [vmem:[#allocation5 + $0x380] sm:$0xff] }
 0xed5   :  { %7633 = vmatpush1.bf16.msra.mxu1 %v7632_v54  ;;  %7635 = vmatprep.subr.bf16.mxu0 %v7634_v55  ;;  %v3522_v54 = vld [vmem:[#allocation5 + $0x148] sm:$0xff]  ;;  %v3507_v55 = vld [vmem:[#allocation5 + $0xd0] sm:$0xff] }
 0xed6   :  { %7667 = vmatprep.subr.bf16.mxu1 %v7666_v1  ;;  %v3540_v1 = vld [vmem:[#allocation5 + $0x1d8] sm:$0xff]  ;;  %v7684_v60 = vpack.c.bf16 %v3522_v54, %v3521_v52  ;;  %v7654_v61 = vpack.c.bf16 %v3508_v56, %v3507_v55  ;;  %v7698_v52 = vpack.c.bf16 %v3562_v8, %v3561_v58  ;;  %v3546_v54 = vld [vmem:[#allocation5 + $0x208] sm:$0xff]  ;;  %v2451_v55 = vadd.f32 %v8973_v35, %v2164_v42  ;;  %v3583_v8 = vld [vmem:[#allocation5 + $0x330] sm:$0xff] }
 0xed7   :  { %3372 = vmatmul.mubr.f32.vlgmr.msra.gmra.mrb[38].mxu0 %v8936_v4  ;;  %v3552_v58 = vld [vmem:[#allocation5 + $0x238] sm:$0xff] }
 0xed8   :  { %3443 = vmatmul.mubr.f32.vlgmr.msra.gmra.mrb[38].mxu1 %v8936_v4  ;;  %7637 = vmatpush3.bf16.msra.mxu0 %v7636_v62  ;;  %v7644_v4 = vpack.c.bf16 %v3486_v30, %v3485_v29  ;;  %v7686_v62 = vpack.c.bf16 %v3540_v1, %v3539_v57  ;;  %v8995_v29 = vsub.s32 5, %v8966_v23  ;;  %v3577_v57 = vld [vmem:[#allocation5 + $0x300] sm:$0xff]  ;;  %v3578_v1 = vld [vmem:[#allocation5 + $0x308] sm:$0xff]  ;;  %v3451_v35 = vmax.f32 %v2451_v55, 0.0 }
 0xed9   :  { %4064 = vmatprep.mubr.f32.mxu0 %v3450_v22  ;;  %7669 = vmatpush3.bf16.msra.mxu1 %v7668_v7  ;;  %v3510_v7 = vld [vmem:[#allocation5 + $0xe8] sm:$0xff]  ;;  %v7732_v3 = vpack.c.bf16 %v3578_v1, %v3577_v57 }
 0xeda   :  { %4134 = vmatprep.mubr.f32.mxu1 %v3452_v24  ;;  %7639 = vmatprep.subr.bf16.mxu0 %v7638_v14  ;;  %v8987_v14 = vsub.s32 0, %v8966_v23  ;;  %v7658_v17 = vpack.c.bf16 %v3510_v7, %v3509_v6  ;;  %v3494_v22 = vld [vmem:[#allocation5 + $0x68] sm:$0xff]  ;;  %v7690_v24 = vpack.c.bf16 %v3542_v12, %v3541_v11  ;;  %v2176_v45 = vrot.slane %v8975_v38, %v8995_v29  ;;  %v3547_v6 = vld [vmem:[#allocation5 + $0x210] sm:$0xff]  ;;  %v3548_v7 = vld [vmem:[#allocation5 + $0x218] sm:$0xff] }
 0xedb   :  { %7671 = vmatprep.subr.bf16.mxu1 %v7670_v18  ;;  %v3525_v18 = vld [vmem:[#allocation5 + $0x160] sm:$0xff]  ;;  %v7660_v21 = vpack.c.bf16 %v3494_v22, %v3493_v0  ;;  %v3579_v11 = vld [vmem:[#allocation5 + $0x310] sm:$0xff]  ;;  %v3554_v55 = vld [vmem:[#allocation5 + $0x248] sm:$0xff] }
 0xedc   :  { %7641 = vmatpush3.bf16.msra.mxu0 %v7640_v25  ;;  %v3526_v25 = vld [vmem:[#allocation5 + $0x168] sm:$0xff]  ;;  %v2156_v34 = vrot.slane %v8975_v38, %v8987_v14 }
 0xedd   :  { %7673 = vmatpush3.bf16.msra.mxu1 %v7672_v26  ;;  %7643 = vmatprep.subr.bf16.mxu0 %v7642_v27  ;;  %v3511_v26 = vld [vmem:[#allocation5 + $0xf0] sm:$0xff]  ;;  %v3512_v27 = vld [vmem:[#allocation5 + $0xf8] sm:$0xff]  ;;  %v3586_v1 = vld [vmem:[#allocation5 + $0x348] sm:$0xff] }
 0xede   :  { %7675 = vmatprep.subr.bf16.mxu1 %v7674_v32  ;;  %v3543_v32 = vld [vmem:[#allocation5 + $0x1f0] sm:$0xff]  ;;  %v2380_v50 = vadd.f32 %v8968_v10, %v2156_v34  ;;  %v3596_v10 = vld [vmem:[#allocation5 + $0x398] sm:$0xff]  ;;  %v3582_v34 = vld [vmem:[#allocation5 + $0x328] sm:$0xff] }
 0xedf   :  { %v7734_v22 = vpack.c.bf16 %v3596_v10, %v3595_v5 }
 0xee0   :  { %7645 = vmatpush3.bf16.msra.mxu0 %v7644_v4  ;;  %v7692_v4 = vpack.c.bf16 %v3526_v25, %v3525_v18  ;;  %v3597_v18 = vld [vmem:[#allocation5 + $0x3a0] sm:$0xff] }
 0xee1   :  { %7677 = vmatpush3.bf16.msra.mxu1 %v7676_v36  ;;  %7647 = vmatprep.subr.bf16.mxu0 %v7646_v37  ;;  %v7662_v36 = vpack.c.bf16 %v3512_v27, %v3511_v26  ;;  %v3495_v37 = vld [vmem:[#allocation5 + $0x70] sm:$0xff]  ;;  %v7704_v26 = vpack.c.bf16 %v3548_v7, %v3547_v6 }
 0xee2   :  { %7679 = vmatprep.subr.bf16.mxu1 %v7678_v43  ;;  %v7694_v43 = vpack.c.bf16 %v3544_v33, %v3543_v32  ;;  %v3549_v32 = vld [vmem:[#allocation5 + $0x220] sm:$0xff]  ;;  %v3550_v33 = vld [vmem:[#allocation5 + $0x228] sm:$0xff]  ;;  %v3587_v6 = vld [vmem:[#allocation5 + $0x350] sm:$0xff] }
 0xee3   :  { %v7708_v41 = vpack.c.bf16 %v3550_v33, %v3549_v32  ;;  %v3590_v33 = vld [vmem:[#allocation5 + $0x368] sm:$0xff] }
 0xee4   :  { %7649 = vmatpush3.bf16.msra.mxu0 %v7648_v47  ;;  %v3594_v47 = vld [vmem:[#allocation5 + $0x388] sm:$0xff] }
 0xee5   :  { %7681 = vmatpush3.bf16.msra.mxu1 %v7680_v48  ;;  %7651 = vmatprep.subr.bf16.mxu0 %v7650_v49  ;;  %v2184_v48 = vrot.slane %v8975_v38, %v9000_v9  ;;  %v7664_v49 = vpack.c.bf16 %v3496_v40, %v3495_v37  ;;  %v7730_v56 = vpack.c.bf16 %v3594_v47, %v3593_v46  ;;  %v3599_v37 = vld [vmem:[#allocation5 + $0x3b0] sm:$0xff]  ;;  %v3600_v40 = vld [vmem:[#allocation5 + $0x3b8] sm:$0xff]  ;;  %v3569_v47 = vld [vmem:[#allocation5 + $0x2c0] sm:$0xff] }
 0xee6   :  { %7683 = vmatprep.subr.bf16.mxu1 %v7682_v53  ;;  %v3545_v53 = vld [vmem:[#allocation5 + $0x200] sm:$0xff]  ;;  %v3584_v46 = vld [vmem:[#allocation5 + $0x338] sm:$0xff] }
 0xee7   :  { %v7700_v2 = vpack.c.bf16 %v3546_v54, %v3545_v53  ;;  %v3553_v54 = vld [vmem:[#allocation5 + $0x240] sm:$0xff] }
 0xee8   :  { %7653 = vmatpush3.bf16.msra.mxu0 %v7652_v59 }
 0xee9   :  { %7685 = vmatpush3.bf16.msra.mxu1 %v7684_v60  ;;  %7655 = vmatprep.subr.bf16.mxu0 %v7654_v61  ;;  %v3563_v60 = vld [vmem:[#allocation5 + $0x290] sm:$0xff]  ;;  %v3564_v61 = vld [vmem:[#allocation5 + $0x298] sm:$0xff] }
 0xeea   :  { %v8992_v20 = vpop.f32.mrb[26].mxu0  ;;  %7687 = vmatprep.subr.bf16.mxu1 %v7686_v62  ;;  %v3449_v62 = vmax.f32 %v2380_v50, 0.0  ;;  %v7702_v12 = vpack.c.bf16 %v3564_v61, %v3563_v60  ;;  %v3602_v50 = vld [vmem:[#allocation5 + $0x3c8] sm:$0xff]  ;;  %v3572_v60 = vld [vmem:[#allocation5 + $0x2d8] sm:$0xff]  ;;  %v3603_v61 = vld [vmem:[#allocation5 + $0x3d0] sm:$0xff] }
 0xeeb   :  { %v2523_v30 = vpop.f32.mrb[27].mxu0  ;;  %v8997_v31 = vpop.f32.mrb[26].mxu1 }
 0xeec   :  { %7657 = vmatpush3.bf16.msra.mxu0 %v7656_v13  ;;  %v2594_v15 = vpop.f32.mrb[27].mxu1  ;;  %v2524_v59 = vadd.f32 %v2523_v30, %v2176_v45  ;;  %v3580_v13 = vld [vmem:[#allocation5 + $0x318] sm:$0xff]  ;;  %v7742_v45 = vpack.c.bf16 %v3600_v40, %v3599_v37  ;;  %v9022_v40 = vld [vmem:[#allocation12 + $0x8] sm:$0xff] }
 0xeed   :  { %7689 = vmatpush3.bf16.msra.mxu1 %v7688_v16  ;;  %7659 = vmatprep.subr.bf16.mxu0 %v7658_v17  ;;  %v2595_v63 = vadd.f32 %v2594_v15, %v2184_v48  ;;  %v3565_v16 = vld [vmem:[#allocation5 + $0x2a0] sm:$0xff]  ;;  %v3566_v17 = vld [vmem:[#allocation5 + $0x2a8] sm:$0xff]  ;;  %v7736_v27 = vpack.c.bf16 %v3580_v13, %v3579_v11  ;;  %v3588_v11 = vld [vmem:[#allocation5 + $0x358] sm:$0xff] }
 0xeee   :  { %7691 = vmatprep.subr.bf16.mxu1 %v7690_v24  ;;  %v3454_v0 = vmax.f32 %v2524_v59, 0.0  ;;  %v3598_v24 = vld [vmem:[#allocation5 + $0x3a8] sm:$0xff]  ;;  %v7706_v30 = vpack.c.bf16 %v3566_v17, %v3565_v16  ;;  %v3581_v15 = vld [vmem:[#allocation5 + $0x320] sm:$0xff]  ;;  %v3571_v59 = vld [vmem:[#allocation5 + $0x2d0] sm:$0xff] }
 0xeef   :  { %v3456_v25 = vmax.f32 %v2595_v63, 0.0  ;;  %v7740_v42 = vpack.c.bf16 %v3582_v34, %v3581_v15  ;;  %v3570_v48 = vld [vmem:[#allocation5 + $0x2c8] sm:$0xff]  ;;  %v3604_v63 = vld [vmem:[#allocation5 + $0x3d8] sm:$0xff]  ;;  %v7718_v10 = vpack.c.bf16 %v3572_v60, %v3571_v59  ;;  %v3605_v13 = vld [vmem:[#allocation5 + $0x3e0] sm:$0xff] }
 0xef0   :  { %7661 = vmatpush3.bf16.msra.mxu0 %v7660_v21  ;;  %v7738_v21 = vpack.c.bf16 %v3598_v24, %v3597_v18  ;;  %v7714_v53 = vpack.c.bf16 %v3570_v48, %v3569_v47  ;;  %v7750_v7 = vpack.c.bf16 %v3604_v63, %v3603_v61  ;;  %v3606_v16 = vld [vmem:[#allocation5 + $0x3e8] sm:$0xff]  ;;  %v3557_v24 = vld [vmem:[#allocation5 + $0x260] sm:$0xff]  ;;  %v3575_v15 = vld [vmem:[#allocation5 + $0x2f0] sm:$0xff] }
 0xef1   :  { %7693 = vmatpush3.bf16.msra.mxu1 %v7692_v4  ;;  %7663 = vmatprep.subr.bf16.mxu0 %v7662_v36  ;;  %v3567_v4 = vld [vmem:[#allocation5 + $0x2b0] sm:$0xff]  ;;  %v3568_v36 = vld [vmem:[#allocation5 + $0x2b8] sm:$0xff]  ;;  %v7754_v32 = vpack.c.bf16 %v3606_v16, %v3605_v13  ;;  %v3610_v59 = vld [vmem:[#allocation5 + $0x408] sm:$0xff] }
 0xef2   :  { %7695 = vmatprep.subr.bf16.mxu1 %v7694_v43  ;;  %v7710_v43 = vpack.c.bf16 %v3568_v36, %v3567_v4  ;;  %v3607_v36 = vld [vmem:[#allocation5 + $0x3f0] sm:$0xff]  ;;  %v3608_v37 = vld [vmem:[#allocation5 + $0x3f8] sm:$0xff]  ;;  %v3641_v63 = vld [vmem:[#allocation5 + $0x500] sm:$0xff] }
 0xef3   :  { %v7758_v47 = vpack.c.bf16 %v3608_v37, %v3607_v36  ;;  %v3592_v48 = vld [vmem:[#allocation5 + $0x378] sm:$0xff]  ;;  %v3643_v16 = vld [vmem:[#allocation5 + $0x510] sm:$0xff]  ;;  %v3613_v37 = vld [vmem:[#allocation5 + $0x420] sm:$0xff] }
 0xef4   :  { %7665 = vmatpush3.bf16.msra.mxu0 %v7664_v49  ;;  %v3601_v49 = vld [vmem:[#allocation5 + $0x3c0] sm:$0xff]  ;;  %v3612_v13 = vld [vmem:[#allocation5 + $0x418] sm:$0xff] }
 0xef5   :  { %7697 = vmatpush3.bf16.msra.mxu1 %v7696_v51  ;;  %7699 = vmatprep.subr.bf16.mxu0 %v7698_v52  ;;  %v7712_v51 = vpack.c.bf16 %v3552_v58, %v3551_v44  ;;  %v7744_v52 = vpack.c.bf16 %v3584_v46, %v3583_v8  ;;  %v7746_v57 = vpack.c.bf16 %v3602_v50, %v3601_v49  ;;  %v3559_v58 = vld [vmem:[#allocation5 + $0x270] sm:$0xff]  ;;  %v3560_v8 = vld [vmem:[#allocation5 + $0x278] sm:$0xff]  ;;  %v3625_v49 = vld [vmem:[#allocation5 + $0x480] sm:$0xff] }
 0xef6   :  { %7731 = vmatprep.subr.bf16.mxu1 %v7730_v56  ;;  %v3585_v56 = vld [vmem:[#allocation5 + $0x340] sm:$0xff]  ;;  %v3626_v50 = vld [vmem:[#allocation5 + $0x488] sm:$0xff] }
 0xef7   :  { %4065 = vmatmul.mubr.f32.vlgmr.msra.gmra.mrb[40].mxu0 %v3449_v62  ;;  %v7748_v5 = vpack.c.bf16 %v3586_v1, %v3585_v56  ;;  %v3555_v62 = vld [vmem:[#allocation5 + $0x250] sm:$0xff]  ;;  %v3609_v1 = vld [vmem:[#allocation5 + $0x400] sm:$0xff] }
 0xef8   :  { %4135 = vmatmul.mubr.f32.vlgmr.msra.gmra.mrb[40].mxu1 %v3451_v35  ;;  %7701 = vmatpush3.bf16.msra.mxu0 %v7700_v2  ;;  %v7716_v2 = vpack.c.bf16 %v3554_v55, %v3553_v54  ;;  %v3573_v35 = vld [vmem:[#allocation5 + $0x2e0] sm:$0xff]  ;;  %v2200_v54 = vrot.slane %v9022_v40, %v8978_v39  ;;  %v7728_v55 = vpack.c.bf16 %v3560_v8, %v3559_v58  ;;  %v3632_v58 = vld [vmem:[#allocation5 + $0x4b8] sm:$0xff]  ;;  %v3663_v8 = vld [vmem:[#allocation5 + $0x5b0] sm:$0xff] }
 0xef9   :  { %4204 = vmatprep.mubr.f32.mxu0 %v3454_v0  ;;  %7733 = vmatpush3.bf16.msra.mxu1 %v7732_v3  ;;  %v3556_v3 = vld [vmem:[#allocation5 + $0x258] sm:$0xff]  ;;  %v9013_v0 = vsub.s32 4, %v8966_v23 }
 0xefa   :  { %4274 = vmatprep.mubr.f32.mxu1 %v3456_v25  ;;  %7703 = vmatprep.subr.bf16.mxu0 %v7702_v12  ;;  %v3574_v12 = vld [vmem:[#allocation5 + $0x2e8] sm:$0xff]  ;;  %v7720_v17 = vpack.c.bf16 %v3556_v3, %v3555_v62  ;;  %v3628_v62 = vld [vmem:[#allocation5 + $0x498] sm:$0xff] }
 0xefb   :  { %7735 = vmatprep.subr.bf16.mxu1 %v7734_v22  ;;  %v7752_v22 = vpack.c.bf16 %v3588_v11, %v3587_v6  ;;  %v7722_v18 = vpack.c.bf16 %v3574_v12, %v3573_v35  ;;  %v3558_v25 = vld [vmem:[#allocation5 + $0x268] sm:$0xff]  ;;  %v7764_v6 = vpack.c.bf16 %v3610_v59, %v3609_v1  ;;  %v3611_v12 = vld [vmem:[#allocation5 + $0x410] sm:$0xff] }
 0xefc   :  { %7705 = vmatpush3.bf16.msra.mxu0 %v7704_v26  ;;  %v3589_v26 = vld [vmem:[#allocation5 + $0x360] sm:$0xff] }
 0xefd   :  { %7737 = vmatpush3.bf16.msra.mxu1 %v7736_v27  ;;  %7707 = vmatprep.subr.bf16.mxu0 %v7706_v30  ;;  %v9016_v27 = vsub.s32 6, %v8966_v23  ;;  %v2172_v23 = vrot.slane %v8975_v38, %v9013_v0 }
 0xefe   :  { %7739 = vmatprep.subr.bf16.mxu1 %v7738_v21  ;;  %v3576_v21 = vld [vmem:[#allocation5 + $0x2f8] sm:$0xff] }
 0xeff   :  { %v7726_v44 = vpack.c.bf16 %v3576_v21, %v3575_v15  ;;  %v2180_v46 = vrot.slane %v8975_v38, %v9016_v27  ;;  %v2522_v56 = vadd.f32 %v8992_v20, %v2172_v23  ;;  %v3660_v20 = vld [vmem:[#allocation5 + $0x598] sm:$0xff]  ;;  %v7768_v21 = vpack.c.bf16 %v3612_v13, %v3611_v12  ;;  %v3651_v13 = vld [vmem:[#allocation5 + $0x550] sm:$0xff] }
 0xf00   :  { %7709 = vmatpush3.bf16.msra.mxu0 %v7708_v41  ;;  %v3620_v12 = vld [vmem:[#allocation5 + $0x458] sm:$0xff] }
 0xf01   :  { %7741 = vmatpush3.bf16.msra.mxu1 %v7740_v42  ;;  %7711 = vmatprep.subr.bf16.mxu0 %v7710_v43  ;;  %v7724_v42 = vpack.c.bf16 %v3558_v25, %v3557_v24  ;;  %v7756_v43 = vpack.c.bf16 %v3590_v33, %v3589_v26  ;;  %v2593_v60 = vadd.f32 %v8997_v31, %v2180_v46  ;;  %v3453_v11 = vmax.f32 %v2522_v56, 0.0  ;;  %v3630_v24 = vld [vmem:[#allocation5 + $0x4a8] sm:$0xff]  ;;  %v3665_v56 = vld [vmem:[#allocation5 + $0x5c0] sm:$0xff] }
 0xf02   :  { %7743 = vmatprep.subr.bf16.mxu1 %v7742_v45  ;;  %v3591_v45 = vld [vmem:[#allocation5 + $0x370] sm:$0xff]  ;;  %v3662_v33 = vld [vmem:[#allocation5 + $0x5a8] sm:$0xff] }
 0xf03   :  { %v7760_v38 = vpack.c.bf16 %v3592_v48, %v3591_v45  ;;  %v3455_v31 = vmax.f32 %v2593_v60, 0.0  ;;  %v3664_v45 = vld [vmem:[#allocation5 + $0x5b8] sm:$0xff]  ;;  %v3617_v60 = vld [vmem:[#allocation5 + $0x440] sm:$0xff] }
 0xf04   :  { %7713 = vmatpush3.bf16.msra.mxu0 %v7712_v51  ;;  %v2192_v51 = vrot.slane %v9022_v40, %v8971_v28 }
 0xf05   :  { %7745 = vmatpush3.bf16.msra.mxu1 %v7744_v52  ;;  %7715 = vmatprep.subr.bf16.mxu0 %v7714_v53  ;;  %v3657_v52 = vld [vmem:[#allocation5 + $0x580] sm:$0xff]  ;;  %v3658_v53 = vld [vmem:[#allocation5 + $0x588] sm:$0xff] }
 0xf06   :  { %7747 = vmatprep.subr.bf16.mxu1 %v7746_v57  ;;  %v7762_v57 = vpack.c.bf16 %v3626_v50, %v3625_v49  ;;  %v7794_v61 = vpack.c.bf16 %v3658_v53, %v3657_v52  ;;  %v3615_v49 = vld [vmem:[#allocation5 + $0x430] sm:$0xff]  ;;  %v3616_v50 = vld [vmem:[#allocation5 + $0x438] sm:$0xff]  ;;  %v7806_v52 = vpack.c.bf16 %v3664_v45, %v3663_v8 }
 0xf07   :  { %v3648_v53 = vld [vmem:[#allocation5 + $0x538] sm:$0xff] }
 0xf08   :  { %7717 = vmatpush3.bf16.msra.mxu0 %v7716_v2  ;;  %v3642_v2 = vld [vmem:[#allocation5 + $0x508] sm:$0xff] }
 0xf09   :  { %7749 = vmatpush3.bf16.msra.mxu1 %v7748_v5  ;;  %7719 = vmatprep.subr.bf16.mxu0 %v7718_v10  ;;  %v3627_v10 = vld [vmem:[#allocation5 + $0x490] sm:$0xff]  ;;  %v7796_v35 = vpack.c.bf16 %v3642_v2, %v3641_v63  ;;  %v3649_v63 = vld [vmem:[#allocation5 + $0x540] sm:$0xff] }
 0xf0a   :  { %v9018_v30 = vpop.f32.mrb[28].mxu0  ;;  %7751 = vmatprep.subr.bf16.mxu1 %v7750_v7  ;;  %v3659_v7 = vld [vmem:[#allocation5 + $0x590] sm:$0xff] }
 0xf0b   :  { %v2665_v34 = vpop.f32.mrb[29].mxu0  ;;  %v9020_v4 = vpop.f32.mrb[28].mxu1  ;;  %v7798_v26 = vpack.c.bf16 %v3660_v20, %v3659_v7 }
 0xf0c   :  { %7721 = vmatpush3.bf16.msra.mxu0 %v7720_v17  ;;  %v2736_v41 = vpop.f32.mrb[29].mxu1  ;;  %v2666_v5 = vadd.f32 %v2665_v34, %v2192_v51  ;;  %v7766_v17 = vpack.c.bf16 %v3628_v62, %v3627_v10  ;;  %v3647_v51 = vld [vmem:[#allocation5 + $0x530] sm:$0xff]  ;;  %v3636_v62 = vld [vmem:[#allocation5 + $0x4d8] sm:$0xff] }
 0xf0d   :  { %7753 = vmatpush3.bf16.msra.mxu1 %v7752_v22  ;;  %7723 = vmatprep.subr.bf16.mxu0 %v7722_v18  ;;  %v2737_v3 = vadd.f32 %v2736_v41, %v2200_v54  ;;  %v3644_v22 = vld [vmem:[#allocation5 + $0x518] sm:$0xff]  ;;  %v3629_v18 = vld [vmem:[#allocation5 + $0x4a0] sm:$0xff]  ;;  %v3614_v41 = vld [vmem:[#allocation5 + $0x428] sm:$0xff]  ;;  %v7808_v1 = vpack.c.bf16 %v3648_v53, %v3647_v51 }
 0xf0e   :  { %7755 = vmatprep.subr.bf16.mxu1 %v7754_v32  ;;  %v3458_v25 = vmax.f32 %v2666_v5, 0.0  ;;  %v3661_v32 = vld [vmem:[#allocation5 + $0x5a0] sm:$0xff]  ;;  %v7800_v34 = vpack.c.bf16 %v3644_v22, %v3643_v16  ;;  %v7770_v36 = vpack.c.bf16 %v3630_v24, %v3629_v18  ;;  %v7772_v46 = vpack.c.bf16 %v3614_v41, %v3613_v37  ;;  %v3650_v5 = vld [vmem:[#allocation5 + $0x548] sm:$0xff]  ;;  %v3635_v10 = vld [vmem:[#allocation5 + $0x4d0] sm:$0xff] }
 0xf0f   :  { %v3460_v15 = vmax.f32 %v2737_v3, 0.0  ;;  %v7802_v23 = vpack.c.bf16 %v3662_v33, %v3661_v32  ;;  %v3633_v54 = vld [vmem:[#allocation5 + $0x4c0] sm:$0xff]  ;;  %v3667_v3 = vld [vmem:[#allocation5 + $0x5d0] sm:$0xff]  ;;  %v7812_v20 = vpack.c.bf16 %v3650_v5, %v3649_v63  ;;  %v3638_v22 = vld [vmem:[#allocation5 + $0x4e8] sm:$0xff] }
 0xf10   :  { %7725 = vmatpush3.bf16.msra.mxu0 %v7724_v42  ;;  %v3645_v42 = vld [vmem:[#allocation5 + $0x520] sm:$0xff]  ;;  %v3670_v24 = vld [vmem:[#allocation5 + $0x5e8] sm:$0xff]  ;;  %v3639_v41 = vld [vmem:[#allocation5 + $0x4f0] sm:$0xff] }
 0xf11   :  { %7757 = vmatpush3.bf16.msra.mxu1 %v7756_v43  ;;  %7727 = vmatprep.subr.bf16.mxu0 %v7726_v44  ;;  %v3646_v43 = vld [vmem:[#allocation5 + $0x528] sm:$0xff]  ;;  %v3631_v44 = vld [vmem:[#allocation5 + $0x4b0] sm:$0xff]  ;;  %v3669_v18 = vld [vmem:[#allocation5 + $0x5e0] sm:$0xff] }
 0xf12   :  { %7759 = vmatprep.subr.bf16.mxu1 %v7758_v47  ;;  %v7804_v47 = vpack.c.bf16 %v3646_v43, %v3645_v42  ;;  %v7774_v48 = vpack.c.bf16 %v3632_v58, %v3631_v44  ;;  %v3621_v33 = vld [vmem:[#allocation5 + $0x460] sm:$0xff]  ;;  %v3654_v37 = vld [vmem:[#allocation5 + $0x568] sm:$0xff]  ;;  %v3640_v42 = vld [vmem:[#allocation5 + $0x4f8] sm:$0xff] }
 0xf13   :  { %v3671_v44 = vld [vmem:[#allocation5 + $0x5f0] sm:$0xff]  ;;  %v3672_v58 = vld [vmem:[#allocation5 + $0x5f8] sm:$0xff]  ;;  %v3673_v5 = vld [vmem:[#allocation5 + $0x600] sm:$0xff] }
 0xf14   :  { %7729 = vmatpush3.bf16.msra.mxu0 %v7728_v55  ;;  %v3634_v55 = vld [vmem:[#allocation5 + $0x4c8] sm:$0xff]  ;;  %v3655_v51 = vld [vmem:[#allocation5 + $0x570] sm:$0xff]  ;;  %v7822_v53 = vpack.c.bf16 %v3672_v58, %v3671_v44  ;;  %v3677_v58 = vld [vmem:[#allocation5 + $0x620] sm:$0xff] }
 0xf15   :  { %7761 = vmatpush3.bf16.msra.mxu1 %v7760_v38  ;;  %7763 = vmatprep.subr.bf16.mxu0 %v7762_v57  ;;  %v3666_v38 = vld [vmem:[#allocation5 + $0x5c8] sm:$0xff]  ;;  %v7776_v57 = vpack.c.bf16 %v3616_v50, %v3615_v49  ;;  %v7778_v59 = vpack.c.bf16 %v3634_v55, %v3633_v54  ;;  %v3623_v49 = vld [vmem:[#allocation5 + $0x470] sm:$0xff]  ;;  %v3624_v50 = vld [vmem:[#allocation5 + $0x478] sm:$0xff] }
 0xf16   :  { %7795 = vmatprep.subr.bf16.mxu1 %v7794_v61  ;;  %v3618_v61 = vld [vmem:[#allocation5 + $0x448] sm:$0xff]  ;;  %v7810_v2 = vpack.c.bf16 %v3666_v38, %v3665_v56  ;;  %v3656_v54 = vld [vmem:[#allocation5 + $0x578] sm:$0xff]  ;;  %v3689_v55 = vld [vmem:[#allocation5 + $0x680] sm:$0xff]  ;;  %v2208_v38 = vrot.slane %v9022_v40, %v8995_v29 }
 0xf17   :  { %4205 = vmatmul.mubr.f32.vlgmr.msra.gmra.mrb[42].mxu0 %v3453_v11  ;;  %v7780_v7 = vpack.c.bf16 %v3618_v61, %v3617_v60  ;;  %v7782_v11 = vpack.c.bf16 %v3636_v62, %v3635_v10  ;;  %v3690_v56 = vld [vmem:[#allocation5 + $0x688] sm:$0xff]  ;;  %v7792_v60 = vpack.c.bf16 %v3624_v50, %v3623_v49  ;;  %v7824_v63 = vpack.c.bf16 %v3656_v54, %v3655_v51  ;;  %v3696_v49 = vld [vmem:[#allocation5 + $0x6b8] sm:$0xff]  ;;  %v3727_v50 = vld [vmem:[#allocation5 + $0x7b0] sm:$0xff] }
 0xf18   :  { %4275 = vmatmul.mubr.f32.vlgmr.msra.gmra.mrb[42].mxu1 %v3455_v31  ;;  %7765 = vmatpush3.bf16.msra.mxu0 %v7764_v6  ;;  %v3668_v6 = vld [vmem:[#allocation5 + $0x5d8] sm:$0xff]  ;;  %v3674_v10 = vld [vmem:[#allocation5 + $0x608] sm:$0xff] }
 0xf19   :  { %4344 = vmatprep.mubr.f32.mxu0 %v3458_v25  ;;  %7797 = vmatpush3.bf16.msra.mxu1 %v7796_v35  ;;  %v3619_v35 = vld [vmem:[#allocation5 + $0x450] sm:$0xff]  ;;  %v7814_v16 = vpack.c.bf16 %v3668_v6, %v3667_v3  ;;  %v3652_v31 = vld [vmem:[#allocation5 + $0x558] sm:$0xff]  ;;  %v3705_v6 = vld [vmem:[#allocation5 + $0x700] sm:$0xff] }
 0xf1a   :  { %4414 = vmatprep.mubr.f32.mxu1 %v3460_v15  ;;  %7767 = vmatprep.subr.bf16.mxu0 %v7766_v17  ;;  %v3637_v17 = vld [vmem:[#allocation5 + $0x4e0] sm:$0xff]  ;;  %v7784_v25 = vpack.c.bf16 %v3620_v12, %v3619_v35  ;;  %v3622_v15 = vld [vmem:[#allocation5 + $0x468] sm:$0xff]  ;;  %v3692_v35 = vld [vmem:[#allocation5 + $0x698] sm:$0xff] }
 0xf1b   :  { %7799 = vmatprep.subr.bf16.mxu1 %v7798_v26  ;;  %v7816_v26 = vpack.c.bf16 %v3652_v31, %v3651_v13  ;;  %v7786_v32 = vpack.c.bf16 %v3638_v22, %v3637_v17  ;;  %v7788_v45 = vpack.c.bf16 %v3622_v15, %v3621_v33  ;;  %v7828_v13 = vpack.c.bf16 %v3674_v10, %v3673_v5  ;;  %v3675_v22 = vld [vmem:[#allocation5 + $0x610] sm:$0xff]  ;;  %v3694_v33 = vld [vmem:[#allocation5 + $0x6a8] sm:$0xff]  ;;  %v3728_v51 = vld [vmem:[#allocation5 + $0x7b8] sm:$0xff] }
 0xf1c   :  { %7769 = vmatpush3.bf16.msra.mxu0 %v7768_v21  ;;  %v3653_v21 = vld [vmem:[#allocation5 + $0x560] sm:$0xff] }
 0xf1d   :  { %7801 = vmatpush3.bf16.msra.mxu1 %v7800_v34  ;;  %7771 = vmatprep.subr.bf16.mxu0 %v7770_v36  ;;  %v7818_v36 = vpack.c.bf16 %v3670_v24, %v3669_v18  ;;  %v3676_v18 = vld [vmem:[#allocation5 + $0x618] sm:$0xff]  ;;  %v3707_v24 = vld [vmem:[#allocation5 + $0x710] sm:$0xff] }
 0xf1e   :  { %7803 = vmatprep.subr.bf16.mxu1 %v7802_v23 }
 0xf20   :  { %7773 = vmatpush3.bf16.msra.mxu0 %v7772_v46  ;;  %v2188_v46 = vrot.slane %v9022_v40, %v8987_v14 }
 0xf21   :  { %7805 = vmatpush3.bf16.msra.mxu1 %v7804_v47  ;;  %7775 = vmatprep.subr.bf16.mxu0 %v7774_v48  ;;  %v7820_v47 = vpack.c.bf16 %v3654_v37, %v3653_v21  ;;  %v7790_v48 = vpack.c.bf16 %v3640_v42, %v3639_v41  ;;  %v3726_v37 = vld [vmem:[#allocation5 + $0x7a8] sm:$0xff]  ;;  %v7832_v42 = vpack.c.bf16 %v3676_v18, %v3675_v22  ;;  %v3684_v22 = vld [vmem:[#allocation5 + $0x658] sm:$0xff]  ;;  %v3715_v18 = vld [vmem:[#allocation5 + $0x750] sm:$0xff] }
 0xf22   :  { %7807 = vmatprep.subr.bf16.mxu1 %v7806_v52  ;;  %v2196_v52 = vrot.slane %v9022_v40, %v8990_v19  ;;  %v2664_v61 = vadd.f32 %v9018_v30, %v2188_v46  ;;  %v3724_v30 = vld [vmem:[#allocation5 + $0x798] sm:$0xff] }
 0xf24   :  { %7777 = vmatpush3.bf16.msra.mxu0 %v7776_v57  ;;  %v3721_v57 = vld [vmem:[#allocation5 + $0x780] sm:$0xff]  ;;  %v2735_v62 = vadd.f32 %v9020_v4, %v2196_v52  ;;  %v3457_v31 = vmax.f32 %v2664_v61, 0.0 }
 0xf25   :  { %7809 = vmatpush3.bf16.msra.mxu1 %v7808_v1  ;;  %7779 = vmatprep.subr.bf16.mxu0 %v7778_v59  ;;  %v3722_v1 = vld [vmem:[#allocation5 + $0x788] sm:$0xff]  ;;  %v2216_v59 = vrot.slane %v9022_v40, %v9000_v9  ;;  %v3729_v61 = vld [vmem:[#allocation5 + $0x7c0] sm:$0xff] }
 0xf26   :  { %7811 = vmatprep.subr.bf16.mxu1 %v7810_v2  ;;  %v7826_v2 = vpack.c.bf16 %v3690_v56, %v3689_v55  ;;  %v7858_v3 = vpack.c.bf16 %v3722_v1, %v3721_v57  ;;  %v3459_v4 = vmax.f32 %v2735_v62, 0.0  ;;  %v3679_v55 = vld [vmem:[#allocation5 + $0x630] sm:$0xff]  ;;  %v3680_v56 = vld [vmem:[#allocation5 + $0x638] sm:$0xff]  ;;  %v7870_v57 = vpack.c.bf16 %v3728_v51, %v3727_v50  ;;  %v3681_v62 = vld [vmem:[#allocation5 + $0x640] sm:$0xff] }
 0xf27   :  { %v3712_v1 = vld [vmem:[#allocation5 + $0x738] sm:$0xff] }
 0xf28   :  { %7781 = vmatpush3.bf16.msra.mxu0 %v7780_v7  ;;  %v3706_v7 = vld [vmem:[#allocation5 + $0x708] sm:$0xff]  ;;  %v9052_v50 = vld [vmem:[#allocation12 + $0x10] sm:$0xff] }
 0xf29   :  { %7813 = vmatpush3.bf16.msra.mxu1 %v7812_v20  ;;  %7783 = vmatprep.subr.bf16.mxu0 %v7782_v11  ;;  %v3691_v11 = vld [vmem:[#allocation5 + $0x690] sm:$0xff]  ;;  %v7860_v17 = vpack.c.bf16 %v3706_v7, %v3705_v6  ;;  %v3713_v6 = vld [vmem:[#allocation5 + $0x740] sm:$0xff] }
 0xf2a   :  { %v9034_v34 = vpop.f32.mrb[30].mxu0  ;;  %7815 = vmatprep.subr.bf16.mxu1 %v7814_v16  ;;  %v3723_v16 = vld [vmem:[#allocation5 + $0x790] sm:$0xff] }
 0xf2b   :  { %v2807_v23 = vpop.f32.mrb[31].mxu0  ;;  %v9036_v43 = vpop.f32.mrb[30].mxu1  ;;  %v7862_v21 = vpack.c.bf16 %v3724_v30, %v3723_v16 }
 0xf2c   :  { %7785 = vmatpush3.bf16.msra.mxu0 %v7784_v25  ;;  %v2878_v8 = vpop.f32.mrb[31].mxu1  ;;  %v2808_v20 = vadd.f32 %v2807_v23, %v2208_v38  ;;  %v7830_v25 = vpack.c.bf16 %v3692_v35, %v3691_v11  ;;  %v3711_v38 = vld [vmem:[#allocation5 + $0x730] sm:$0xff]  ;;  %v3700_v35 = vld [vmem:[#allocation5 + $0x6d8] sm:$0xff] }
 0xf2d   :  { %7817 = vmatpush3.bf16.msra.mxu1 %v7816_v26  ;;  %7787 = vmatprep.subr.bf16.mxu0 %v7786_v32  ;;  %v2879_v12 = vadd.f32 %v2878_v8, %v2216_v59  ;;  %v3708_v26 = vld [vmem:[#allocation5 + $0x718] sm:$0xff]  ;;  %v3693_v32 = vld [vmem:[#allocation5 + $0x6a0] sm:$0xff]  ;;  %v3678_v8 = vld [vmem:[#allocation5 + $0x628] sm:$0xff]  ;;  %v7872_v5 = vpack.c.bf16 %v3712_v1, %v3711_v38  ;;  %v2212_v1 = vrot.slane %v9022_v40, %v9016_v27 }
 0xf2e   :  { %7819 = vmatprep.subr.bf16.mxu1 %v7818_v36  ;;  %v3462_v15 = vmax.f32 %v2808_v20, 0.0  ;;  %v3725_v36 = vld [vmem:[#allocation5 + $0x7a0] sm:$0xff]  ;;  %v7864_v23 = vpack.c.bf16 %v3708_v26, %v3707_v24  ;;  %v7834_v44 = vpack.c.bf16 %v3694_v33, %v3693_v32  ;;  %v7836_v52 = vpack.c.bf16 %v3678_v8, %v3677_v58  ;;  %v3714_v20 = vld [vmem:[#allocation5 + $0x748] sm:$0xff]  ;;  %v3699_v11 = vld [vmem:[#allocation5 + $0x6d0] sm:$0xff] }
 0xf2f   :  { %v3464_v41 = vmax.f32 %v2879_v12, 0.0  ;;  %v7866_v46 = vpack.c.bf16 %v3726_v37, %v3725_v36  ;;  %v3697_v59 = vld [vmem:[#allocation5 + $0x6c0] sm:$0xff]  ;;  %v3731_v12 = vld [vmem:[#allocation5 + $0x7d0] sm:$0xff]  ;;  %v7876_v30 = vpack.c.bf16 %v3714_v20, %v3713_v6  ;;  %v3702_v26 = vld [vmem:[#allocation5 + $0x6e8] sm:$0xff] }
 0xf30   :  { %7789 = vmatpush3.bf16.msra.mxu0 %v7788_v45  ;;  %v3709_v45 = vld [vmem:[#allocation5 + $0x720] sm:$0xff]  ;;  %v3734_v33 = vld [vmem:[#allocation5 + $0x7e8] sm:$0xff]  ;;  %v3703_v8 = vld [vmem:[#allocation5 + $0x6f0] sm:$0xff] }
 0xf31   :  { %7821 = vmatpush3.bf16.msra.mxu1 %v7820_v47  ;;  %7791 = vmatprep.subr.bf16.mxu0 %v7790_v48  ;;  %v3710_v47 = vld [vmem:[#allocation5 + $0x728] sm:$0xff]  ;;  %v3695_v48 = vld [vmem:[#allocation5 + $0x6b0] sm:$0xff]  ;;  %v3733_v32 = vld [vmem:[#allocation5 + $0x7e0] sm:$0xff] }
 0xf32   :  { %7823 = vmatprep.subr.bf16.mxu1 %v7822_v53  ;;  %v7868_v53 = vpack.c.bf16 %v3710_v47, %v3709_v45  ;;  %v7838_v54 = vpack.c.bf16 %v3696_v49, %v3695_v48  ;;  %v3685_v37 = vld [vmem:[#allocation5 + $0x660] sm:$0xff]  ;;  %v3718_v58 = vld [vmem:[#allocation5 + $0x768] sm:$0xff]  ;;  %v3704_v45 = vld [vmem:[#allocation5 + $0x6f8] sm:$0xff] }
 0xf33   :  { %v3735_v48 = vld [vmem:[#allocation5 + $0x7f0] sm:$0xff]  ;;  %v3736_v49 = vld [vmem:[#allocation5 + $0x7f8] sm:$0xff]  ;;  %v3737_v20 = vld [vmem:[#allocation5 + $0x800] sm:$0xff] }
 0xf34   :  { %7793 = vmatpush3.bf16.msra.mxu0 %v7792_v60  ;;  %v3698_v60 = vld [vmem:[#allocation5 + $0x6c8] sm:$0xff]  ;;  %v3688_v38 = vld [vmem:[#allocation5 + $0x678] sm:$0xff] }
 0xf35   :  { %7825 = vmatpush3.bf16.msra.mxu1 %v7824_v63  ;;  %7827 = vmatprep.subr.bf16.mxu0 %v7826_v2  ;;  %v3730_v63 = vld [vmem:[#allocation5 + $0x7c8] sm:$0xff]  ;;  %v7840_v2 = vpack.c.bf16 %v3680_v56, %v3679_v55  ;;  %v7842_v10 = vpack.c.bf16 %v3698_v60, %v3697_v59  ;;  %v7854_v55 = vpack.c.bf16 %v3704_v45, %v3703_v8  ;;  %v3687_v56 = vld [vmem:[#allocation5 + $0x670] sm:$0xff]  ;;  %v3720_v60 = vld [vmem:[#allocation5 + $0x778] sm:$0xff] }
 0xf36   :  { %7859 = vmatprep.subr.bf16.mxu1 %v7858_v3  ;;  %v3682_v3 = vld [vmem:[#allocation5 + $0x648] sm:$0xff]  ;;  %v7874_v7 = vpack.c.bf16 %v3730_v63, %v3729_v61  ;;  %v7886_v59 = vpack.c.bf16 %v3736_v49, %v3735_v48  ;;  %v3753_v61 = vld [vmem:[#allocation5 + $0x880] sm:$0xff] }
 0xf37   :  { %4345 = vmatmul.mubr.f32.vlgmr.msra.gmra.mrb[44].mxu0 %v3457_v31  ;;  %v7844_v16 = vpack.c.bf16 %v3682_v3, %v3681_v62  ;;  %v7846_v31 = vpack.c.bf16 %v3700_v35, %v3699_v11  ;;  %v3754_v63 = vld [vmem:[#allocation5 + $0x888] sm:$0xff]  ;;  %v2232_v62 = vrot.slane %v9052_v50, %v8978_v39  ;;  %v7856_v3 = vpack.c.bf16 %v3688_v38, %v3687_v56  ;;  %v3741_v49 = vld [vmem:[#allocation5 + $0x820] sm:$0xff]  ;;  %v3760_v56 = vld [vmem:[#allocation5 + $0x8b8] sm:$0xff] }
 0xf38   :  { %4415 = vmatmul.mubr.f32.vlgmr.msra.gmra.mrb[44].mxu1 %v3459_v4  ;;  %7829 = vmatpush3.bf16.msra.mxu0 %v7828_v13  ;;  %v3732_v13 = vld [vmem:[#allocation5 + $0x7d8] sm:$0xff]  ;;  %v3738_v11 = vld [vmem:[#allocation5 + $0x808] sm:$0xff]  ;;  %v2877_v35 = vadd.f32 %v9036_v43, %v2212_v1  ;;  %v3791_v38 = vld [vmem:[#allocation5 + $0x9b0] sm:$0xff] }
 0xf39   :  { %4484 = vmatprep.mubr.f32.mxu0 %v3462_v15  ;;  %7861 = vmatpush3.bf16.msra.mxu1 %v7860_v17  ;;  %v3683_v17 = vld [vmem:[#allocation5 + $0x650] sm:$0xff]  ;;  %v7878_v24 = vpack.c.bf16 %v3732_v13, %v3731_v12  ;;  %v3716_v4 = vld [vmem:[#allocation5 + $0x758] sm:$0xff]  ;;  %v3769_v13 = vld [vmem:[#allocation5 + $0x900] sm:$0xff] }
 0xf3a   :  { %4554 = vmatprep.mubr.f32.mxu1 %v3464_v41  ;;  %7831 = vmatprep.subr.bf16.mxu0 %v7830_v25  ;;  %v3701_v25 = vld [vmem:[#allocation5 + $0x6e0] sm:$0xff]  ;;  %v7848_v15 = vpack.c.bf16 %v3684_v22, %v3683_v17  ;;  %v3686_v41 = vld [vmem:[#allocation5 + $0x668] sm:$0xff]  ;;  %v3756_v17 = vld [vmem:[#allocation5 + $0x898] sm:$0xff]  ;;  %v3463_v43 = vmax.f32 %v2877_v35, 0.0 }
 0xf3b   :  { %7863 = vmatprep.subr.bf16.mxu1 %v7862_v21  ;;  %v7880_v21 = vpack.c.bf16 %v3716_v4, %v3715_v18  ;;  %v7850_v36 = vpack.c.bf16 %v3702_v26, %v3701_v25  ;;  %v7892_v18 = vpack.c.bf16 %v3738_v11, %v3737_v20  ;;  %v3739_v26 = vld [vmem:[#allocation5 + $0x810] sm:$0xff]  ;;  %v3745_v35 = vld [vmem:[#allocation5 + $0x840] sm:$0xff] }
 0xf3c   :  { %7833 = vmatpush3.bf16.msra.mxu0 %v7832_v42  ;;  %v3717_v42 = vld [vmem:[#allocation5 + $0x760] sm:$0xff] }
 0xf3d   :  { %7865 = vmatpush3.bf16.msra.mxu1 %v7864_v23  ;;  %7835 = vmatprep.subr.bf16.mxu0 %v7834_v44  ;;  %v7882_v44 = vpack.c.bf16 %v3734_v33, %v3733_v32  ;;  %v3740_v32 = vld [vmem:[#allocation5 + $0x818] sm:$0xff]  ;;  %v3771_v33 = vld [vmem:[#allocation5 + $0x910] sm:$0xff] }
 0xf3e   :  { %7867 = vmatprep.subr.bf16.mxu1 %v7866_v46  ;;  %v7896_v45 = vpack.c.bf16 %v3740_v32, %v3739_v26  ;;  %v3748_v26 = vld [vmem:[#allocation5 + $0x858] sm:$0xff]  ;;  %v3779_v32 = vld [vmem:[#allocation5 + $0x950] sm:$0xff] }
 0xf40   :  { %7837 = vmatpush3.bf16.msra.mxu0 %v7836_v52  ;;  %v7852_v52 = vpack.c.bf16 %v3686_v41, %v3685_v37  ;;  %v3758_v37 = vld [vmem:[#allocation5 + $0x8a8] sm:$0xff] }
 0xf41   :  { %7869 = vmatpush3.bf16.msra.mxu1 %v7868_v53  ;;  %7839 = vmatprep.subr.bf16.mxu0 %v7838_v54  ;;  %v2204_v53 = vrot.slane %v9022_v40, %v9013_v0  ;;  %v7884_v54 = vpack.c.bf16 %v3718_v58, %v3717_v42  ;;  %v3790_v58 = vld [vmem:[#allocation5 + $0x9a8] sm:$0xff] }
 0xf42   :  { %7871 = vmatprep.subr.bf16.mxu1 %v7870_v57  ;;  %v3719_v57 = vld [vmem:[#allocation5 + $0x770] sm:$0xff] }
 0xf43   :  { %v2806_v6 = vadd.f32 %v9034_v34, %v2204_v53  ;;  %v7888_v40 = vpack.c.bf16 %v3720_v60, %v3719_v57  ;;  %v3788_v34 = vld [vmem:[#allocation5 + $0x998] sm:$0xff] }
 0xf44   :  { %7841 = vmatpush3.bf16.msra.mxu0 %v7840_v2  ;;  %v2224_v2 = vrot.slane %v9052_v50, %v8971_v28  ;;  %v3792_v57 = vld [vmem:[#allocation5 + $0x9b8] sm:$0xff] }
 0xf45   :  { %7873 = vmatpush3.bf16.msra.mxu1 %v7872_v5  ;;  %7843 = vmatprep.subr.bf16.mxu0 %v7842_v10  ;;  %v3785_v5 = vld [vmem:[#allocation5 + $0x980] sm:$0xff]  ;;  %v3786_v10 = vld [vmem:[#allocation5 + $0x988] sm:$0xff]  ;;  %v3461_v4 = vmax.f32 %v2806_v6, 0.0 }
 0xf46   :  { %7875 = vmatprep.subr.bf16.mxu1 %v7874_v7  ;;  %v7890_v7 = vpack.c.bf16 %v3754_v63, %v3753_v61  ;;  %v7922_v12 = vpack.c.bf16 %v3786_v10, %v3785_v5  ;;  %v3743_v61 = vld [vmem:[#allocation5 + $0x830] sm:$0xff]  ;;  %v3744_v63 = vld [vmem:[#allocation5 + $0x838] sm:$0xff]  ;;  %v7934_v5 = vpack.c.bf16 %v3792_v57, %v3791_v38  ;;  %v3793_v6 = vld [vmem:[#allocation5 + $0x9c0] sm:$0xff] }
 0xf47   :  { %v3776_v10 = vld [vmem:[#allocation5 + $0x938] sm:$0xff] }
 0xf48   :  { %7845 = vmatpush3.bf16.msra.mxu0 %v7844_v16  ;;  %v3770_v16 = vld [vmem:[#allocation5 + $0x908] sm:$0xff] }
 0xf49   :  { %7877 = vmatpush3.bf16.msra.mxu1 %v7876_v30  ;;  %7847 = vmatprep.subr.bf16.mxu0 %v7846_v31  ;;  %v3755_v31 = vld [vmem:[#allocation5 + $0x890] sm:$0xff]  ;;  %v7924_v25 = vpack.c.bf16 %v3770_v16, %v3769_v13  ;;  %v3777_v13 = vld [vmem:[#allocation5 + $0x940] sm:$0xff] }
 0xf4a   :  { %v9048_v23 = vpop.f32.mrb[32].mxu0  ;;  %7879 = vmatprep.subr.bf16.mxu1 %v7878_v24  ;;  %v3787_v24 = vld [vmem:[#allocation5 + $0x990] sm:$0xff] }
 0xf4b   :  { %v2949_v46 = vpop.f32.mrb[33].mxu0  ;;  %v9050_v47 = vpop.f32.mrb[32].mxu1  ;;  %v7926_v42 = vpack.c.bf16 %v3788_v34, %v3787_v24 }
 0xf4c   :  { %7849 = vmatpush3.bf16.msra.mxu0 %v7848_v15  ;;  %v3020_v51 = vpop.f32.mrb[33].mxu1  ;;  %v2950_v30 = vadd.f32 %v2949_v46, %v2224_v2  ;;  %v7894_v15 = vpack.c.bf16 %v3756_v17, %v3755_v31  ;;  %v3775_v2 = vld [vmem:[#allocation5 + $0x930] sm:$0xff]  ;;  %v3764_v17 = vld [vmem:[#allocation5 + $0x8d8] sm:$0xff] }
 0xf4d   :  { %7881 = vmatpush3.bf16.msra.mxu1 %v7880_v21  ;;  %7851 = vmatprep.subr.bf16.mxu0 %v7850_v36  ;;  %v3021_v22 = vadd.f32 %v3020_v51, %v2232_v62  ;;  %v3772_v21 = vld [vmem:[#allocation5 + $0x918] sm:$0xff]  ;;  %v3757_v36 = vld [vmem:[#allocation5 + $0x8a0] sm:$0xff]  ;;  %v3742_v51 = vld [vmem:[#allocation5 + $0x828] sm:$0xff]  ;;  %v7936_v20 = vpack.c.bf16 %v3776_v10, %v3775_v2 }
 0xf4e   :  { %7883 = vmatprep.subr.bf16.mxu1 %v7882_v44  ;;  %v3466_v41 = vmax.f32 %v2950_v30, 0.0  ;;  %v3789_v44 = vld [vmem:[#allocation5 + $0x9a0] sm:$0xff]  ;;  %v7928_v46 = vpack.c.bf16 %v3772_v21, %v3771_v33  ;;  %v7898_v48 = vpack.c.bf16 %v3758_v37, %v3757_v36  ;;  %v7900_v1 = vpack.c.bf16 %v3742_v51, %v3741_v49  ;;  %v3778_v30 = vld [vmem:[#allocation5 + $0x948] sm:$0xff]  ;;  %v3763_v31 = vld [vmem:[#allocation5 + $0x8d0] sm:$0xff] }
 0xf4f   :  { %v3468_v8 = vmax.f32 %v3021_v22, 0.0  ;;  %v7930_v53 = vpack.c.bf16 %v3790_v58, %v3789_v44  ;;  %v3761_v62 = vld [vmem:[#allocation5 + $0x8c0] sm:$0xff]  ;;  %v3795_v22 = vld [vmem:[#allocation5 + $0x9d0] sm:$0xff]  ;;  %v7940_v34 = vpack.c.bf16 %v3778_v30, %v3777_v13  ;;  %v3766_v21 = vld [vmem:[#allocation5 + $0x8e8] sm:$0xff] }
 0xf50   :  { %7853 = vmatpush3.bf16.msra.mxu0 %v7852_v52  ;;  %v3773_v52 = vld [vmem:[#allocation5 + $0x920] sm:$0xff]  ;;  %v3798_v37 = vld [vmem:[#allocation5 + $0x9e8] sm:$0xff]  ;;  %v3767_v51 = vld [vmem:[#allocation5 + $0x8f0] sm:$0xff] }
 0xf51   :  { %7885 = vmatpush3.bf16.msra.mxu1 %v7884_v54  ;;  %7855 = vmatprep.subr.bf16.mxu0 %v7854_v55  ;;  %v3774_v54 = vld [vmem:[#allocation5 + $0x928] sm:$0xff]  ;;  %v3759_v55 = vld [vmem:[#allocation5 + $0x8b0] sm:$0xff]  ;;  %v3797_v36 = vld [vmem:[#allocation5 + $0x9e0] sm:$0xff] }
 0xf52   :  { %7887 = vmatprep.subr.bf16.mxu1 %v7886_v59  ;;  %v7932_v59 = vpack.c.bf16 %v3774_v54, %v3773_v52  ;;  %v7902_v60 = vpack.c.bf16 %v3760_v56, %v3759_v55  ;;  %v3749_v58 = vld [vmem:[#allocation5 + $0x860] sm:$0xff]  ;;  %v3782_v49 = vld [vmem:[#allocation5 + $0x968] sm:$0xff]  ;;  %v3768_v52 = vld [vmem:[#allocation5 + $0x8f8] sm:$0xff] }
 0xf53   :  { %v3799_v55 = vld [vmem:[#allocation5 + $0x9f0] sm:$0xff]  ;;  %v3800_v56 = vld [vmem:[#allocation5 + $0x9f8] sm:$0xff]  ;;  %v3801_v30 = vld [vmem:[#allocation5 + $0xa00] sm:$0xff] }
 0xf54   :  { %7857 = vmatpush3.bf16.msra.mxu0 %v7856_v3  ;;  %v3762_v3 = vld [vmem:[#allocation5 + $0x8c8] sm:$0xff]  ;;  %v3783_v2 = vld [vmem:[#allocation5 + $0x970] sm:$0xff]  ;;  %v7950_v10 = vpack.c.bf16 %v3800_v56, %v3799_v55  ;;  %v3805_v56 = vld [vmem:[#allocation5 + $0xa20] sm:$0xff] }
 0xf55   :  { %7889 = vmatpush3.bf16.msra.mxu1 %v7888_v40  ;;  %7891 = vmatprep.subr.bf16.mxu0 %v7890_v7  ;;  %v3794_v40 = vld [vmem:[#allocation5 + $0x9c8] sm:$0xff]  ;;  %v7904_v7 = vpack.c.bf16 %v3744_v63, %v3743_v61  ;;  %v7906_v11 = vpack.c.bf16 %v3762_v3, %v3761_v62  ;;  %v3751_v61 = vld [vmem:[#allocation5 + $0x870] sm:$0xff]  ;;  %v3752_v63 = vld [vmem:[#allocation5 + $0x878] sm:$0xff] }
 0xf56   :  { %7923 = vmatprep.subr.bf16.mxu1 %v7922_v12  ;;  %v3746_v12 = vld [vmem:[#allocation5 + $0x848] sm:$0xff]  ;;  %v7938_v16 = vpack.c.bf16 %v3794_v40, %v3793_v6  ;;  %v3784_v62 = vld [vmem:[#allocation5 + $0x978] sm:$0xff]  ;;  %v3817_v3 = vld [vmem:[#allocation5 + $0xa80] sm:$0xff]  ;;  %v2240_v40 = vrot.slane %v9052_v50, %v8995_v29 }
 0xf57   :  { %4485 = vmatmul.mubr.f32.vlgmr.msra.gmra.mrb[46].mxu0 %v3461_v4  ;;  %v7908_v24 = vpack.c.bf16 %v3746_v12, %v3745_v35  ;;  %v7910_v4 = vpack.c.bf16 %v3764_v17, %v3763_v31  ;;  %v3818_v6 = vld [vmem:[#allocation5 + $0xa88] sm:$0xff]  ;;  %v7920_v35 = vpack.c.bf16 %v3752_v63, %v3751_v61  ;;  %v7952_v13 = vpack.c.bf16 %v3784_v62, %v3783_v2  ;;  %v3824_v61 = vld [vmem:[#allocation5 + $0xab8] sm:$0xff]  ;;  %v3855_v63 = vld [vmem:[#allocation5 + $0xbb0] sm:$0xff] }
 0xf58   :  { %4555 = vmatmul.mubr.f32.vlgmr.msra.gmra.mrb[46].mxu1 %v3463_v43  ;;  %7893 = vmatpush3.bf16.msra.mxu0 %v7892_v18  ;;  %v3796_v18 = vld [vmem:[#allocation5 + $0x9d8] sm:$0xff]  ;;  %v3802_v31 = vld [vmem:[#allocation5 + $0xa08] sm:$0xff] }
 0xf59   :  { %4624 = vmatprep.mubr.f32.mxu0 %v3466_v41  ;;  %7925 = vmatpush3.bf16.msra.mxu1 %v7924_v25  ;;  %v3747_v25 = vld [vmem:[#allocation5 + $0x850] sm:$0xff]  ;;  %v7942_v33 = vpack.c.bf16 %v3796_v18, %v3795_v22  ;;  %v3780_v43 = vld [vmem:[#allocation5 + $0x958] sm:$0xff]  ;;  %v3833_v18 = vld [vmem:[#allocation5 + $0xb00] sm:$0xff] }
 0xf5a   :  { %4694 = vmatprep.mubr.f32.mxu1 %v3468_v8  ;;  %7895 = vmatprep.subr.bf16.mxu0 %v7894_v15  ;;  %v3765_v15 = vld [vmem:[#allocation5 + $0x8e0] sm:$0xff]  ;;  %v7912_v41 = vpack.c.bf16 %v3748_v26, %v3747_v25  ;;  %v3750_v8 = vld [vmem:[#allocation5 + $0x868] sm:$0xff]  ;;  %v3820_v25 = vld [vmem:[#allocation5 + $0xa98] sm:$0xff] }
 0xf5b   :  { %7927 = vmatprep.subr.bf16.mxu1 %v7926_v42  ;;  %v7944_v42 = vpack.c.bf16 %v3780_v43, %v3779_v32  ;;  %v7914_v44 = vpack.c.bf16 %v3766_v21, %v3765_v15  ;;  %v7916_v57 = vpack.c.bf16 %v3750_v8, %v3749_v58  ;;  %v7956_v32 = vpack.c.bf16 %v3802_v31, %v3801_v30  ;;  %v3803_v21 = vld [vmem:[#allocation5 + $0xa10] sm:$0xff]  ;;  %v3822_v58 = vld [vmem:[#allocation5 + $0xaa8] sm:$0xff]  ;;  %v3856_v2 = vld [vmem:[#allocation5 + $0xbb8] sm:$0xff] }
 0xf5c   :  { %7897 = vmatpush3.bf16.msra.mxu0 %v7896_v45  ;;  %v3781_v45 = vld [vmem:[#allocation5 + $0x960] sm:$0xff] }
 0xf5d   :  { %7929 = vmatpush3.bf16.msra.mxu1 %v7928_v46  ;;  %7899 = vmatprep.subr.bf16.mxu0 %v7898_v48  ;;  %v7946_v48 = vpack.c.bf16 %v3798_v37, %v3797_v36  ;;  %v3804_v36 = vld [vmem:[#allocation5 + $0xa18] sm:$0xff]  ;;  %v3835_v37 = vld [vmem:[#allocation5 + $0xb10] sm:$0xff] }
 0xf5e   :  { %7931 = vmatprep.subr.bf16.mxu1 %v7930_v53 }
 0xf60   :  { %7901 = vmatpush3.bf16.msra.mxu0 %v7900_v1  ;;  %v2220_v1 = vrot.slane %v9052_v50, %v8987_v14 }
 0xf61   :  { %7933 = vmatpush3.bf16.msra.mxu1 %v7932_v59  ;;  %7903 = vmatprep.subr.bf16.mxu0 %v7902_v60  ;;  %v7948_v59 = vpack.c.bf16 %v3782_v49, %v3781_v45  ;;  %v7918_v60 = vpack.c.bf16 %v3768_v52, %v3767_v51  ;;  %v3854_v49 = vld [vmem:[#allocation5 + $0xba8] sm:$0xff]  ;;  %v7960_v52 = vpack.c.bf16 %v3804_v36, %v3803_v21  ;;  %v3812_v21 = vld [vmem:[#allocation5 + $0xa58] sm:$0xff]  ;;  %v3843_v36 = vld [vmem:[#allocation5 + $0xb50] sm:$0xff] }
 0xf62   :  { %7935 = vmatprep.subr.bf16.mxu1 %v7934_v5  ;;  %v2228_v5 = vrot.slane %v9052_v50, %v8990_v19  ;;  %v2948_v12 = vadd.f32 %v9048_v23, %v2220_v1  ;;  %v3852_v23 = vld [vmem:[#allocation5 + $0xb98] sm:$0xff] }
 0xf64   :  { %7905 = vmatpush3.bf16.msra.mxu0 %v7904_v7  ;;  %v3849_v7 = vld [vmem:[#allocation5 + $0xb80] sm:$0xff]  ;;  %v3019_v17 = vadd.f32 %v9050_v47, %v2228_v5  ;;  %v3465_v43 = vmax.f32 %v2948_v12, 0.0 }
 0xf65   :  { %7937 = vmatpush3.bf16.msra.mxu1 %v7936_v20  ;;  %7907 = vmatprep.subr.bf16.mxu0 %v7906_v11  ;;  %v3850_v20 = vld [vmem:[#allocation5 + $0xb88] sm:$0xff]  ;;  %v2248_v11 = vrot.slane %v9052_v50, %v9000_v9  ;;  %v3857_v12 = vld [vmem:[#allocation5 + $0xbc0] sm:$0xff] }
 0xf66   :  { %7939 = vmatprep.subr.bf16.mxu1 %v7938_v16  ;;  %v7954_v16 = vpack.c.bf16 %v3818_v6, %v3817_v3  ;;  %v7986_v22 = vpack.c.bf16 %v3850_v20, %v3849_v7  ;;  %v3467_v47 = vmax.f32 %v3019_v17, 0.0  ;;  %v3807_v3 = vld [vmem:[#allocation5 + $0xa30] sm:$0xff]  ;;  %v3808_v6 = vld [vmem:[#allocation5 + $0xa38] sm:$0xff]  ;;  %v7998_v7 = vpack.c.bf16 %v3856_v2, %v3855_v63  ;;  %v3809_v17 = vld [vmem:[#allocation5 + $0xa40] sm:$0xff] }
 0xf67   :  { %v3840_v20 = vld [vmem:[#allocation5 + $0xb38] sm:$0xff] }
 0xf68   :  { %7909 = vmatpush3.bf16.msra.mxu0 %v7908_v24  ;;  %v3834_v24 = vld [vmem:[#allocation5 + $0xb08] sm:$0xff]  ;;  %v9082_v63 = vld [vmem:[#allocation12 + $0x18] sm:$0xff] }
 0xf69   :  { %7941 = vmatpush3.bf16.msra.mxu1 %v7940_v34  ;;  %7911 = vmatprep.subr.bf16.mxu0 %v7910_v4  ;;  %v3819_v4 = vld [vmem:[#allocation5 + $0xa90] sm:$0xff]  ;;  %v7988_v15 = vpack.c.bf16 %v3834_v24, %v3833_v18  ;;  %v3841_v18 = vld [vmem:[#allocation5 + $0xb40] sm:$0xff] }
 0xf6a   :  { %v9064_v46 = vpop.f32.mrb[34].mxu0  ;;  %7943 = vmatprep.subr.bf16.mxu1 %v7942_v33  ;;  %v3851_v33 = vld [vmem:[#allocation5 + $0xb90] sm:$0xff] }
 0xf6b   :  { %v3091_v53 = vpop.f32.mrb[35].mxu0  ;;  %v9066_v54 = vpop.f32.mrb[34].mxu1  ;;  %v7990_v45 = vpack.c.bf16 %v3852_v23, %v3851_v33 }
 0xf6c   :  { %7913 = vmatpush3.bf16.msra.mxu0 %v7912_v41  ;;  %v3162_v38 = vpop.f32.mrb[35].mxu1  ;;  %v3092_v34 = vadd.f32 %v3091_v53, %v2240_v40  ;;  %v7958_v41 = vpack.c.bf16 %v3820_v25, %v3819_v4  ;;  %v3839_v40 = vld [vmem:[#allocation5 + $0xb30] sm:$0xff]  ;;  %v3828_v25 = vld [vmem:[#allocation5 + $0xad8] sm:$0xff] }
 0xf6d   :  { %7945 = vmatpush3.bf16.msra.mxu1 %v7944_v42  ;;  %7915 = vmatprep.subr.bf16.mxu0 %v7914_v44  ;;  %v3163_v26 = vadd.f32 %v3162_v38, %v2248_v11  ;;  %v3836_v42 = vld [vmem:[#allocation5 + $0xb18] sm:$0xff]  ;;  %v3821_v44 = vld [vmem:[#allocation5 + $0xaa0] sm:$0xff]  ;;  %v3806_v38 = vld [vmem:[#allocation5 + $0xa28] sm:$0xff]  ;;  %v8000_v30 = vpack.c.bf16 %v3840_v20, %v3839_v40  ;;  %v2244_v20 = vrot.slane %v9052_v50, %v9016_v27 }
 0xf6e   :  { %7947 = vmatprep.subr.bf16.mxu1 %v7946_v48  ;;  %v3470_v8 = vmax.f32 %v3092_v34, 0.0  ;;  %v3853_v48 = vld [vmem:[#allocation5 + $0xba0] sm:$0xff]  ;;  %v7992_v53 = vpack.c.bf16 %v3836_v42, %v3835_v37  ;;  %v7962_v55 = vpack.c.bf16 %v3822_v58, %v3821_v44  ;;  %v7964_v5 = vpack.c.bf16 %v3806_v38, %v3805_v56  ;;  %v3842_v34 = vld [vmem:[#allocation5 + $0xb48] sm:$0xff]  ;;  %v3827_v4 = vld [vmem:[#allocation5 + $0xad0] sm:$0xff] }
 0xf6f   :  { %v3472_v51 = vmax.f32 %v3163_v26, 0.0  ;;  %v7994_v1 = vpack.c.bf16 %v3854_v49, %v3853_v48  ;;  %v3825_v11 = vld [vmem:[#allocation5 + $0xac0] sm:$0xff]  ;;  %v3859_v26 = vld [vmem:[#allocation5 + $0xbd0] sm:$0xff]  ;;  %v8004_v23 = vpack.c.bf16 %v3842_v34, %v3841_v18  ;;  %v3830_v42 = vld [vmem:[#allocation5 + $0xae8] sm:$0xff] }
 0xf70   :  { %7917 = vmatpush3.bf16.msra.mxu0 %v7916_v57  ;;  %v3837_v57 = vld [vmem:[#allocation5 + $0xb20] sm:$0xff]  ;;  %v3862_v58 = vld [vmem:[#allocation5 + $0xbe8] sm:$0xff]  ;;  %v3831_v38 = vld [vmem:[#allocation5 + $0xaf0] sm:$0xff] }
 0xf71   :  { %7949 = vmatpush3.bf16.msra.mxu1 %v7948_v59  ;;  %7919 = vmatprep.subr.bf16.mxu0 %v7918_v60  ;;  %v3838_v59 = vld [vmem:[#allocation5 + $0xb28] sm:$0xff]  ;;  %v3823_v60 = vld [vmem:[#allocation5 + $0xab0] sm:$0xff]  ;;  %v3861_v44 = vld [vmem:[#allocation5 + $0xbe0] sm:$0xff] }
 0xf72   :  { %7951 = vmatprep.subr.bf16.mxu1 %v7950_v10  ;;  %v7996_v10 = vpack.c.bf16 %v3838_v59, %v3837_v57  ;;  %v7966_v62 = vpack.c.bf16 %v3824_v61, %v3823_v60  ;;  %v3813_v49 = vld [vmem:[#allocation5 + $0xa60] sm:$0xff]  ;;  %v3846_v56 = vld [vmem:[#allocation5 + $0xb68] sm:$0xff]  ;;  %v3832_v57 = vld [vmem:[#allocation5 + $0xaf8] sm:$0xff] }
 0xf73   :  { %v3863_v60 = vld [vmem:[#allocation5 + $0xbf0] sm:$0xff]  ;;  %v3864_v61 = vld [vmem:[#allocation5 + $0xbf8] sm:$0xff]  ;;  %v3865_v34 = vld [vmem:[#allocation5 + $0xc00] sm:$0xff] }
 0xf74   :  { %7921 = vmatpush3.bf16.msra.mxu0 %v7920_v35  ;;  %v3826_v35 = vld [vmem:[#allocation5 + $0xac8] sm:$0xff]  ;;  %v3816_v40 = vld [vmem:[#allocation5 + $0xa78] sm:$0xff] }
 0xf75   :  { %7953 = vmatpush3.bf16.msra.mxu1 %v7952_v13  ;;  %7955 = vmatprep.subr.bf16.mxu0 %v7954_v16  ;;  %v3858_v13 = vld [vmem:[#allocation5 + $0xbc8] sm:$0xff]  ;;  %v7968_v16 = vpack.c.bf16 %v3808_v6, %v3807_v3  ;;  %v7970_v31 = vpack.c.bf16 %v3826_v35, %v3825_v11  ;;  %v7982_v3 = vpack.c.bf16 %v3832_v57, %v3831_v38  ;;  %v3815_v6 = vld [vmem:[#allocation5 + $0xa70] sm:$0xff]  ;;  %v3848_v35 = vld [vmem:[#allocation5 + $0xb78] sm:$0xff] }
 0xf76   :  { %7987 = vmatprep.subr.bf16.mxu1 %v7986_v22  ;;  %v3810_v22 = vld [vmem:[#allocation5 + $0xa48] sm:$0xff]  ;;  %v8002_v24 = vpack.c.bf16 %v3858_v13, %v3857_v12  ;;  %v8014_v11 = vpack.c.bf16 %v3864_v61, %v3863_v60  ;;  %v3881_v12 = vld [vmem:[#allocation5 + $0xc80] sm:$0xff] }
 0xf77   :  { %4625 = vmatmul.mubr.f32.vlgmr.msra.gmra.mrb[48].mxu0 %v3465_v43  ;;  %v7972_v33 = vpack.c.bf16 %v3810_v22, %v3809_v17  ;;  %v7974_v43 = vpack.c.bf16 %v3828_v25, %v3827_v4  ;;  %v3882_v13 = vld [vmem:[#allocation5 + $0xc88] sm:$0xff]  ;;  %v2264_v17 = vrot.slane %v9082_v63, %v8978_v39  ;;  %v7984_v22 = vpack.c.bf16 %v3816_v40, %v3815_v6  ;;  %v3901_v61 = vld [vmem:[#allocation5 + $0xd20] sm:$0xff]  ;;  %v3920_v6 = vld [vmem:[#allocation5 + $0xdb8] sm:$0xff] }
 0xf78   :  { %4695 = vmatmul.mubr.f32.vlgmr.msra.gmra.mrb[48].mxu1 %v3467_v47  ;;  %7957 = vmatpush3.bf16.msra.mxu0 %v7956_v32  ;;  %v3860_v32 = vld [vmem:[#allocation5 + $0xbd8] sm:$0xff]  ;;  %v3866_v4 = vld [vmem:[#allocation5 + $0xc08] sm:$0xff]  ;;  %v3161_v25 = vadd.f32 %v9066_v54, %v2244_v20 }
 0xf79   :  { %4764 = vmatprep.mubr.f32.mxu0 %v3470_v8  ;;  %7989 = vmatpush3.bf16.msra.mxu1 %v7988_v15  ;;  %v3811_v15 = vld [vmem:[#allocation5 + $0xa50] sm:$0xff]  ;;  %v8006_v37 = vpack.c.bf16 %v3860_v32, %v3859_v26  ;;  %v3844_v47 = vld [vmem:[#allocation5 + $0xb58] sm:$0xff]  ;;  %v3898_v32 = vld [vmem:[#allocation5 + $0xd08] sm:$0xff] }
 0xf7a   :  { %4834 = vmatprep.mubr.f32.mxu1 %v3472_v51  ;;  %7959 = vmatprep.subr.bf16.mxu0 %v7958_v41  ;;  %v3829_v41 = vld [vmem:[#allocation5 + $0xae0] sm:$0xff]  ;;  %v7976_v8 = vpack.c.bf16 %v3812_v21, %v3811_v15  ;;  %v3814_v51 = vld [vmem:[#allocation5 + $0xa68] sm:$0xff]  ;;  %v8020_v15 = vpack.c.bf16 %v3866_v4, %v3865_v34  ;;  %v3915_v21 = vld [vmem:[#allocation5 + $0xd90] sm:$0xff]  ;;  %v3471_v54 = vmax.f32 %v3161_v25, 0.0 }
 0xf7b   :  { %7991 = vmatprep.subr.bf16.mxu1 %v7990_v45  ;;  %v8008_v45 = vpack.c.bf16 %v3844_v47, %v3843_v36  ;;  %v7978_v48 = vpack.c.bf16 %v3830_v42, %v3829_v41  ;;  %v3867_v47 = vld [vmem:[#allocation5 + $0xc10] sm:$0xff]  ;;  %v3868_v41 = vld [vmem:[#allocation5 + $0xc18] sm:$0xff]  ;;  %v3870_v60 = vld [vmem:[#allocation5 + $0xc28] sm:$0xff] }
 0xf7c   :  { %7961 = vmatpush3.bf16.msra.mxu0 %v7960_v52  ;;  %v3845_v52 = vld [vmem:[#allocation5 + $0xb60] sm:$0xff]  ;;  %v3899_v42 = vld [vmem:[#allocation5 + $0xd10] sm:$0xff]  ;;  %v3874_v4 = vld [vmem:[#allocation5 + $0xc48] sm:$0xff] }
 0xf7d   :  { %7993 = vmatpush3.bf16.msra.mxu1 %v7992_v53  ;;  %7963 = vmatprep.subr.bf16.mxu0 %v7962_v55  ;;  %v8010_v55 = vpack.c.bf16 %v3862_v58, %v3861_v44  ;;  %v3900_v58 = vld [vmem:[#allocation5 + $0xd18] sm:$0xff]  ;;  %v3873_v34 = vld [vmem:[#allocation5 + $0xc40] sm:$0xff] }
 0xf7e   :  { %7995 = vmatprep.subr.bf16.mxu1 %v7994_v1  ;;  %v8056_v38 = vpack.c.bf16 %v3900_v58, %v3899_v42  ;;  %v3905_v25 = vld [vmem:[#allocation5 + $0xd40] sm:$0xff]  ;;  %v3926_v58 = vld [vmem:[#allocation5 + $0xde8] sm:$0xff] }
 0xf7f   :  { %v3893_v42 = vld [vmem:[#allocation5 + $0xce0] sm:$0xff] }
 0xf80   :  { %7965 = vmatpush3.bf16.msra.mxu0 %v7964_v5  ;;  %v7980_v5 = vpack.c.bf16 %v3814_v51, %v3813_v49  ;;  %v3917_v51 = vld [vmem:[#allocation5 + $0xda0] sm:$0xff] }
 0xf81   :  { %7997 = vmatpush3.bf16.msra.mxu1 %v7996_v10  ;;  %7967 = vmatprep.subr.bf16.mxu0 %v7966_v62  ;;  %v2236_v10 = vrot.slane %v9052_v50, %v9013_v0  ;;  %v8012_v62 = vpack.c.bf16 %v3846_v56, %v3845_v52  ;;  %v3918_v52 = vld [vmem:[#allocation5 + $0xda8] sm:$0xff]  ;;  %v8024_v56 = vpack.c.bf16 %v3868_v41, %v3867_v47  ;;  %v3908_v41 = vld [vmem:[#allocation5 + $0xd58] sm:$0xff] }
 0xf82   :  { %7999 = vmatprep.subr.bf16.mxu1 %v7998_v7  ;;  %v3847_v7 = vld [vmem:[#allocation5 + $0xb70] sm:$0xff] }
 0xf83   :  { %v3090_v18 = vadd.f32 %v9064_v46, %v2236_v10  ;;  %v8016_v50 = vpack.c.bf16 %v3848_v35, %v3847_v7  ;;  %v3916_v46 = vld [vmem:[#allocation5 + $0xd98] sm:$0xff]  ;;  %v3887_v10 = vld [vmem:[#allocation5 + $0xcb0] sm:$0xff] }
 0xf84   :  { %7969 = vmatpush3.bf16.msra.mxu0 %v7968_v16  ;;  %v2256_v16 = vrot.slane %v9082_v63, %v8971_v28  ;;  %v3897_v28 = vld [vmem:[#allocation5 + $0xd00] sm:$0xff]  ;;  %v8054_v49 = vpack.c.bf16 %v3916_v46, %v3915_v21  ;;  %v3872_v35 = vld [vmem:[#allocation5 + $0xc38] sm:$0xff]  ;;  %v3875_v46 = vld [vmem:[#allocation5 + $0xc50] sm:$0xff] }
 0xf85   :  { %8001 = vmatpush3.bf16.msra.mxu1 %v8000_v30  ;;  %7971 = vmatprep.subr.bf16.mxu0 %v7970_v31  ;;  %v3913_v30 = vld [vmem:[#allocation5 + $0xd80] sm:$0xff]  ;;  %v3914_v31 = vld [vmem:[#allocation5 + $0xd88] sm:$0xff]  ;;  %v3469_v36 = vmax.f32 %v3090_v18, 0.0 }
 0xf86   :  { %8003 = vmatprep.subr.bf16.mxu1 %v8002_v24  ;;  %v8018_v24 = vpack.c.bf16 %v3882_v13, %v3881_v12  ;;  %v8050_v26 = vpack.c.bf16 %v3914_v31, %v3913_v30  ;;  %v3903_v12 = vld [vmem:[#allocation5 + $0xd30] sm:$0xff]  ;;  %v3889_v30 = vld [vmem:[#allocation5 + $0xcc0] sm:$0xff]  ;;  %v3890_v31 = vld [vmem:[#allocation5 + $0xcc8] sm:$0xff] }
 0xf88   :  { %7973 = vmatpush3.bf16.msra.mxu0 %v7972_v33 }
 0xf89   :  { %8005 = vmatpush3.bf16.msra.mxu1 %v8004_v23  ;;  %7975 = vmatprep.subr.bf16.mxu0 %v7974_v43  ;;  %v3883_v23 = vld [vmem:[#allocation5 + $0xc90] sm:$0xff]  ;;  %v3884_v43 = vld [vmem:[#allocation5 + $0xc98] sm:$0xff] }
 0xf8a   :  { %v9078_v53 = vpop.f32.mrb[36].mxu0  ;;  %8007 = vmatprep.subr.bf16.mxu1 %v8006_v37  ;;  %v8052_v37 = vpack.c.bf16 %v3898_v32, %v3897_v28  ;;  %v8022_v44 = vpack.c.bf16 %v3884_v43, %v3883_v23  ;;  %v3906_v28 = vld [vmem:[#allocation5 + $0xd48] sm:$0xff]  ;;  %v3891_v32 = vld [vmem:[#allocation5 + $0xcd0] sm:$0xff]  ;;  %v3924_v43 = vld [vmem:[#allocation5 + $0xdd8] sm:$0xff] }
 0xf8b   :  { %v3233_v1 = vpop.f32.mrb[37].mxu0  ;;  %v9080_v59 = vpop.f32.mrb[36].mxu1  ;;  %v3923_v23 = vld [vmem:[#allocation5 + $0xdd0] sm:$0xff] }
 0xf8c   :  { %7977 = vmatpush3.bf16.msra.mxu0 %v7976_v8  ;;  %v3304_v2 = vpop.f32.mrb[37].mxu1  ;;  %v3234_v33 = vadd.f32 %v3233_v1, %v2256_v16  ;;  %v3885_v8 = vld [vmem:[#allocation5 + $0xca0] sm:$0xff]  ;;  %v3904_v16 = vld [vmem:[#allocation5 + $0xd38] sm:$0xff]  ;;  %v8070_v47 = vpack.c.bf16 %v3924_v43, %v3923_v23 }
 0xf8d   :  { %8009 = vmatpush3.bf16.msra.mxu1 %v8008_v45  ;;  %7979 = vmatprep.subr.bf16.mxu0 %v7978_v48  ;;  %v3305_v39 = vadd.f32 %v3304_v2, %v2264_v17  ;;  %v3886_v45 = vld [vmem:[#allocation5 + $0xca8] sm:$0xff]  ;;  %v3869_v1 = vld [vmem:[#allocation5 + $0xc20] sm:$0xff]  ;;  %v8058_v2 = vpack.c.bf16 %v3918_v52, %v3917_v51  ;;  %v3948_v23 = vld [vmem:[#allocation5 + $0xe98] sm:$0xff] }
 0xf8e   :  { %8011 = vmatprep.subr.bf16.mxu1 %v8010_v55  ;;  %v3474_v48 = vmax.f32 %v3234_v33, 0.0  ;;  %v8026_v57 = vpack.c.bf16 %v3886_v45, %v3885_v8  ;;  %v8028_v40 = vpack.c.bf16 %v3870_v60, %v3869_v1  ;;  %v3921_v17 = vld [vmem:[#allocation5 + $0xdc0] sm:$0xff]  ;;  %v3892_v33 = vld [vmem:[#allocation5 + $0xcd8] sm:$0xff]  ;;  %v3878_v51 = vld [vmem:[#allocation5 + $0xc68] sm:$0xff] }
 0xf8f   :  { %v3476_v55 = vmax.f32 %v3305_v39, 0.0  ;;  %v8036_v39 = vpack.c.bf16 %v3874_v4, %v3873_v34  ;;  %v8038_v21 = vpack.c.bf16 %v3892_v33, %v3891_v32  ;;  %v3909_v52 = vld [vmem:[#allocation5 + $0xd60] sm:$0xff]  ;;  %v3896_v1 = vld [vmem:[#allocation5 + $0xcf8] sm:$0xff]  ;;  %v3930_v4 = vld [vmem:[#allocation5 + $0xe08] sm:$0xff] }
 0xf90   :  { %7981 = vmatpush3.bf16.msra.mxu0 %v7980_v5  ;;  %v3902_v5 = vld [vmem:[#allocation5 + $0xd28] sm:$0xff]  ;;  %v3929_v34 = vld [vmem:[#allocation5 + $0xe00] sm:$0xff]  ;;  %v3947_v33 = vld [vmem:[#allocation5 + $0xe90] sm:$0xff] }
 0xf91   :  { %8013 = vmatpush3.bf16.msra.mxu1 %v8012_v62  ;;  %7983 = vmatprep.subr.bf16.mxu0 %v7982_v3  ;;  %v3888_v62 = vld [vmem:[#allocation5 + $0xcb8] sm:$0xff]  ;;  %v3919_v3 = vld [vmem:[#allocation5 + $0xdb0] sm:$0xff]  ;;  %v8060_v7 = vpack.c.bf16 %v3902_v5, %v3901_v61  ;;  %v8084_v43 = vpack.c.bf16 %v3930_v4, %v3929_v34  ;;  %v3970_v34 = vld [vmem:[#allocation5 + $0xf48] sm:$0xff] }
 0xf92   :  { %8015 = vmatprep.subr.bf16.mxu1 %v8014_v11  ;;  %v8030_v20 = vpack.c.bf16 %v3888_v62, %v3887_v10  ;;  %v3871_v11 = vld [vmem:[#allocation5 + $0xc30] sm:$0xff]  ;;  %v8062_v13 = vpack.c.bf16 %v3920_v6, %v3919_v3  ;;  %v3928_v5 = vld [vmem:[#allocation5 + $0xdf8] sm:$0xff]  ;;  %v2252_v3 = vrot.slane %v9082_v63, %v8987_v14  ;;  %v3978_v14 = vld [vmem:[#allocation5 + $0xf88] sm:$0xff] }
 0xf93   :  { %v8032_v18 = vpack.c.bf16 %v3872_v35, %v3871_v11  ;;  %v3911_v11 = vld [vmem:[#allocation5 + $0xd70] sm:$0xff]  ;;  %v2260_v35 = vrot.slane %v9082_v63, %v8990_v19 }
 0xf94   :  { %7985 = vmatpush3.bf16.msra.mxu0 %v7984_v22  ;;  %v3922_v22 = vld [vmem:[#allocation5 + $0xdc8] sm:$0xff]  ;;  %v3955_v4 = vld [vmem:[#allocation5 + $0xed0] sm:$0xff] }
 0xf95   :  { %8017 = vmatpush3.bf16.msra.mxu1 %v8016_v50  ;;  %8019 = vmatprep.subr.bf16.mxu0 %v8018_v24  ;;  %v8064_v50 = vpack.c.bf16 %v3904_v16, %v3903_v12  ;;  %v8034_v24 = vpack.c.bf16 %v3890_v31, %v3889_v30  ;;  %v3945_v16 = vld [vmem:[#allocation5 + $0xe80] sm:$0xff]  ;;  %v3946_v30 = vld [vmem:[#allocation5 + $0xe88] sm:$0xff]  ;;  %v2272_v31 = vrot.slane %v9082_v63, %v8995_v29 }
 0xf96   :  { %8051 = vmatprep.subr.bf16.mxu1 %v8050_v26  ;;  %v8066_v26 = vpack.c.bf16 %v3922_v22, %v3921_v17  ;;  %v3977_v17 = vld [vmem:[#allocation5 + $0xf80] sm:$0xff]  ;;  %v2280_v22 = vrot.slane %v9082_v63, %v9000_v9 }
 0xf97   :  { %4765 = vmatmul.mubr.f32.vlgmr.msra.gmra.mrb[50].mxu0 %v3469_v36  ;;  %v3876_v36 = vld [vmem:[#allocation5 + $0xc58] sm:$0xff]  ;;  %v3961_v29 = vld [vmem:[#allocation5 + $0xf00] sm:$0xff] }
 0xf98   :  { %4835 = vmatmul.mubr.f32.vlgmr.msra.gmra.mrb[50].mxu1 %v3471_v54  ;;  %8021 = vmatpush3.bf16.msra.mxu0 %v8020_v15  ;;  %v8068_v15 = vpack.c.bf16 %v3906_v28, %v3905_v25  ;;  %v3894_v54 = vld [vmem:[#allocation5 + $0xce8] sm:$0xff]  ;;  %v8040_v8 = vpack.c.bf16 %v3876_v36, %v3875_v46  ;;  %v3303_v25 = vadd.f32 %v9080_v59, %v2260_v35  ;;  %v3931_v46 = vld [vmem:[#allocation5 + $0xe10] sm:$0xff]  ;;  %v3932_v36 = vld [vmem:[#allocation5 + $0xe18] sm:$0xff] }
 0xf99   :  { %4904 = vmatprep.mubr.f32.mxu0 %v3474_v48  ;;  %8053 = vmatpush3.bf16.msra.mxu1 %v8052_v37  ;;  %v3907_v37 = vld [vmem:[#allocation5 + $0xd50] sm:$0xff]  ;;  %v8042_v48 = vpack.c.bf16 %v3894_v54, %v3893_v42  ;;  %v3962_v28 = vld [vmem:[#allocation5 + $0xf08] sm:$0xff]  ;;  %v3949_v42 = vld [vmem:[#allocation5 + $0xea0] sm:$0xff] }
 0xf9a   :  { %4974 = vmatprep.mubr.f32.mxu1 %v3476_v55  ;;  %8023 = vmatprep.subr.bf16.mxu0 %v8022_v44  ;;  %v3925_v44 = vld [vmem:[#allocation5 + $0xde0] sm:$0xff]  ;;  %v8072_v45 = vpack.c.bf16 %v3908_v41, %v3907_v37  ;;  %v3963_v37 = vld [vmem:[#allocation5 + $0xf10] sm:$0xff]  ;;  %v3475_v59 = vmax.f32 %v3303_v25, 0.0  ;;  %v3964_v41 = vld [vmem:[#allocation5 + $0xf18] sm:$0xff] }
 0xf9b   :  { %8055 = vmatprep.subr.bf16.mxu1 %v8054_v49  ;;  %v3877_v49 = vld [vmem:[#allocation5 + $0xc60] sm:$0xff]  ;;  %v3950_v54 = vld [vmem:[#allocation5 + $0xea8] sm:$0xff]  ;;  %v3956_v25 = vld [vmem:[#allocation5 + $0xed8] sm:$0xff] }
 0xf9c   :  { %8025 = vmatpush3.bf16.msra.mxu0 %v8024_v56  ;;  %v8074_v56 = vpack.c.bf16 %v3926_v58, %v3925_v44  ;;  %v8044_v62 = vpack.c.bf16 %v3878_v51, %v3877_v49  ;;  %v8088_v49 = vpack.c.bf16 %v3932_v36, %v3931_v46  ;;  %v8120_v51 = vpack.c.bf16 %v3964_v41, %v3963_v37  ;;  %v3989_v46 = vld [vmem:[#allocation5 + $0xfe0] sm:$0xff]  ;;  %v3990_v36 = vld [vmem:[#allocation5 + $0xfe8] sm:$0xff] }
 0xf9d   :  { %8057 = vmatpush3.bf16.msra.mxu1 %v8056_v38  ;;  %8027 = vmatprep.subr.bf16.mxu0 %v8026_v57  ;;  %v3910_v38 = vld [vmem:[#allocation5 + $0xd68] sm:$0xff]  ;;  %v3895_v57 = vld [vmem:[#allocation5 + $0xcf0] sm:$0xff]  ;;  %v3941_v41 = vld [vmem:[#allocation5 + $0xe60] sm:$0xff] }
 0xf9e   :  { %8059 = vmatprep.subr.bf16.mxu1 %v8058_v2  ;;  %v3927_v2 = vld [vmem:[#allocation5 + $0xdf0] sm:$0xff]  ;;  %v8076_v6 = vpack.c.bf16 %v3910_v38, %v3909_v52  ;;  %v8090_v52 = vpack.c.bf16 %v3950_v54, %v3949_v42  ;;  %v3934_v38 = vld [vmem:[#allocation5 + $0xe28] sm:$0xff]  ;;  %v3973_v54 = vld [vmem:[#allocation5 + $0xf60] sm:$0xff] }
 0xf9f   :  { %v8078_v12 = vpack.c.bf16 %v3928_v5, %v3927_v2  ;;  %v3951_v2 = vld [vmem:[#allocation5 + $0xeb0] sm:$0xff]  ;;  %v3952_v5 = vld [vmem:[#allocation5 + $0xeb8] sm:$0xff]  ;;  %v3942_v42 = vld [vmem:[#allocation5 + $0xe68] sm:$0xff] }
 0xfa0   :  { %8029 = vmatpush3.bf16.msra.mxu0 %v8028_v40  ;;  %v8046_v40 = vpack.c.bf16 %v3896_v1, %v3895_v57  ;;  %v3965_v57 = vld [vmem:[#allocation5 + $0xf20] sm:$0xff] }
 0xfa1   :  { %8061 = vmatpush3.bf16.msra.mxu1 %v8060_v7  ;;  %8031 = vmatprep.subr.bf16.mxu0 %v8030_v20  ;;  %v3879_v7 = vld [vmem:[#allocation5 + $0xc70] sm:$0xff]  ;;  %v3880_v20 = vld [vmem:[#allocation5 + $0xc78] sm:$0xff] }
 0xfa2   :  { %8063 = vmatprep.subr.bf16.mxu1 %v8062_v13  ;;  %v3912_v13 = vld [vmem:[#allocation5 + $0xd78] sm:$0xff] }
 0xfa3   :  { %v8080_v19 = vpack.c.bf16 %v3912_v13, %v3911_v11  ;;  %v3967_v11 = vld [vmem:[#allocation5 + $0xf30] sm:$0xff]  ;;  %v3953_v13 = vld [vmem:[#allocation5 + $0xec0] sm:$0xff] }
 0xfa4   :  { %8033 = vmatpush3.bf16.msra.mxu0 %v8032_v18  ;;  %v8048_v18 = vpack.c.bf16 %v3880_v20, %v3879_v7  ;;  %v3935_v7 = vld [vmem:[#allocation5 + $0xe30] sm:$0xff]  ;;  %v3936_v20 = vld [vmem:[#allocation5 + $0xe38] sm:$0xff] }
 0xfa5   :  { %8065 = vmatpush3.bf16.msra.mxu1 %v8064_v50  ;;  %8035 = vmatprep.subr.bf16.mxu0 %v8034_v24  ;;  %v3232_v50 = vadd.f32 %v9078_v53, %v2252_v3  ;;  %v8082_v24 = vpack.c.bf16 %v3946_v30, %v3945_v16  ;;  %v3980_v53 = vld [vmem:[#allocation5 + $0xf98] sm:$0xff]  ;;  %v3954_v16 = vld [vmem:[#allocation5 + $0xec8] sm:$0xff]  ;;  %v3985_v30 = vld [vmem:[#allocation5 + $0xfc0] sm:$0xff] }
 0xfa6   :  { %8067 = vmatprep.subr.bf16.mxu1 %v8066_v26  ;;  %v8114_v26 = vpack.c.bf16 %v3978_v14, %v3977_v17  ;;  %v8096_v17 = vpack.c.bf16 %v3936_v20, %v3935_v7 }
 0xfa8   :  { %8037 = vmatpush3.bf16.msra.mxu0 %v8036_v39  ;;  %v3979_v39 = vld [vmem:[#allocation5 + $0xf90] sm:$0xff] }
 0xfa9   :  { %8069 = vmatpush3.bf16.msra.mxu1 %v8068_v15  ;;  %8039 = vmatprep.subr.bf16.mxu0 %v8038_v21  ;;  %v3473_v15 = vmax.f32 %v3232_v50, 0.0  ;;  %v8116_v21 = vpack.c.bf16 %v3962_v28, %v3961_v29  ;;  %v8118_v58 = vpack.c.bf16 %v3980_v53, %v3979_v39  ;;  %v3938_v50 = vld [vmem:[#allocation5 + $0xe48] sm:$0xff]  ;;  %v3988_v29 = vld [vmem:[#allocation5 + $0xfd8] sm:$0xff] }
 0xfaa   :  { %v9094_v55 = vpop.f32.mrb[38].mxu0  ;;  %8071 = vmatprep.subr.bf16.mxu1 %v8070_v47  ;;  %v8086_v47 = vpack.c.bf16 %v3948_v23, %v3947_v33  ;;  %v8102_v33 = vpack.c.bf16 %v3956_v25, %v3955_v4  ;;  %v3939_v23 = vld [vmem:[#allocation5 + $0xe50] sm:$0xff]  ;;  %v3972_v53 = vld [vmem:[#allocation5 + $0xf58] sm:$0xff] }
 0xfab   :  { %v3375_v60 = vpop.f32.mrb[39].mxu0  ;;  %v9096_v61 = vpop.f32.mrb[38].mxu1 }
 0xfac   :  { %8041 = vmatpush3.bf16.msra.mxu0 %v8040_v8  ;;  %v3446_v10 = vpop.f32.mrb[39].mxu1  ;;  %v3376_v32 = vadd.f32 %v3375_v60, %v2272_v31  ;;  %v3981_v8 = vld [vmem:[#allocation5 + $0xfa0] sm:$0xff]  ;;  %v3966_v60 = vld [vmem:[#allocation5 + $0xf28] sm:$0xff] }
 0xfad   :  { %8073 = vmatpush3.bf16.msra.mxu1 %v8072_v45  ;;  %8043 = vmatprep.subr.bf16.mxu0 %v8042_v48  ;;  %v3447_v9 = vadd.f32 %v3446_v10, %v2280_v22  ;;  %v3982_v45 = vld [vmem:[#allocation5 + $0xfa8] sm:$0xff]  ;;  %v3983_v10 = vld [vmem:[#allocation5 + $0xfb0] sm:$0xff]  ;;  %v8098_v22 = vpack.c.bf16 %v3954_v16, %v3953_v13 }
 0xfae   :  { %8075 = vmatprep.subr.bf16.mxu1 %v8074_v56  ;;  %v3478_v44 = vmax.f32 %v3376_v32, 0.0  ;;  %v3933_v56 = vld [vmem:[#allocation5 + $0xe20] sm:$0xff]  ;;  %v8122_v1 = vpack.c.bf16 %v3982_v45, %v3981_v8  ;;  %v3986_v31 = vld [vmem:[#allocation5 + $0xfc8] sm:$0xff]  ;;  %v3959_v45 = vld [vmem:[#allocation5 + $0xef0] sm:$0xff] }
 0xfaf   :  { %v3480_v48 = vmax.f32 %v3447_v9, 0.0  ;;  %v8092_v3 = vpack.c.bf16 %v3934_v38, %v3933_v56  ;;  %v3940_v9 = vld [vmem:[#allocation5 + $0xe58] sm:$0xff]  ;;  %v3974_v8 = vld [vmem:[#allocation5 + $0xf68] sm:$0xff]  ;;  %v3991_v56 = vld [vmem:[#allocation5 + $0xff0] sm:$0xff] }
 0xfb0   :  { %8045 = vmatpush3.bf16.msra.mxu0 %v8044_v62  ;;  %v3984_v62 = vld [vmem:[#allocation5 + $0xfb8] sm:$0xff]  ;;  %v8104_v37 = vpack.c.bf16 %v3940_v9, %v3939_v23 }
 0xfb1   :  { %8077 = vmatpush3.bf16.msra.mxu1 %v8076_v6  ;;  %8047 = vmatprep.subr.bf16.mxu0 %v8046_v40  ;;  %v8124_v6 = vpack.c.bf16 %v3966_v60, %v3965_v57  ;;  %v8094_v40 = vpack.c.bf16 %v3952_v5, %v3951_v2  ;;  %v8126_v35 = vpack.c.bf16 %v3984_v62, %v3983_v10  ;;  %v3992_v38 = vld [vmem:[#allocation5 + $0xff8] sm:$0xff] }
 0xfb2   :  { %8079 = vmatprep.subr.bf16.mxu1 %v8078_v12  ;;  %v3968_v12 = vld [vmem:[#allocation5 + $0xf38] sm:$0xff]  ;;  %v2268_v57 = vrot.slane %v9082_v63, %v9013_v0  ;;  %v8108_v2 = vpack.c.bf16 %v3942_v42, %v3941_v41  ;;  %v8140_v10 = vpack.c.bf16 %v3974_v8, %v3973_v54  ;;  %v8142_v20 = vpack.c.bf16 %v3992_v38, %v3991_v56 }
 0xfb3   :  { %v8128_v14 = vpack.c.bf16 %v3968_v12, %v3967_v11  ;;  %v3975_v11 = vld [vmem:[#allocation5 + $0xf70] sm:$0xff] }
 0xfb4   :  { %8049 = vmatpush3.bf16.msra.mxu0 %v8048_v18  ;;  %v3937_v18 = vld [vmem:[#allocation5 + $0xe40] sm:$0xff]  ;;  %v3374_v13 = vadd.f32 %v9094_v55, %v2268_v57 }
 0xfb5   :  { %8081 = vmatpush3.bf16.msra.mxu1 %v8080_v19  ;;  %8083 = vmatprep.subr.bf16.mxu0 %v8082_v24  ;;  %v3969_v19 = vld [vmem:[#allocation5 + $0xf40] sm:$0xff]  ;;  %v8130_v24 = vpack.c.bf16 %v3986_v31, %v3985_v30  ;;  %v8100_v28 = vpack.c.bf16 %v3938_v50, %v3937_v18 }
 0xfb6   :  { %8115 = vmatprep.subr.bf16.mxu1 %v8114_v26  ;;  %v3987_v26 = vld [vmem:[#allocation5 + $0xfd0] sm:$0xff]  ;;  %v8132_v32 = vpack.c.bf16 %v3970_v34, %v3969_v19  ;;  %v3477_v31 = vmax.f32 %v3374_v13, 0.0 }
 0xfb7   :  { %4905 = vmatmul.mubr.f32.vlgmr.msra.gmra.mrb[52].mxu0 %v3473_v15  ;;  %v8134_v39 = vpack.c.bf16 %v3988_v29, %v3987_v26  ;;  %v3957_v15 = vld [vmem:[#allocation5 + $0xee0] sm:$0xff] }
 0xfb8   :  { %4975 = vmatmul.mubr.f32.vlgmr.msra.gmra.mrb[52].mxu1 %v3475_v59  ;;  %8085 = vmatpush3.bf16.msra.mxu0 %v8084_v43  ;;  %v3971_v43 = vld [vmem:[#allocation5 + $0xf50] sm:$0xff] }
 0xfb9   :  { %5044 = vmatprep.mubr.f32.mxu0 %v3478_v44  ;;  %8117 = vmatpush3.bf16.msra.mxu1 %v8116_v21  ;;  %v3958_v21 = vld [vmem:[#allocation5 + $0xee8] sm:$0xff]  ;;  %v8136_v59 = vpack.c.bf16 %v3972_v53, %v3971_v43 }
 0xfba   :  { %5114 = vmatprep.mubr.f32.mxu1 %v3480_v48  ;;  %8087 = vmatprep.subr.bf16.mxu0 %v8086_v47  ;;  %v8106_v47 = vpack.c.bf16 %v3958_v21, %v3957_v15  ;;  %v3960_v48 = vld [vmem:[#allocation5 + $0xef8] sm:$0xff] }
 0xfbb   :  { %8119 = vmatprep.subr.bf16.mxu1 %v8118_v58  ;;  %v8138_v58 = vpack.c.bf16 %v3990_v36, %v3989_v46  ;;  %v8110_v62 = vpack.c.bf16 %v3960_v48, %v3959_v45 }
 0xfbc   :  { %8089 = vmatpush3.bf16.msra.mxu0 %v8088_v49 }
 0xfbd   :  { %8121 = vmatpush3.bf16.msra.mxu1 %v8120_v51  ;;  %8091 = vmatprep.subr.bf16.mxu0 %v8090_v52  ;;  %v5143_v51 = vld [vmem:[#allocation14] ss:$0 sm:$0xff] }
 0xfbe   :  { %8123 = vmatprep.subr.bf16.mxu1 %v8122_v1 }
 0xfc0   :  { %8093 = vmatpush3.bf16.msra.mxu0 %v8092_v3  ;;  %v3943_v3 = vld [vmem:[#allocation5 + $0xe70] sm:$0xff] }
 0xfc1   :  { %8125 = vmatpush3.bf16.msra.mxu1 %v8124_v6  ;;  %8095 = vmatprep.subr.bf16.mxu0 %v8094_v40  ;;  %v3944_v6 = vld [vmem:[#allocation5 + $0xe78] sm:$0xff]  ;;  %v2276_v40 = vrot.slane %v9082_v63, %v9016_v27 }
 0xfc2   :  { %8127 = vmatprep.subr.bf16.mxu1 %v8126_v35  ;;  %v3976_v35 = vld [vmem:[#allocation5 + $0xf78] sm:$0xff]  ;;  %v8112_v12 = vpack.c.bf16 %v3944_v6, %v3943_v3 }
 0xfc3   :  { %v8144_v16 = vpack.c.bf16 %v3976_v35, %v3975_v11  ;;  %v3445_v30 = vadd.f32 %v9096_v61, %v2276_v40 }
 0xfc4   :  { %8097 = vmatpush3.bf16.msra.mxu0 %v8096_v17 }
 0xfc5   :  { %8129 = vmatpush3.bf16.msra.mxu1 %v8128_v14  ;;  %8099 = vmatprep.subr.bf16.mxu0 %v8098_v22  ;;  %v3479_v27 = vmax.f32 %v3445_v30, 0.0 }
 0xfc6   :  { %8131 = vmatprep.subr.bf16.mxu1 %v8130_v24 }
 0xfc8   :  { %8101 = vmatpush3.bf16.msra.mxu0 %v8100_v28 }
 0xfc9   :  { %8133 = vmatpush3.bf16.msra.mxu1 %v8132_v32  ;;  %8103 = vmatprep.subr.bf16.mxu0 %v8102_v33 }
 0xfca   :  { %v5498_v44 = vpop.f32.mrb[40].mxu0  ;;  %8135 = vmatprep.subr.bf16.mxu1 %v8134_v39 }
 0xfcb   :  { %v5533_v49 = vpop.f32.mrb[40].mxu1  ;;  %v5499_v52 = vpop.f32.mrb[41].mxu0 }
 0xfcc   :  { %v5500_v1 = vadd.f32 %v5499_v52, %v5498_v44  ;;  %v5534_v60 = vpop.f32.mrb[41].mxu1  ;;  %8105 = vmatpush3.bf16.msra.mxu0 %v8104_v37 }
 0xfcd   :  { %v5535_v5 = vadd.f32 %v5534_v60, %v5533_v49  ;;  %8137 = vmatpush3.bf16.msra.mxu1 %v8136_v59  ;;  %8107 = vmatprep.subr.bf16.mxu0 %v8106_v47 }
 0xfce   :  { %v4067_v7 = vadd.f32 %v5500_v1, %v5143_v51  ;;  %8139 = vmatprep.subr.bf16.mxu1 %v8138_v58 }
 0xfd0   :  { %v4137_v0 = vadd.f32 %v5535_v5, %v4067_v7  ;;  %8109 = vmatpush3.bf16.msra.mxu0 %v8108_v2 }
 0xfd1   :  { %8141 = vmatpush3.bf16.msra.mxu1 %v8140_v10  ;;  %8111 = vmatprep.subr.bf16.mxu0 %v8110_v62 }
 0xfd2   :  { %8143 = vmatprep.subr.bf16.mxu1 %v8142_v20 }
 0xfd4   :  { %8113 = vmatpush3.bf16.msra.mxu0 %v8112_v12 }
 0xfd5   :  { %8145 = vmatpush3.bf16.msra.mxu1 %v8144_v16 }
 0xfd7   :  { %5045 = vmatmul.mubr.f32.vlgmr.msra.gmra.mrb[54].mxu0 %v3477_v31 }
 0xfd8   :  { %5115 = vmatmul.mubr.f32.vlgmr.msra.gmra.mrb[54].mxu1 %v3479_v27 }
 0xfea   :  { %v5568_v63 = vpop.f32.mrb[42].mxu0 }
 0xfeb   :  { %v5603_v17 = vpop.f32.mrb[42].mxu1  ;;  %v5569_v14 = vpop.f32.mrb[43].mxu0 }
 0xfec   :  { %v5570_v22 = vadd.f32 %v5569_v14, %v5568_v63  ;;  %v5604_v18 = vpop.f32.mrb[43].mxu1 }
 0xfed   :  { %v5605_v50 = vadd.f32 %v5604_v18, %v5603_v17 }
 0xfee   :  { %v4207_v19 = vadd.f32 %v5570_v22, %v4137_v0 }
 0xff0   :  { %v4277_v55 = vadd.f32 %v5605_v50, %v4207_v19 }
0x100a   :  { %v5638_v24 = vpop.f32.mrb[44].mxu0 }
0x100b   :  { %v5673_v34 = vpop.f32.mrb[44].mxu1  ;;  %v5639_v4 = vpop.f32.mrb[45].mxu0 }
0x100c   :  { %v5640_v25 = vadd.f32 %v5639_v4, %v5638_v24  ;;  %v5674_v61 = vpop.f32.mrb[45].mxu1 }
0x100d   :  { %v5675_v26 = vadd.f32 %v5674_v61, %v5673_v34 }
0x100e   :  { %v4347_v29 = vadd.f32 %v5640_v25, %v4277_v55 }
0x1010   :  { %v4417_v28 = vadd.f32 %v5675_v26, %v4347_v29 }
0x102a   :  { %v5708_v32 = vpop.f32.mrb[46].mxu0 }
0x102b   :  { %v5743_v33 = vpop.f32.mrb[46].mxu1  ;;  %v5709_v23 = vpop.f32.mrb[47].mxu0 }
0x102c   :  { %v5710_v9 = vadd.f32 %v5709_v23, %v5708_v32  ;;  %v5744_v43 = vpop.f32.mrb[47].mxu1 }
0x102d   :  { %v5745_v39 = vadd.f32 %v5744_v43, %v5743_v33 }
0x102e   :  { %v4487_v53 = vadd.f32 %v5710_v9, %v4417_v28 }
0x1030   :  { %v4557_v15 = vadd.f32 %v5745_v39, %v4487_v53 }
0x104a   :  { %v5778_v21 = vpop.f32.mrb[48].mxu0 }
0x104b   :  { %v5813_v46 = vpop.f32.mrb[48].mxu1  ;;  %v5779_v36 = vpop.f32.mrb[49].mxu0 }
0x104c   :  { %v5780_v37 = vadd.f32 %v5779_v36, %v5778_v21  ;;  %v5814_v59 = vpop.f32.mrb[49].mxu1 }
0x104d   :  { %v5815_v47 = vadd.f32 %v5814_v59, %v5813_v46 }
0x104e   :  { %v4627_v41 = vadd.f32 %v5780_v37, %v4557_v15 }
0x1050   :  { %v4697_v42 = vadd.f32 %v5815_v47, %v4627_v41 }
0x106a   :  { %v5848_v54 = vpop.f32.mrb[50].mxu0 }
0x106b   :  { %v5883_v44 = vpop.f32.mrb[50].mxu1  ;;  %v5849_v58 = vpop.f32.mrb[51].mxu0 }
0x106c   :  { %v5850_v8 = vadd.f32 %v5849_v58, %v5848_v54  ;;  %v5884_v45 = vpop.f32.mrb[51].mxu1 }
0x106d   :  { %v5885_v48 = vadd.f32 %v5884_v45, %v5883_v44 }
0x106e   :  { %v4767_v49 = vadd.f32 %v5850_v8, %v4697_v42 }
0x1070   :  { %v4837_v51 = vadd.f32 %v5885_v48, %v4767_v49 }
0x108a   :  { %v5918_v52 = vpop.f32.mrb[52].mxu0 }
0x108b   :  { %v5953_v56 = vpop.f32.mrb[52].mxu1  ;;  %v5919_v38 = vpop.f32.mrb[53].mxu0 }
0x108c   :  { %v5920_v57 = vadd.f32 %v5919_v38, %v5918_v52  ;;  %v5954_v1 = vpop.f32.mrb[53].mxu1 }
0x108d   :  { %v5955_v60 = vadd.f32 %v5954_v1, %v5953_v56 }
0x108e   :  { %v4907_v2 = vadd.f32 %v5920_v57, %v4837_v51 }
0x1090   :  { %v4977_v5 = vadd.f32 %v5955_v60, %v4907_v2 }
0x10aa   :  { %v5988_v10 = vpop.f32.mrb[54].mxu0 }
0x10ab   :  { %v6023_v62 = vpop.f32.mrb[54].mxu1  ;;  %v5989_v3 = vpop.f32.mrb[55].mxu0 }
0x10ac   :  { %v5990_v6 = vadd.f32 %v5989_v3, %v5988_v10  ;;  %v6024_v40 = vpop.f32.mrb[55].mxu1 }
0x10ad   :  { %v6025_v7 = vadd.f32 %v6024_v40, %v6023_v62 }
0x10ae   :  { %v5047_v20 = vadd.f32 %v5990_v6, %v4977_v5 }
0x10b0   :  { %v5117_v11 = vadd.f32 %v6025_v7, %v5047_v20 }
0x10b2   :  { %5120 = vst [vmem:[%s9125_s8] sm:$0xff] %v5117_v11 }
0x10b3   :  { %5125 = vsyncpa [#allocation8], 1 }
0x10b4   :  { %5126 = vsyncpa [#allocation10], 1 }
0x10b5   :  { %5127 = vsyncpa [#allocation13], 1 }
0x10b6   :  { %5128 = vsyncmov [#allocation6] }
0x10b9   :  { %s5129_s18 = vpop.sfrf %5128 }
0x10ba   :  { %p5144_p0 = scmp.ne.s32.totalorder %s5129_s18, 0 }
0x10bc   :  { %5133 = shalt.err (%p5144_p0)  }
0x10bd   :  { %5135 = vsyncmov [#allocation6 + $0x1] }
0x10c0   :  { %s5136_s9 = vpop.sfrf %5135 }
0x10c1   :  { %p5145_p1 = scmp.ne.s32.totalorder %s5136_s9, 0 }
0x10c3   :  { %5140 = shalt.err (%p5145_p1)  }

</bundles_post_ra>
